<compile_context>
chip_gen: v5e
topology: v5e:2x2
jax: 0.10.0
libtpu: 0.0.40
codegen_flags: <defaults>
</compile_context>

<pallas_src>
import jax
import jax.numpy as jnp
from jax.experimental import pallas as pl
from jax.experimental.pallas import tpu as pltpu

FEAT = 2048                 # ResNeXt101 avg-pool output channels
N_FREQ = 3                  # for i in range(3): sin(2**i x), cos(2**i x)
KBLK = 2 * FEAT             # 4096 rows of weight per frequency ([sin_f | cos_f])
EXPANDED = FEAT * 2 * N_FREQ  # 12288 == Linear in_features
OUT = 100                   # Linear out_features
OUT_PAD = 128               # lane-dense padded output width


def head_kernel(x_ref, w_ref, b_ref, o_ref, sc_ref):
    """One (batch-tile, frequency) step of the fused sin/cos + Linear head.

    Grid: (M tiles, N_FREQ). Axis 1 (frequency) is the reduction axis; the
    output block index is constant over it, so o_ref stays resident and is
    used directly as the accumulator.

    x_ref:  (Bt, FEAT)       f32   backbone features (resident across f)
    w_ref:  (KBLK, OUT_PAD)  bf16  weight rows [sin_f | cos_f] (pre-transposed)
    b_ref:  (1, OUT_PAD)     f32   padded bias
    o_ref:  (Bt, OUT_PAD)    f32   padded logits / accumulator
    sc_ref: (Bt, KBLK)       bf16  staging slab [sin(2^f x) | cos(2^f x)]
    """
    f = pl.program_id(1)

    # scale = 2**f via an integer shift on the scalar unit (no transcendental).
    scale = jnp.left_shift(1, f).astype(jnp.float32)

    xs = x_ref[...] * scale
    # EUP sin/cos each step (EUP is otherwise idle; kernel is weight-DMA bound).
    # f32 math; cast to bf16 only when staging the MXU operand.
    sc_ref[:, :FEAT] = jnp.sin(xs).astype(jnp.bfloat16)
    sc_ref[:, FEAT:] = jnp.cos(xs).astype(jnp.bfloat16)

    @pl.when(f == 0)
    def _():
        # Initialize the resident output block with the broadcast (padded) bias.
        o_ref[...] = jnp.broadcast_to(b_ref[...], o_ref.shape)

    # Dropout(p=0.7) is identity at inference time (module.eval()).
    o_ref[...] += jnp.dot(sc_ref[...], w_ref[...],
                          preferred_element_type=jnp.float32)


def prepare_head_params(weight, bias):
    """One-time (model-load-time) parameter prep — NOT in the per-call hot path.

    weight: (OUT, EXPANDED) f32 torch layout; bias: (OUT,) f32.
    Returns bf16 (EXPANDED, OUT_PAD) weight and f32 (1, OUT_PAD) bias,
    zero-padded in the extra output lanes. torch.cat order keeps the sin_f /
    cos_f weight rows contiguous, so frequency block f is rows
    [f*4096 : (f+1)*4096].
    """
    w_prep = jnp.zeros((EXPANDED, OUT_PAD), jnp.bfloat16)
    w_prep = w_prep.at[:, :OUT].set(weight.T.astype(jnp.bfloat16))
    b_prep = jnp.zeros((1, OUT_PAD), jnp.float32).at[0, :OUT].set(bias)
    return w_prep, b_prep


def _round_up(x, m):
    return ((x + m - 1) // m) * m


def custom_model_head(features, w_prep, b_prep, *, max_batch_tile=256):
    """features: (B, FEAT) f32; w_prep/b_prep from prepare_head_params."""
    B = features.shape[0]
    # Batch tile: at least 8 rows (f32 sublane multiple), capped so that
    # x (f32) + bf16 staging slab + double-buffered 1 MiB weight block stays
    # far below the 16 MiB (v5e) scoped-VMEM default.
    bt = min(max_batch_tile, _round_up(max(B, 8), 8))
    b_pad = _round_up(B, bt)
    if b_pad != B:
        features = jnp.pad(features, ((0, b_pad - B), (0, 0)))

    out_pad = pl.pallas_call(
        head_kernel,
        out_shape=jax.ShapeDtypeStruct((b_pad, OUT_PAD), jnp.float32),
        grid_spec=pltpu.PrefetchScalarGridSpec(
            num_scalar_prefetch=0,
            grid=(b_pad // bt, N_FREQ),            # reduction axis last
            in_specs=[
                pl.BlockSpec((bt, FEAT), lambda m, f: (m, 0)),        # resident x
                pl.BlockSpec((KBLK, OUT_PAD), lambda m, f: (f, 0)),   # K-tiled W
                pl.BlockSpec((1, OUT_PAD), lambda m, f: (0, 0)),      # bias
            ],
            out_specs=pl.BlockSpec((bt, OUT_PAD), lambda m, f: (m, 0)),
            scratch_shapes=[
                pltpu.VMEM((bt, KBLK), jnp.bfloat16),  # [sin | cos] staging slab
            ],
        ),
        compiler_params=pltpu.CompilerParams(
            dimension_semantics=("parallel", "arbitrary"),
        ),
    )(features, w_prep, b_prep)
    return out_pad[:B, :OUT]


def reference_head(features, weight, bias):
    feats = []
    for i in range(N_FREQ):
        s = (2.0 ** i) * features
        feats.append(jnp.sin(s))
        feats.append(jnp.cos(s))
    z = jnp.concatenate(feats, axis=1)
    return z @ weight.T + bias


if __name__ == "__main__":
    key = jax.random.PRNGKey(0)
    k_x, k_w, k_b = jax.random.split(key, 3)

    batch = 2
    # Deterministic synthetic post-backbone features (what flatten() produces).
    features = jax.random.normal(k_x, (batch, FEAT), dtype=jnp.float32)

    # nn.Linear(12288, 100) default init: U(-bound, bound), bound = 1/sqrt(fan_in)
    bound = 1.0 / (EXPANDED ** 0.5)
    weight = jax.random.uniform(k_w, (OUT, EXPANDED), jnp.float32, -bound, bound)
    bias = jax.random.uniform(k_b, (OUT,), jnp.float32, -bound, bound)

    # One-time weight prep (model-load-time cost, not per call).
    w_prep, b_prep = prepare_head_params(weight, bias)
    w_prep, b_prep = jax.block_until_ready((w_prep, b_prep))

    out = custom_model_head(features, w_prep, b_prep)
    out = jax.block_until_ready(out)

    ref = reference_head(features, weight, bias)
    assert out.shape == (batch, OUT)
    # bf16 weight/activation in the MXU (f32 accumulation) -> looser tolerance.
    assert jnp.allclose(out, ref, atol=2e-2, rtol=2e-2), "mismatch vs reference"

    print("KERNEL_OK")
</pallas_src>

<mosaic_0001>
module attributes {stable_mosaic.version = 11 : i64} {
  func.func @head_kernel(%arg0: i32, %arg1: i32, %arg2: memref<8x2048xf32, #tpu.memory_space<vmem>>, %arg3: memref<4096x128xbf16, #tpu.memory_space<vmem>>, %arg4: memref<1x128xf32, #tpu.memory_space<vmem>>, %arg5: memref<8x128xf32, #tpu.memory_space<vmem>>, %arg6: memref<8x4096xbf16, #tpu.memory_space<vmem>>) attributes {dimension_semantics = [#tpu.dimension_semantics<parallel>, #tpu.dimension_semantics<arbitrary>], iteration_bounds = array<i64: 1, 3>, scalar_prefetch = 0 : i64, scratch_operands = 1 : i64, tpu.core_type = #tpu.core_type<tc>, window_params = [{transform_indices = @transform_0, window_bounds = array<i64: 8, 2048>}, {transform_indices = @transform_1, window_bounds = array<i64: 4096, 128>}, {pipeline_mode = #tpu.pipeline_mode<synchronous>, transform_indices = @transform_2, window_bounds = array<i64: 1, 128>}, {transform_indices = @transform_3, window_bounds = array<i64: 8, 128>}]} {
    %c1_i32 = arith.constant 1 : i32
    %0 = arith.shli %c1_i32, %arg1 : i32
    %1 = arith.sitofp %0 : i32 to f32
    %c0 = arith.constant 0 : index
    %c0_0 = arith.constant 0 : index
    %2 = vector.load %arg2[%c0, %c0_0] : memref<8x2048xf32, #tpu.memory_space<vmem>>, vector<8x2048xf32>
    %3 = vector.broadcast %1 : f32 to vector<8x2048xf32>
    %4 = arith.mulf %2, %3 : vector<8x2048xf32>
    %5 = math.sin %4 : vector<8x2048xf32>
    %6 = arith.truncf %5 : vector<8x2048xf32> to vector<8x2048xbf16>
    %c0_1 = arith.constant 0 : index
    %c0_2 = arith.constant 0 : index
    %7 = vector.load %arg6[%c0_1, %c0_2] : memref<8x4096xbf16, #tpu.memory_space<vmem>>, vector<8x2048xbf16>
    tpu.vector_store %arg6[%c0_1, %c0_2], %6 {strides = array<i32>} : memref<8x4096xbf16, #tpu.memory_space<vmem>>, vector<8x2048xbf16>,
    %8 = math.cos %4 : vector<8x2048xf32>
    %9 = arith.truncf %8 : vector<8x2048xf32> to vector<8x2048xbf16>
    %c0_3 = arith.constant 0 : index
    %c2048 = arith.constant 2048 : index
    %10 = vector.load %arg6[%c0_3, %c2048] : memref<8x4096xbf16, #tpu.memory_space<vmem>>, vector<8x2048xbf16>
    tpu.vector_store %arg6[%c0_3, %c2048], %9 {strides = array<i32>} : memref<8x4096xbf16, #tpu.memory_space<vmem>>, vector<8x2048xbf16>,
    %c0_i32 = arith.constant 0 : i32
    %11 = arith.cmpi eq, %arg1, %c0_i32 : i32
    %12 = arith.extui %11 : i1 to i32
    %c0_i32_4 = arith.constant 0 : i32
    %13 = arith.cmpi ne, %12, %c0_i32_4 : i32
    scf.if %13 {
      %c0_13 = arith.constant 0 : index
      %c0_14 = arith.constant 0 : index
      %20 = vector.load %arg4[%c0_13, %c0_14] : memref<1x128xf32, #tpu.memory_space<vmem>>, vector<1x128xf32>
      %21 = vector.shape_cast %20 : vector<1x128xf32> to vector<1x128xf32>
      %22 = vector.broadcast %21 : vector<1x128xf32> to vector<8x128xf32>
      %c0_15 = arith.constant 0 : index
      %c0_16 = arith.constant 0 : index
      %23 = vector.load %arg5[%c0_15, %c0_16] : memref<8x128xf32, #tpu.memory_space<vmem>>, vector<8x128xf32>
      tpu.vector_store %arg5[%c0_15, %c0_16], %22 {strides = array<i32>} : memref<8x128xf32, #tpu.memory_space<vmem>>, vector<8x128xf32>,
    } else {
    }
    %c0_5 = arith.constant 0 : index
    %c0_6 = arith.constant 0 : index
    %14 = vector.load %arg5[%c0_5, %c0_6] : memref<8x128xf32, #tpu.memory_space<vmem>>, vector<8x128xf32>
    %c0_7 = arith.constant 0 : index
    %c0_8 = arith.constant 0 : index
    %15 = vector.load %arg6[%c0_7, %c0_8] : memref<8x4096xbf16, #tpu.memory_space<vmem>>, vector<8x4096xbf16>
    %c0_9 = arith.constant 0 : index
    %c0_10 = arith.constant 0 : index
    %16 = vector.load %arg3[%c0_9, %c0_10] : memref<4096x128xbf16, #tpu.memory_space<vmem>>, vector<4096x128xbf16>
    %cst = arith.constant dense<0.000000e+00> : vector<8x128xf32>
    %17 = tpu.matmul %15, %16, %cst {dimension_numbers = #tpu.dot_dimension_numbers<[1], [0], [0], [1], [0, 0, 1, 1], [], []>} : vector<8x4096xbf16>, vector<4096x128xbf16>, vector<8x128xf32> -> vector<8x128xf32>
    %18 = arith.addf %14, %17 : vector<8x128xf32>
    %c0_11 = arith.constant 0 : index
    %c0_12 = arith.constant 0 : index
    %19 = vector.load %arg5[%c0_11, %c0_12] : memref<8x128xf32, #tpu.memory_space<vmem>>, vector<8x128xf32>
    tpu.vector_store %arg5[%c0_11, %c0_12], %18 {strides = array<i32>} : memref<8x128xf32, #tpu.memory_space<vmem>>, vector<8x128xf32>,
    return
  }
  func.func @transform_0(%arg0: i32, %arg1: i32) -> (i32, i32) {
    %c0_i32 = arith.constant 0 : i32
    %c0_i32_0 = arith.constant 0 : i32
    return %arg0, %c0_i32 : i32, i32
  }
  func.func @transform_1(%arg0: i32, %arg1: i32) -> (i32, i32) {
    %c0_i32 = arith.constant 0 : i32
    %c0_i32_0 = arith.constant 0 : i32
    return %arg1, %c0_i32 : i32, i32
  }
  func.func @transform_2(%arg0: i32, %arg1: i32) -> (i32, i32) {
    %c0_i32 = arith.constant 0 : i32
    %c0_i32_0 = arith.constant 0 : i32
    %c0_i32_1 = arith.constant 0 : i32
    return %c0_i32, %c0_i32_0 : i32, i32
  }
  func.func @transform_3(%arg0: i32, %arg1: i32) -> (i32, i32) {
    %c0_i32 = arith.constant 0 : i32
    %c0_i32_0 = arith.constant 0 : i32
    return %arg0, %c0_i32 : i32, i32
  }
}

</mosaic_0001>

<bundles_post_ra>
// kernel: tpu_custom_call.1
= control target key start
LH: loop header
LB: loop body
LE: loop exit
PB: predicated region body
PF: predicated region fallthrough
CT: control target
= control target key end

     0   :  { %8 = vsyncpa [#allocation4], 0  ;;  %s13055_s0 = inlined_call_operand.hbm [shape: f32[8,2048], index: 0, kind: input, shape index: {}]   ;;  %s13056_s1 = inlined_call_operand.hbm [shape: bf16[12288,128], index: 1, kind: input, shape index: {}]   ;;  %s13057_s2 = inlined_call_operand.hbm [shape: f32[1,128], index: 2, kind: input, shape index: {}]   ;;  %s13058_s3 = inlined_call_operand.hbm [shape: f32[8,128], index: 3, kind: output, shape index: {}]  }
   0x1   :  { %9 = vsyncpa [#allocation7], 0 }
   0x2   :  { %11 = vsyncpa [#allocation7 + $0x1], 0 }
   0x3   :  { %12 = vsyncpa [#allocation5], 0  ;;  %s9647_s12 = smov 0   ;;  %s9649_s13 = smov 0  }
   0x4   :  { %s9651_s14 = smov 0   ;;  %s9653_s15 = smov 0  }
   0x5   :  { %s9655_s16 = smov 0   ;;  %s9657_s17 = smov 0  }
   0x6 LB: > { %s9676_s18 = sadd.s32 4294967295, %s9612_s17   ;;  %s63_s19 = sadd.s32 1, %s9600_s14  ;;  %s9612_s17 = sphi %s9657_s17, %s18_s17   ;;  %s9608_s16 = sphi %s9655_s16, %s13435_s16   ;;  %s9604_s15 = sphi %s9653_s15, %s13434_s15   ;;  %s9600_s14 = sphi %s9651_s14, %s13433_s14   ;;  %s9596_s13 = sphi %s9649_s13, %s13432_s13   ;;  %s9592_s12 = sphi %s9647_s12, %s13431_s12  }
   0x7   : > { %p70_p0 = scmp.ne.s32.totalorder %s9600_s14, %s9596_s13  ;;  %p71_p1 = scmp.eq.s32.totalorder %s9612_s17, 0 }
   0x8   : > { %p76_p2 = scmp.ne.s32.totalorder %s9596_s13, %s9592_s12  ;;  %p77_p3 = scmp.eq.s32.totalorder %s9676_s18, 0 }
   0x9   : > { %p9684_p4 = por %p71_p1, %p70_p0  ;;  %p7945_p5 = scmp.ge.s32.totalorder %s9612_s17, 1 }
   0xa   : > { %p9691_p6 = por %p77_p3, %p76_p2  ;;  %p134_p7 = scmp.lt.s32.totalorder %s9612_s17, 4 }
   0xb   : > { %s161_s24 = sshll.u32 %s13057_s2, 4  ;;  %s9614_s26 = smov [#allocation8]   ;;  %s162_s24 = int_to_ptr.hbm [resolvable:$true] %s161_s24 }
   0xc   : > { %p9699_p8 = pnand %p7945_p5, %p134_p7  ;;  %s163_s27 = sshll.u32 %s9614_s26, 4  ;;  %s164_s27 = int_to_ptr.vmem [resolvable:$true] %s163_s27 }
   0xd   : > { %p9365_p10 = scmp.lt.s32.totalorder %s9612_s17, 3  ;;  %s149_s4 = sshll.u32 %s13055_s0, 4  ;;  %s150_s4 = int_to_ptr.hbm [resolvable:$true] %s149_s4 }
   0xe   : > { %p9352_p9 = pneg %p9699_p8  ;;  %s9615_s5 = smov [#allocation3]  }
   0xf   : > { %p9710_p12 = pnand %p9365_p10, %p9684_p4  ;;  %s151_s6 = sshll.u32 %s9615_s5, 4  ;;  %s152_s6 = int_to_ptr.vmem [resolvable:$true] %s151_s6 }
  0x10   : > { %p9353_p11 = pnand %p9352_p9, %p77_p3  ;;  %s27_s7 = sadd.s32 1, %s9608_s16 }
  0x11   : > { %p28_p13 = scmp.ge.s32.totalorder %s27_s7, 3  ;;  %s174_s8 = sand.u32 1, %s9612_s17  }
  0x12   : > { %9358 = dma.hbm_to_vmem [thread:$0]  (!%p9353_p11), %s162_s24, 16, %s164_s27, [#allocation7]  }
  0x13   : > { %9355 = dma.hbm_to_vmem [thread:$0]  (!%p9353_p11), %s150_s4, 2048, %s152_s6, [#allocation4]  }
  0x14   : > { %s176_s9 = sand.u32 1, %s9600_s14   ;;  %s13437_s7 = smov (%p28_p13, %s27_s7), 0 }
  0x15   : > { %s7949_s10 = sshll.u32 %s176_s9, 11  ;;  %s9081_s11 = sshll.u32 %s9608_s16, 11 }
  0x16   : > { %s60_s12 = ssub.s32 %s9608_s16, %s13437_s7  ;;  %s183_s23 = scalar_lea.hbm %s13056_s1, %s9081_s11 }
  0x17   : > { %p61_p0 = scmp.eq.s32.totalorder %s60_s12, 0  ;;  %s184_s24 = sshll.u32 %s183_s23, 4  ;;  %s185_s24 = int_to_ptr.hbm [resolvable:$true] %s184_s24 }
  0x18   : > { %s178_s26 = scalar_lea.vmem [#allocation6], %s7949_s10  ;;  %s175_s30 = scalar_lea.sflag [#allocation7], %s174_s8 }
  0x19   : > { %s186_s27 = sshll.u32 %s178_s26, 4  ;;  %s9616_s4 = smov 64   ;;  %s187_s27 = int_to_ptr.vmem [resolvable:$true] %s186_s27 }
  0x1a   : > { %s9731_s29 = scalar_select %p61_p0, %s9600_s14, %s63_s19  }
  0x1b   : > { %s9617_s5 = smov 4   ;;  %198 = sbr.rel (%p9699_p8) target bundleno = 1108 (0x454), region = 32 }
  0x1c   : > { %9362 = dma.hbm_to_vmem [thread:$0]  (!%p9710_p12), %s185_s24, 32768, %s187_s27, %s175_s30, %s9616_s4, %s9616_s4, %s9617_s5  }
  0x20   : > { %9575 = dma.done.wait (%p77_p3), [#allocation4], 2048  }
  0x21   : > { %9577 = vsyncadd (%p77_p3), [#allocation4], 4294965248  ;;  %s205_s19 = sand.u32 1, %s9676_s18   ;;  %s207_s6 = sand.u32 1, %s9596_s13  }
  0x22   : > { %s7954_s9 = sshll.u32 %s207_s6, 11  ;;  %s206_s8 = scalar_lea.sflag [#allocation7], %s205_s19 }
  0x23   : > { %s9743_s10 = scalar_lea.vmem [#allocation6], %s7954_s9 }
  0x24   : > { %9579 = dma.done.wait (%p9691_p6), %s206_s8, 32768  }
  0x25   : > { %9581 = vsyncadd (%p9691_p6), %s206_s8, 4294934528 }
  0x26   : > { %9583 = dma.done.wait (%p77_p3), [#allocation7], 16  }
  0x27   : > { %9585 = vsyncadd (%p77_p3), [#allocation7], 4294967280  ;;  %s9618_s25 = smov 1   ;;  %v236_v1 = vld [vmem:[#allocation3] sm:$0xff]  ;;  %v237_v2 = vld [vmem:[#allocation3 + $0x8] sm:$0xff]  ;;  %p8052_p1 = scmp.ne.s32.totalorder %s9604_s15, 0 }
  0x28   : > { %s234_s28 = sshll.u32 %s9618_s25, %s9604_s15  ;;  %v13074_v19 = vmov 683565275   ;;  %v13070_v21 = vmov 2475754826   ;;  %v13064_v23 = vmov 2131351028  }
  0x29   : > { %s235_s11 = scvt.s32.f32 %s234_s28  ;;  %v13066_v25 = vmov 2102212464   ;;  %v13072_v27 = vmov 920167782   ;;  %v13076_v34 = vmov 1326507024  }
  0x2a   : > { %v238_v59 = vld [vmem:[#allocation3 + $0x10] sm:$0xff] }
  0x2b   : > { %v9754_v0 = vstv %s235_s11 }
  0x2c   : > { %v9757_v3 = vmul.f32 %v9754_v0, %v236_v1  ;;  %v9760_v4 = vmul.f32 %v9754_v0, %v237_v2 }
  0x2e   : > { %13204 = vst [vmem:[#allocation14_spill] sm:$0xff] %v9757_v3  ;;  %v272_v5 = vand.u32 2139095040, %v9757_v3  ;;  %v269_v6 = vand.u32 2147483647, %v9757_v3  ;;  %v427_v8 = vand.u32 2139095040, %v9760_v4 }
  0x2f   : > { %13205 = vst [vmem:[#allocation15_spill] sm:$0xff] %v9760_v4 }
  0x30   : > { %v273_v7 = vshrl.u32 %v272_v5, 23  ;;  %v276_v10 = vand.u32 8388607, %v269_v6  ;;  %v428_v12 = vshrl.u32 %v427_v8, 23 }
  0x32   : > { %v7956_v9 = vadd.s32 4294967169, %v273_v7  ;;  %v277_v14 = vor.u32 8388608, %v276_v10  ;;  %v7959_v17 = vadd.s32 4294967169, %v428_v12  ;;  %v9829_v7 = vmul.f32 %v9754_v0, %v238_v59 }
  0x34   : > { %v279_v11 = vadd.s32 1, %v7956_v9  ;;  %v9782_v32 = vshll.u32 %v277_v14, 8  ;;  %v434_v36 = vadd.s32 1, %v7959_v17  ;;  %13206 = vst [vmem:[#allocation16_spill] sm:$0xff] %v9829_v7 }
  0x36   : > { %vm280_vm0 = vcmp.gt.s32.totalorder %v279_v11, 0  ;;  %v318_v46 = vand.u32 65535, %v9782_v32  ;;  %v319_v49 = vshrl.u32 %v9782_v32, 16  ;;  %vm435_vm5 = vcmp.gt.s32.totalorder %v434_v36, 0 }
  0x37   : > { %v281_v13 = vsel %vm280_vm0, %v279_v11, 0  ;;  %v436_v56 = vsel %vm435_vm5, %v434_v36, 0 }
  0x38   : > { %v283_v15 = vand.u32 31, %v281_v13  ;;  %v9767_v16 = vshrl.u32 %v281_v13, 5  ;;  %v438_v2 = vand.u32 31, %v436_v56 }
  0x3a   : > { %v9769_v18 = vsub.s32 32, %v283_v15  ;;  %v286_v20 = vshll.u32 %v13074_v19, %v283_v15  ;;  %v289_v22 = vshll.u32 %v13070_v21, %v283_v15  ;;  %v292_v24 = vshll.u32 %v13064_v23, %v283_v15 }
  0x3b   : > { %v295_v26 = vshll.u32 %v13066_v25, %v283_v15  ;;  %v298_v28 = vshll.u32 %v13072_v27, %v283_v15  ;;  %vm301_vm1 = vcmp.lt.s32.totalorder %v9767_v16, 1  ;;  %vm304_vm2 = vcmp.lt.s32.totalorder %v9767_v16, 4 }
  0x3c   : > { %v287_v29 = vshrl.u32 %v13070_v21, %v9769_v18  ;;  %v290_v30 = vshrl.u32 %v13064_v23, %v9769_v18  ;;  %v293_v31 = vshrl.u32 %v13066_v25, %v9769_v18  ;;  %v296_v33 = vshrl.u32 %v13072_v27, %v9769_v18 }
  0x3d   : > { %v299_v35 = vshrl.u32 %v13076_v34, %v9769_v18  ;;  %vm303_vm3 = vcmp.lt.s32.totalorder %v9767_v16, 3  ;;  %vm302_vm4 = vcmp.lt.s32.totalorder %v9767_v16, 2  ;;  %v9833_v13 = vsub.s32 32, %v438_v2 }
  0x3e   : > { %v9789_v37 = vor.u32 %v287_v29, %v286_v20  ;;  %v9791_v38 = vor.u32 %v290_v30, %v289_v22  ;;  %v9793_v39 = vor.u32 %v293_v31, %v292_v24  ;;  %v297_v40 = vor.u32 %v296_v33, %v295_v26 }
  0x3f   : > { %v300_v41 = vor.u32 %v299_v35, %v298_v28  ;;  %v13061_v15 = vmov 0   ;;  %v13068_v20 = vand.u32 2147483647, %v9760_v4  ;;  %v582_v24 = vand.u32 2139095040, %v9829_v7 }
  0x40   : > { %v309_v42 = vsel %vm301_vm1, %v9789_v37, %v9791_v38  ;;  %v313_v43 = vsel %vm301_vm1, %v9791_v38, %v9793_v39  ;;  %v310_v44 = vsel %vm304_vm2, %v297_v40, 920167782  ;;  %v453_v28 = vshll.u32 %v13072_v27, %v438_v2 }
  0x41   : > { %v314_v45 = vsel %vm304_vm2, %v300_v41, 1326507024  ;;  %v311_v47 = vsel %vm303_vm3, %v9793_v39, %v310_v44  ;;  %v454_v29 = vshrl.u32 %v13076_v34, %v9833_v13  ;;  %v431_v33 = vand.u32 8388607, %v13068_v20 }
  0x42   : > { %v315_v48 = vsel %vm303_vm3, %v297_v40, %v314_v45  ;;  %v312_v50 = vsel %vm302_vm4, %v309_v42, %v311_v47  ;;  %v9847_v35 = vshrl.u32 %v436_v56, 5  ;;  %v450_v40 = vshll.u32 %v13066_v25, %v438_v2 }
  0x43   : > { %v316_v51 = vsel %vm302_vm4, %v313_v43, %v315_v48  ;;  %v342_v54 = vand.u32 65535, %v312_v50  ;;  %v343_v55 = vshrl.u32 %v312_v50, 16  ;;  %v451_v41 = vshrl.u32 %v13072_v27, %v9833_v13 }
  0x44   : > { %v320_v52 = vand.u32 65535, %v316_v51  ;;  %v321_v53 = vshrl.u32 %v316_v51, 16  ;;  %v583_v42 = vshrl.u32 %v582_v24, 23  ;;  %v444_v43 = vshll.u32 %v13070_v21, %v438_v2 }
  0x45   : > { %v344_v61 = vmul.u32 %v342_v54, %v318_v46  ;;  %v345_v62 = vmul.u32 %v343_v55, %v318_v46  ;;  %v9825_v63 = vmul.u32 %v342_v54, %v319_v49  ;;  %v347_v12 = vmul.u32 %v343_v55, %v319_v49 }
  0x46   : > { %v9821_v57 = vmul.u32 %v321_v53, %v318_v46  ;;  %v9823_v58 = vmul.u32 %v320_v52, %v319_v49  ;;  %v322_v60 = vmul.u32 %v320_v52, %v318_v46  ;;  %v325_v14 = vmul.u32 %v321_v53, %v319_v49 }
  0x47   : > { %v348_v5 = vshll.u32 %v345_v62, 16  ;;  %v350_v9 = vshll.u32 %v9825_v63, 16  ;;  %v445_v44 = vshrl.u32 %v13064_v23, %v9833_v13  ;;  %v447_v45 = vshll.u32 %v13064_v23, %v438_v2 }
  0x48   : > { %v326_v1 = vshll.u32 %v9821_v57, 16  ;;  %v328_v8 = vshll.u32 %v9823_v58, 16  ;;  %v448_v46 = vshrl.u32 %v13066_v25, %v9833_v13  ;;  %v349_v47 = vshrl.u32 %v345_v62, 16 }
  0x49   : > { %vm352_vm7 = vc.u32 %v344_v61, %v348_v5  ;;  %v354_v11 = vadd.s32 %v348_v5, %v344_v61  ;;  %v441_v49 = vshll.u32 %v13074_v19, %v438_v2  ;;  %v455_v50 = vor.u32 %v454_v29, %v453_v28 }
  0x4a   : > { %vm330_vm6 = vc.u32 %v322_v60, %v326_v1  ;;  %v332_v10 = vadd.s32 %v326_v1, %v322_v60  ;;  %v353_v17 = vsel %vm352_vm7, 1, %v13061_v15  ;;  %v327_v51 = vshrl.u32 %v9821_v57, 16 }
  0x4b   : > { %v331_v22 = vsel %vm330_vm6, 1, %v13061_v15  ;;  %vm356_vm8 = vc.u32 %v354_v11, %v350_v9  ;;  %v355_v26 = vadd.s32 %v353_v17, %v347_v12  ;;  %v442_v53 = vshrl.u32 %v13070_v21, %v9833_v13 }
  0x4c   : > { %vm334_vm9 = vc.u32 %v332_v10, %v328_v8  ;;  %v333_v30 = vadd.s32 %v331_v22, %v325_v14  ;;  %v357_v31 = vsel %vm356_vm8, 1, %v13061_v15  ;;  %vm459_vm10 = vcmp.lt.s32.totalorder %v9847_v35, 4 }
  0x4d   : > { %v335_v36 = vsel %vm334_vm9, 1, %v13061_v15  ;;  %v359_v48 = vadd.s32 %v357_v31, %v355_v26  ;;  %v432_v54 = vor.u32 8388608, %v431_v33  ;;  %v452_v55 = vor.u32 %v451_v41, %v450_v40 }
  0x4e   : > { %v337_v52 = vadd.s32 %v335_v36, %v333_v30  ;;  %v7962_v56 = vadd.s32 4294967169, %v583_v42  ;;  %v285_v59 = vshrl.u32 %v13074_v19, %v9769_v18  ;;  %v351_v60 = vshrl.u32 %v9825_v63, 16 }
  0x4f   : > { %v9867_v61 = vor.u32 %v445_v44, %v444_v43  ;;  %v9869_v62 = vor.u32 %v448_v46, %v447_v45  ;;  %v360_v1 = vadd.s32 %v359_v48, %v349_v47  ;;  %vm456_vm11 = vcmp.lt.s32.totalorder %v9847_v35, 1 }
  0x50   : > { %vm458_vm12 = vcmp.lt.s32.totalorder %v9847_v35, 3  ;;  %v469_v57 = vsel %vm459_vm10, %v455_v50, 1326507024  ;;  %v306_v2 = vsel %vm304_vm2, %v9793_v39, 2102212464  ;;  %v329_v18 = vshrl.u32 %v9823_v58, 16 }
  0x51   : > { %v338_v5 = vadd.s32 %v337_v52, %v327_v51  ;;  %v9879_v8 = vor.u32 %v442_v53, %v441_v49  ;;  %v465_v10 = vsel %vm459_vm10, %v452_v55, 920167782  ;;  %vm457_vm13 = vcmp.lt.s32.totalorder %v9847_v35, 2 }
  0x52   : > { %v468_v12 = vsel %vm456_vm11, %v9867_v61, %v9869_v62  ;;  %v470_v14 = vsel %vm458_vm12, %v452_v55, %v469_v57  ;;  %v9890_v17 = vshll.u32 %v432_v54, 8  ;;  %v305_v39 = vsel %vm301_vm1, %v285_v59, %v9789_v37 }
  0x53   : > { %v307_v58 = vsel %vm303_vm3, %v9791_v38, %v306_v2  ;;  %v361_v22 = vadd.s32 %v360_v1, %v351_v60  ;;  %v589_v24 = vadd.s32 1, %v7962_v56  ;;  %v9898_v26 = vadd.s32 %v338_v5, %v329_v18 }
  0x54   : > { %v9902_v28 = vadd.s32 %v354_v11, %v350_v9  ;;  %v464_v29 = vsel %vm456_vm11, %v9879_v8, %v9867_v61  ;;  %v466_v37 = vsel %vm458_vm12, %v9869_v62, %v465_v10  ;;  %v471_v38 = vsel %vm457_vm13, %v468_v12, %v470_v14 }
  0x55   : > { %v308_v30 = vsel %vm302_vm4, %v305_v39, %v307_v58  ;;  %v365_v31 = vadd.s32 1, %v361_v22  ;;  %v467_v63 = vsel %vm457_vm13, %v464_v29, %v466_v37  ;;  %vm590_vm14 = vcmp.gt.s32.totalorder %v589_v24, 0 }
  0x56   : > { %vm364_vm15 = vc.u32 %v9898_v26, %v9902_v28  ;;  %v473_v9 = vand.u32 65535, %v9890_v17  ;;  %v476_v11 = vshrl.u32 %v471_v38, 16  ;;  %v362_v33 = vmul.u32 %v9782_v32, %v308_v30 }
  0x57   : > { %v498_v36 = vshrl.u32 %v467_v63, 16  ;;  %v591_v40 = vsel %vm590_vm14, %v589_v24, 0  ;;  %v366_v41 = vsel %vm364_vm15, %v365_v31, %v361_v22  ;;  %v475_v42 = vand.u32 65535, %v471_v38 }
  0x58   : > { %v9921_v43 = vmul.u32 %v476_v11, %v473_v9  ;;  %v474_v16 = vshrl.u32 %v9890_v17, 16  ;;  %v593_v44 = vand.u32 31, %v591_v40  ;;  %v367_v45 = vadd.s32 %v366_v41, %v362_v33 }
  0x59   : > { %v497_v46 = vand.u32 65535, %v467_v63  ;;  %v9924_v47 = vmul.u32 %v498_v36, %v473_v9  ;;  %v477_v48 = vmul.u32 %v475_v42, %v473_v9  ;;  %v13060_v50 = vand.u32 2147483647, %v9829_v7 }
  0x5a   : > { %v481_v49 = vshll.u32 %v9921_v43, 16  ;;  %v9928_v51 = vmul.u32 %v475_v42, %v474_v16  ;;  %v9930_v32 = vsub.s32 32, %v593_v44  ;;  %v368_v52 = vadd.s32 536870912, %v367_v45 }
  0x5b   : > { %v499_v53 = vmul.u32 %v497_v46, %v473_v9  ;;  %v503_v54 = vshll.u32 %v9924_v47, 16  ;;  %v9933_v55 = vmul.u32 %v497_v46, %v474_v16  ;;  %v502_v56 = vmul.u32 %v498_v36, %v474_v16 }
  0x5c   : > { %vm485_vm0 = vc.u32 %v477_v48, %v481_v49  ;;  %v586_v59 = vand.u32 8388607, %v13060_v50  ;;  %v9937_v60 = vshrl.u32 %v591_v40, 5  ;;  %v480_v1 = vmul.u32 %v476_v11, %v474_v16 }
  0x5d   : > { %v483_v57 = vshll.u32 %v9928_v51, 16  ;;  %v608_v2 = vshll.u32 %v13072_v27, %v593_v44  ;;  %v609_v18 = vshrl.u32 %v13076_v34, %v9930_v32  ;;  %v9943_v5 = vshrl.u32 %v368_v52, 30 }
  0x5e   : > { %vm507_vm1 = vc.u32 %v499_v53, %v503_v54  ;;  %v605_v10 = vshll.u32 %v13066_v25, %v593_v44  ;;  %v606_v12 = vshrl.u32 %v13072_v27, %v9930_v32  ;;  %v486_v14 = vsel %vm485_vm0, 1, %v13061_v15 }
  0x5f   : > { %v487_v39 = vadd.s32 %v481_v49, %v477_v48  ;;  %v505_v58 = vshll.u32 %v9933_v55, 16  ;;  %v509_v22 = vadd.s32 %v503_v54, %v499_v53  ;;  %v599_v24 = vshll.u32 %v13070_v21, %v593_v44 }
  0x60   : > { %v600_v29 = vshrl.u32 %v13064_v23, %v9930_v32  ;;  %v602_v37 = vshll.u32 %v13064_v23, %v593_v44  ;;  %v603_v38 = vshrl.u32 %v13066_v25, %v9930_v32  ;;  %v508_v30 = vsel %vm507_vm1, 1, %v13061_v15 }
  0x61   : > { %v596_v31 = vshll.u32 %v13074_v19, %v593_v44  ;;  %v597_v63 = vshrl.u32 %v13070_v21, %v9930_v32  ;;  %v610_v9 = vor.u32 %v609_v18, %v608_v2  ;;  %v370_v11 = vshll.u32 %v9943_v5, 30 }
  0x62   : > { %v607_v33 = vor.u32 %v606_v12, %v605_v10  ;;  %vm614_vm2 = vcmp.lt.s32.totalorder %v9937_v60, 4  ;;  %vm489_vm3 = vc.u32 %v487_v39, %v483_v57  ;;  %vm511_vm4 = vc.u32 %v509_v22, %v505_v58  ;;  %v239_v39 = vld [vmem:[#allocation3 + $0x18] sm:$0xff] }
  0x63   : > { %v587_v36 = vor.u32 8388608, %v586_v59  ;;  %v488_v40 = vadd.s32 %v486_v14, %v480_v1  ;;  %v510_v41 = vadd.s32 %v508_v30, %v502_v56  ;;  %v9962_v42 = vor.u32 %v600_v29, %v599_v24 }
  0x64   : > { %v9964_v16 = vor.u32 %v603_v38, %v602_v37  ;;  %v9966_v46 = vor.u32 %v597_v63, %v596_v31  ;;  %vm611_vm5 = vcmp.lt.s32.totalorder %v9937_v60, 1  ;;  %vm613_vm6 = vcmp.lt.s32.totalorder %v9937_v60, 3 }
  0x65   : > { %v624_v44 = vsel %vm614_vm2, %v610_v9, 1326507024  ;;  %v9972_v48 = vsub.s32 %v367_v45, %v370_v11  ;;  %v490_v49 = vsel %vm489_vm3, 1, %v13061_v15  ;;  %v512_v52 = vsel %vm511_vm4, 1, %v13061_v15 }
  0x66   : > { %v620_v53 = vsel %vm614_vm2, %v607_v33, 920167782  ;;  %v482_v54 = vshrl.u32 %v9921_v43, 16  ;;  %v504_v56 = vshrl.u32 %v9924_v47, 16  ;;  %vm612_vm7 = vcmp.lt.s32.totalorder %v9937_v60, 2 }
  0x67   : > { %v623_v59 = vsel %vm611_vm5, %v9962_v42, %v9964_v16  ;;  %v625_v45 = vsel %vm613_vm6, %v607_v33, %v624_v44  ;;  %v492_v1 = vadd.s32 %v490_v49, %v488_v40  ;;  %v514_v57 = vadd.s32 %v512_v52, %v510_v41 }
  0x68   : > { %v619_v2 = vsel %vm611_vm5, %v9966_v46, %v9962_v42  ;;  %v621_v43 = vsel %vm613_vm6, %v9964_v16, %v620_v53  ;;  %v373_v47 = vsub.s32 0, %v9972_v48  ;;  %v9995_v18 = vshll.u32 %v587_v36, 8 }
  0x69   : > { %vm372_vm8 = vcmp.lt.s32.totalorder %v9972_v48, 0  ;;  %v626_v10 = vsel %vm612_vm7, %v623_v59, %v625_v45  ;;  %v440_v12 = vshrl.u32 %v13074_v19, %v9833_v13  ;;  %v622_v14 = vsel %vm612_vm7, %v619_v2, %v621_v43 }
  0x6a   : > { %v484_v24 = vshrl.u32 %v9928_v51, 16  ;;  %v493_v29 = vadd.s32 %v492_v1, %v482_v54  ;;  %v506_v37 = vshrl.u32 %v9933_v55, 16  ;;  %v515_v38 = vadd.s32 %v514_v57, %v504_v56 }
  0x6b   : > { %v374_v30 = vsel %vm372_vm8, %v373_v47, %v9972_v48  ;;  %v628_v31 = vand.u32 65535, %v9995_v18  ;;  %v631_v63 = vshrl.u32 %v626_v10, 16  ;;  %v461_v9 = vsel %vm459_vm10, %v9869_v62, 2102212464 }
  0x6c   : > { %v653_v13 = vshrl.u32 %v622_v14, 16  ;;  %v10012_v11 = vmul.f32 %v9754_v0, %v239_v39  ;;  %v460_v51 = vsel %vm456_vm11, %v440_v12, %v9879_v8  ;;  %v375_v33 = vclz %v374_v30 }
  0x6d   : > { %v10017_v55 = vadd.s32 %v493_v29, %v484_v24  ;;  %v10019_v36 = vadd.s32 %v509_v22, %v505_v58  ;;  %v516_v40 = vadd.s32 %v515_v38, %v506_v37  ;;  %v462_v41 = vsel %vm458_vm12, %v9867_v61, %v461_v9 }
  0x6e   : > { %13207 = vst [vmem:[#allocation17_spill] sm:$0xff] %v10012_v11  ;;  %v629_v62 = vshrl.u32 %v9995_v18, 16  ;;  %v630_v44 = vand.u32 65535, %v626_v10  ;;  %v10025_v49 = vmul.u32 %v631_v63, %v628_v31  ;;  %v652_v52 = vand.u32 65535, %v622_v14 }
  0x6f   : > { %v10027_v53 = vmul.u32 %v653_v13, %v628_v31  ;;  %v7957_v54 = vadd.s32 4294967294, %v375_v33  ;;  %v463_v8 = vsel %vm457_vm13, %v460_v51, %v462_v41  ;;  %vm519_vm9 = vc.u32 %v10017_v55, %v10019_v36  ;;  %v240_v33 = vld [vmem:[#allocation3 + $0x20] sm:$0xff] }
  0x70   : > { %v520_v58 = vadd.s32 1, %v516_v40  ;;  %v632_v22 = vmul.u32 %v630_v44, %v628_v31  ;;  %v10033_v56 = vmul.u32 %v630_v44, %v629_v62  ;;  %v636_v61 = vshll.u32 %v10025_v49, 16 }
  0x71   : > { %v737_v59 = vand.u32 2139095040, %v10012_v11  ;;  %v654_v45 = vmul.u32 %v652_v52, %v628_v31  ;;  %v10037_v1 = vmul.u32 %v652_v52, %v629_v62  ;;  %v658_v57 = vshll.u32 %v10027_v53, 16 }
  0x72   : > { %v517_v2 = vmul.u32 %v9890_v17, %v463_v8  ;;  %v521_v43 = vsel %vm519_vm9, %v520_v58, %v516_v40  ;;  %vm7958_vm10 = vcmp.lt.s32.totalorder %v7957_v54, 0  ;;  %v638_v47 = vshll.u32 %v10033_v56, 16 }
  0x73   : > { %v738_v35 = vshrl.u32 %v737_v59, 23  ;;  %vm640_vm11 = vc.u32 %v632_v22, %v636_v61  ;;  %v642_v12 = vadd.s32 %v636_v61, %v632_v22  ;;  %v660_v14 = vshll.u32 %v10037_v1, 16 }
  0x74   : > { %vm662_vm12 = vc.u32 %v654_v45, %v658_v57  ;;  %v10043_v39 = vadd.s32 %v658_v57, %v654_v45  ;;  %v522_v24 = vadd.s32 %v521_v43, %v517_v2  ;;  %v10045_v37 = vsel %vm7958_vm10, 0, %v7957_v54 }
  0x75   : > { %v7965_v10 = vadd.s32 4294967169, %v738_v35  ;;  %v635_v38 = vmul.u32 %v631_v63, %v629_v62  ;;  %v657_v30 = vmul.u32 %v653_v13, %v629_v62  ;;  %v641_v17 = vsel %vm640_vm11, 1, %v13061_v15 }
  0x76   : > { %v663_v31 = vsel %vm662_vm12, 1, %v13061_v15  ;;  %v363_v9 = vadd.s32 %v9902_v28, %v9898_v26  ;;  %vm644_vm14 = vc.u32 %v642_v12, %v638_v47  ;;  %vm666_vm15 = vc.u32 %v10043_v39, %v660_v14 }
  0x77   : > { %v744_v29 = vadd.s32 1, %v7965_v10  ;;  %v379_v40 = vsub.s32 32, %v10045_v37  ;;  %v383_v63 = vsub.s32 4294967266, %v10045_v37  ;;  %v523_v13 = vadd.s32 536870912, %v522_v24 }
  0x78   : > { %v643_v62 = vadd.s32 %v641_v17, %v635_v38  ;;  %v665_v44 = vadd.s32 %v663_v31, %v657_v30  ;;  %v645_v52 = vsel %vm644_vm14, 1, %v13061_v15  ;;  %v667_v54 = vsel %vm666_vm15, 1, %v13061_v15 }
  0x79   : > { %vm745_vm13 = vcmp.gt.s32.totalorder %v744_v29, 0  ;;  %v13059_v26 = vand.u32 2147483647, %v10012_v11  ;;  %v10062_v8 = vmul.f32 %v9754_v0, %v240_v33  ;;  %v595_v58 = vshrl.u32 %v13074_v19, %v9930_v32 }
  0x7a   : > { %v746_v51 = vsel %vm745_vm13, %v744_v29, 0  ;;  %v380_v22 = vshll.u32 %v9972_v48, %v10045_v37  ;;  %v381_v61 = vshrl.u32 %v363_v9, %v379_v40  ;;  %v384_v59 = vadd.s32 127, %v383_v63 }
  0x7b   : > { %v748_v41 = vand.u32 31, %v746_v51  ;;  %13208 = vst [vmem:[#allocation18_spill] sm:$0xff] %v10062_v8  ;;  %v10068_v45 = vshrl.u32 %v523_v13, 30  ;;  %v637_v57 = vshrl.u32 %v10025_v49, 16  ;;  %v647_v2 = vadd.s32 %v645_v52, %v643_v62 }
  0x7c   : > { %v659_v35 = vshrl.u32 %v10027_v53, 16  ;;  %v669_v43 = vadd.s32 %v667_v54, %v665_v44  ;;  %v741_v47 = vand.u32 8388607, %v13059_v26  ;;  %v10074_v10 = vshrl.u32 %v746_v51, 5 }
  0x7d   : > { %v10059_v28 = vsub.s32 32, %v748_v41  ;;  %v760_v32 = vshll.u32 %v13066_v25, %v748_v41  ;;  %v754_v12 = vshll.u32 %v13070_v21, %v748_v41  ;;  %v757_v49 = vshll.u32 %v13064_v23, %v748_v41 }
  0x7e   : > { %v751_v37 = vshll.u32 %v13074_v19, %v748_v41  ;;  %v763_v30 = vshll.u32 %v13072_v27, %v748_v41  ;;  %v525_v31 = vshll.u32 %v10068_v45, 30  ;;  %v615_v9 = vsel %vm611_vm5, %v595_v58, %v9966_v46 }
  0x7f   : > { %v761_v48 = vshrl.u32 %v13072_v27, %v10059_v28  ;;  %v755_v29 = vshrl.u32 %v13064_v23, %v10059_v28  ;;  %v758_v53 = vshrl.u32 %v13066_v25, %v10059_v28  ;;  %v752_v38 = vshrl.u32 %v13070_v21, %v10059_v28 }
  0x80   : > { %v764_v17 = vshrl.u32 %v13076_v34, %v10059_v28  ;;  %v616_v51 = vsel %vm614_vm2, %v9964_v16, 2102212464  ;;  %v639_v33 = vshrl.u32 %v10033_v56, 16  ;;  %v661_v40 = vshrl.u32 %v10037_v1, 16 }
  0x81   : > { %v670_v63 = vadd.s32 %v669_v43, %v659_v35  ;;  %v742_v13 = vor.u32 8388608, %v741_v47  ;;  %v762_v41 = vor.u32 %v761_v48, %v760_v32  ;;  %v648_v62 = vadd.s32 %v647_v2, %v637_v57 }
  0x82   : > { %v10100_v44 = vor.u32 %v755_v29, %v754_v12  ;;  %v10102_v52 = vor.u32 %v758_v53, %v757_v49  ;;  %vm769_vm0 = vcmp.lt.s32.totalorder %v10074_v10, 4  ;;  %v385_v54 = vshll.u32 %v384_v59, 23 }
  0x83   : > { %v10105_v46 = vor.u32 %v752_v38, %v751_v37  ;;  %v765_v58 = vor.u32 %v764_v17, %v763_v30  ;;  %vm766_vm1 = vcmp.lt.s32.totalorder %v10074_v10, 1  ;;  %v10108_v16 = vsub.s32 %v522_v24, %v525_v31 }
  0x84   : > { %v617_v56 = vsel %vm613_vm6, %v9962_v42, %v616_v51  ;;  %vm768_vm2 = vcmp.lt.s32.totalorder %v10074_v10, 3  ;;  %v892_v57 = vand.u32 2139095040, %v10062_v8  ;;  %v382_v2 = vor.u32 %v381_v61, %v380_v22 }
  0x85   : > { %v671_v35 = vadd.s32 %v670_v63, %v661_v40  ;;  %v775_v59 = vsel %vm769_vm0, %v762_v41, 920167782  ;;  %v10117_v43 = vshll.u32 %v742_v13, 8  ;;  %v10119_v47 = vadd.s32 %v648_v62, %v639_v33 }
  0x86   : > { %v10124_v24 = vadd.s32 %v10043_v39, %v660_v14  ;;  %vm767_vm3 = vcmp.lt.s32.totalorder %v10074_v10, 2  ;;  %v778_v42 = vsel %vm766_vm1, %v10100_v44, %v10102_v52  ;;  %v618_v22 = vsel %vm612_vm7, %v615_v9, %v617_v56 }
  0x87   : > { %v774_v61 = vsel %vm766_vm1, %v10105_v46, %v10100_v44  ;;  %v776_v1 = vsel %vm768_vm2, %v10102_v52, %v775_v59  ;;  %v779_v14 = vsel %vm769_vm0, %v765_v58, 1326507024  ;;  %v386_v39 = vor.u32 4788187, %v385_v54 }
  0x88   : > { %vm527_vm4 = vcmp.lt.s32.totalorder %v10108_v16, 0  ;;  %v780_v32 = vsel %vm768_vm2, %v762_v41, %v779_v14  ;;  %v893_v60 = vshrl.u32 %v892_v57, 23  ;;  %v528_v48 = vsub.s32 0, %v10108_v16 }
  0x89   : > { %v675_v12 = vadd.s32 1, %v671_v35  ;;  %v781_v29 = vsel %vm767_vm3, %v778_v42, %v780_v32  ;;  %v783_v49 = vand.u32 65535, %v10117_v43  ;;  %vm674_vm5 = vc.u32 %v10119_v47, %v10124_v24 }
  0x8a   : > { %v777_v53 = vsel %vm767_vm3, %v774_v61, %v776_v1  ;;  %v784_v37 = vshrl.u32 %v10117_v43, 16  ;;  %v785_v38 = vand.u32 65535, %v781_v29  ;;  %v786_v30 = vshrl.u32 %v781_v29, 16  ;;  %v241_v61 = vld [vmem:[#allocation3 + $0x28] sm:$0xff]  ;;  %v242_v1 = vld [vmem:[#allocation3 + $0x30] sm:$0xff] }
  0x8b   : > { %v807_v17 = vand.u32 65535, %v777_v53  ;;  %v672_v31 = vmul.u32 %v9995_v18, %v618_v22  ;;  %v7968_v9 = vadd.s32 4294967169, %v893_v60  ;;  %v529_v51 = vsel %vm527_vm4, %v528_v48, %v10108_v16 }
  0x8c   : > { %v676_v33 = vsel %vm674_vm5, %v675_v12, %v671_v35  ;;  %v10156_v40 = vmul.u32 %v786_v30, %v783_v49  ;;  %v808_v63 = vshrl.u32 %v777_v53, 16  ;;  %v387_v13 = vand.u32 2147483647, %v386_v39  ;;  %v243_v39 = vld [vmem:[#allocation3 + $0x38] sm:$0xff] }
  0x8d   : > { %v389_v41 = vcvt.s32.f32 %v382_v2  ;;  %v787_v62 = vmul.u32 %v785_v38, %v783_v49  ;;  %v10158_v54 = vmul.u32 %v785_v38, %v784_v37  ;;  %v809_v56 = vmul.u32 %v807_v17, %v783_v49 }
  0x8e   : > { %v791_v58 = vshll.u32 %v10156_v40, 16  ;;  %v10161_v57 = vmul.u32 %v808_v63, %v783_v49  ;;  %v10163_v59 = vmul.u32 %v807_v17, %v784_v37  ;;  %v530_v18 = vclz %v529_v51 }
  0x8f   : > { %v10165_v42 = vadd.s32 %v676_v33, %v672_v31  ;;  %v899_v22 = vadd.s32 1, %v7968_v9  ;;  %v390_v14 = vmul.f32 %v389_v41, %v387_v13  ;;  %v793_v2 = vshll.u32 %v10158_v54, 16  ;;  %v244_v31 = vld [vmem:[#allocation3 + $0x40] sm:$0xff]  ;;  %v245_v41 = vld [vmem:[#allocation3 + $0x48] sm:$0xff] }
  0x90   : > { %v813_v35 = vshll.u32 %v10161_v57, 16  ;;  %vm795_vm6 = vc.u32 %v787_v62, %v791_v58  ;;  %v797_v32 = vadd.s32 %v791_v58, %v787_v62  ;;  %v13069_v60 = vshll.u32 %v10163_v59, 16  ;;  %v246_v62 = vld [vmem:[#allocation3 + $0x50] sm:$0xff]  ;;  %v247_v58 = vld [vmem:[#allocation3 + $0x58] sm:$0xff] }
  0x91   : > { %v7960_v12 = vadd.s32 4294967294, %v530_v18  ;;  %v678_v29 = vadd.s32 536870912, %v10165_v42  ;;  %vm900_vm8 = vcmp.gt.s32.totalorder %v899_v22, 0  ;;  %v10174_v49 = vmul.f32 %v9754_v0, %v241_v61 }
  0x92   : > { %vm817_vm7 = vc.u32 %v809_v56, %v813_v35  ;;  %v10170_v48 = vadd.s32 %v813_v35, %v809_v56  ;;  %v10177_v53 = vmul.f32 %v9754_v0, %v242_v1  ;;  %v790_v38 = vmul.u32 %v786_v30, %v784_v37 }
  0x93   : > { %13209 = vst [vmem:[#allocation19_spill] sm:$0xff] %v10174_v49  ;;  %v812_v17 = vmul.u32 %v808_v63, %v784_v37  ;;  %v10180_v9 = vmul.f32 %v9754_v0, %v243_v39  ;;  %v796_v51 = vsel %vm795_vm6, 1, %v13061_v15  ;;  %v818_v33 = vsel %vm817_vm7, 1, %v13061_v15  ;;  %v248_v37 = vld [vmem:[#allocation3 + $0x60] sm:$0xff] }
  0x94   : > { %13210 = vst [vmem:[#allocation20_spill] sm:$0xff] %v10177_v53  ;;  %v901_v13 = vsel %vm900_vm8, %v899_v22, 0  ;;  %v391_v56 = vxor.u32 2147483648, %v390_v14  ;;  %vm799_vm9 = vc.u32 %v797_v32, %v793_v2  ;;  %vm821_vm10 = vc.u32 %v10170_v48, %v13069_v60 }
  0x95   : > { %13211 = vst [vmem:[#allocation21_spill] sm:$0xff] %v10180_v9  ;;  %v903_v30 = vand.u32 31, %v901_v13  ;;  %vm271_vm11 = vcmp.lt.s32.totalorder %v9757_v3, 0  ;;  %vm7961_vm12 = vcmp.lt.s32.totalorder %v7960_v12, 0  ;;  %v10188_v63 = vshrl.u32 %v678_v29, 30 }
  0x96   : > { %v13063_v18 = vand.u32 2147483647, %v10062_v8  ;;  %v10192_v22 = vmul.f32 %v9754_v0, %v244_v31  ;;  %v798_v35 = vadd.s32 %v796_v51, %v790_v38  ;;  %v820_v61 = vadd.s32 %v818_v33, %v812_v17 }
  0x97   : > { %v10194_v1 = vsub.s32 32, %v903_v30  ;;  %v10197_v2 = vmul.f32 %v9754_v0, %v245_v41  ;;  %v10200_v39 = vmul.f32 %v9754_v0, %v246_v62  ;;  %v800_v32 = vsel %vm799_vm9, 1, %v13061_v15 }
  0x98   : > { %13212 = vst [vmem:[#allocation22_spill] sm:$0xff] %v10192_v22  ;;  %v822_v29 = vsel %vm821_vm10, 1, %v13061_v15  ;;  %v10205_v26 = vmul.f32 %v9754_v0, %v247_v58  ;;  %v10208_v31 = vmul.f32 %v9754_v0, %v248_v37  ;;  %v392_v38 = vsel %vm271_vm11, %v391_v56, %v390_v14 }
  0x99   : > { %13213 = vst [vmem:[#allocation23_spill] sm:$0xff] %v10197_v2  ;;  %v10212_v17 = vsel %vm7961_vm12, 0, %v7960_v12  ;;  %v680_v51 = vshll.u32 %v10188_v63, 30  ;;  %v792_v33 = vshrl.u32 %v10156_v40, 16  ;;  %v814_v41 = vshrl.u32 %v10161_v57, 16 }
  0x9a   : > { %13214 = vst [vmem:[#allocation24_spill] sm:$0xff] %v10200_v39  ;;  %v896_v62 = vand.u32 8388607, %v13063_v18  ;;  %v802_v50 = vadd.s32 %v800_v32, %v798_v35  ;;  %v824_v58 = vadd.s32 %v822_v29, %v820_v61  ;;  %v915_v15 = vshll.u32 %v13066_v25, %v903_v30 }
  0x9b   : > { %13215 = vst [vmem:[#allocation25_spill] sm:$0xff] %v10205_v26  ;;  %v916_v37 = vshrl.u32 %v13072_v27, %v10194_v1  ;;  %vm10224_vm13 = vcmp.le.f32.partialorder %v269_v6, 0.7853982  ;;  %v909_v40 = vshll.u32 %v13070_v21, %v903_v30  ;;  %v910_v57 = vshrl.u32 %v13064_v23, %v10194_v1 }
  0x9c   : > { %13216 = vst [vmem:[#allocation26_spill] sm:$0xff] %v10208_v31  ;;  %v912_v12 = vshll.u32 %v13064_v23, %v903_v30  ;;  %v913_v56 = vshrl.u32 %v13066_v25, %v10194_v1  ;;  %v10234_v35 = vshrl.u32 %v901_v13, 5  ;;  %v906_v61 = vshll.u32 %v13074_v19, %v903_v30 }
  0x9d   : > { %v907_v6 = vshrl.u32 %v13070_v21, %v10194_v1  ;;  %v918_v32 = vshll.u32 %v13072_v27, %v903_v30  ;;  %v10241_v29 = vsub.s32 %v10165_v42, %v680_v51  ;;  %v750_v18 = vshrl.u32 %v13074_v19, %v10059_v28 }
  0x9e   : > { %v771_v23 = vsel %vm769_vm0, %v10102_v52, 2102212464  ;;  %v897_v25 = vor.u32 8388608, %v896_v62  ;;  %v794_v13 = vshrl.u32 %v10158_v54, 16  ;;  %v816_v20 = vshrl.u32 %v10163_v59, 16  ;;  %v249_v52 = vld [vmem:[#allocation3 + $0x68] sm:$0xff] }
  0x9f   : > { %v917_v60 = vor.u32 %v916_v37, %v915_v15  ;;  %v919_v21 = vshrl.u32 %v13076_v34, %v10194_v1  ;;  %v803_v30 = vadd.s32 %v802_v50, %v792_v33  ;;  %v825_v27 = vadd.s32 %v824_v58, %v814_v41  ;;  %v250_v33 = vld [vmem:[#allocation3 + $0x70] sm:$0xff] }
  0xa0   : > { %v10252_v42 = vor.u32 %v910_v57, %v909_v40  ;;  %v10254_v51 = vor.u32 %v913_v56, %v912_v12  ;;  %v10256_v28 = vor.u32 %v907_v6, %v906_v61  ;;  %vm921_vm14 = vcmp.lt.s32.totalorder %v10234_v35, 1 }
  0xa1   : > { %v920_v19 = vor.u32 %v919_v21, %v918_v32  ;;  %vm924_vm15 = vcmp.lt.s32.totalorder %v10234_v35, 4  ;;  %v538_v54 = vsub.s32 4294967266, %v10212_v17  ;;  %v683_v15 = vsub.s32 0, %v10241_v29 }
  0xa2   : > { %v770_v50 = vsel %vm766_vm1, %v750_v18, %v10105_v46  ;;  %vm923_vm0 = vcmp.lt.s32.totalorder %v10234_v35, 3  ;;  %v772_v21 = vsel %vm768_vm2, %v10100_v44, %v771_v23  ;;  %v930_v41 = vsel %vm924_vm15, %v917_v60, 920167782 }
  0xa3   : > { %v934_v62 = vsel %vm924_vm15, %v920_v19, 1326507024  ;;  %v10273_v58 = vshll.u32 %v897_v25, 8  ;;  %v13219_v37 = vshll.u32 %v10163_v59, 16  ;;  %v826_v46 = vadd.s32 %v825_v27, %v816_v20 }
  0xa4   : > { %vm922_vm1 = vcmp.lt.s32.totalorder %v10234_v35, 2  ;;  %v933_v23 = vsel %vm921_vm14, %v10252_v42, %v10254_v51  ;;  %v10285_v44 = vadd.s32 %v803_v30, %v794_v13  ;;  %v929_v19 = vsel %vm921_vm14, %v10256_v28, %v10252_v42 }
  0xa5   : > { %v10278_v40 = vadd.s32 %v10170_v48, %v13219_v37  ;;  %v931_v25 = vsel %vm923_vm0, %v10254_v51, %v930_v41  ;;  %v935_v27 = vsel %vm923_vm0, %v917_v60, %v934_v62  ;;  %v10297_v20 = vmul.f32 %v9754_v0, %v249_v52 }
  0xa6   : > { %v10300_v59 = vmul.f32 %v9754_v0, %v250_v33  ;;  %v518_v48 = vadd.s32 %v10019_v36, %v10017_v55  ;;  %vm682_vm2 = vcmp.lt.s32.totalorder %v10241_v29, 0  ;;  %v10308_v18 = vsel %vm10224_vm13, %v9757_v3, %v392_v38 }
  0xa7   : > { %13220 = vst [vmem:[#allocation27_spill] sm:$0xff] %v10297_v20  ;;  %v534_v57 = vsub.s32 32, %v10212_v17  ;;  %v936_v60 = vsel %vm922_vm1, %v933_v23, %v935_v27  ;;  %v938_v12 = vand.u32 65535, %v10273_v58  ;;  %v393_v56 = vsub.s32 4, %v9943_v5 }
  0xa8   : > { %13221 = vst [vmem:[#allocation28_spill] sm:$0xff] %v10300_v59  ;;  %v773_v61 = vsel %vm767_vm3, %v770_v50, %v772_v21  ;;  %v830_v55 = vadd.s32 1, %v826_v46  ;;  %v932_v36 = vsel %vm922_vm1, %v929_v19, %v931_v25  ;;  %v539_v6 = vadd.s32 127, %v538_v54 }
  0xa9   : > { %v684_v38 = vsel %vm682_vm2, %v683_v15, %v10241_v29  ;;  %vm829_vm4 = vc.u32 %v10285_v44, %v10278_v40  ;;  %v941_v32 = vshrl.u32 %v936_v60, 16  ;;  %v10324_v13 = vmul.f32 %v10308_v18, %v10308_v18 }
  0xaa   : > { %v535_v30 = vshll.u32 %v10108_v16, %v10212_v17  ;;  %v939_v10 = vshrl.u32 %v10273_v58, 16  ;;  %v940_v52 = vand.u32 65535, %v936_v60  ;;  %v536_v50 = vshrl.u32 %v518_v48, %v534_v57 }
  0xab   : > { %v827_v33 = vmul.u32 %v10117_v43, %v773_v61  ;;  %v10330_v54 = vmul.u32 %v941_v32, %v938_v12  ;;  %v963_v15 = vshrl.u32 %v932_v36, 16  ;;  %vm426_vm3 = vcmp.lt.s32.totalorder %v9760_v4, 0 }
  0xac   : > { %v685_v21 = vclz %v684_v38  ;;  %v831_v41 = vsel %vm829_vm4, %v830_v55, %v826_v46  ;;  %v962_v62 = vand.u32 65535, %v932_v36  ;;  %v394_v37 = vsel %vm271_vm11, %v393_v56, %v9943_v5 }
  0xad   : > { %v398_v16 = vmul.f32 -0.001358992, %v10324_v13  ;;  %v540_v17 = vshll.u32 %v539_v6, 23  ;;  %v548_v23 = vsub.s32 4, %v10068_v45  ;;  %v942_v19 = vmul.u32 %v940_v52, %v938_v12 }
  0xae   : > { %v10338_v25 = vmul.u32 %v940_v52, %v939_v10  ;;  %v946_v43 = vshll.u32 %v10330_v54, 16  ;;  %v1047_v27 = vand.u32 2139095040, %v10174_v49  ;;  %v405_v48 = vmul.f32 -0.00019511016, %v10324_v13 }
  0xaf   : > { %v537_v46 = vor.u32 %v536_v50, %v535_v30  ;;  %v832_v57 = vadd.s32 %v831_v41, %v827_v33  ;;  %v10343_v60 = vmul.u32 %v963_v15, %v938_v12  ;;  %v10347_v5 = vsel %vm10224_vm13, 0, %v394_v37 }
  0xb0   : > { %13222 = vst [vmem:[#allocation29_spill] sm:$0xff] %v10347_v5  ;;  %v13223_v56 = vand.u32 2147483647, %v9760_v4  ;;  %v7963_v55 = vadd.s32 4294967294, %v685_v21  ;;  %v10355_v36 = vmul.u32 %v962_v62, %v939_v10  ;;  %v399_v6 = vadd.f32 0.041655596, %v398_v16 }
  0xb1   : > { %v541_v38 = vor.u32 4788187, %v540_v17  ;;  %v549_v30 = vsel %vm426_vm3, %v548_v23, %v10068_v45  ;;  %v964_v52 = vmul.u32 %v962_v62, %v938_v12  ;;  %v948_v14 = vshll.u32 %v10338_v25, 16 }
  0xb2   : > { %vm10351_vm5 = vcmp.le.f32.partialorder %v13223_v56, 0.7853982  ;;  %vm950_vm6 = vc.u32 %v942_v19, %v946_v43  ;;  %v952_v50 = vadd.s32 %v946_v43, %v942_v19  ;;  %v1048_v33 = vshrl.u32 %v1047_v27, 23 }
  0xb3   : > { %v406_v41 = vadd.f32 0.008332121, %v405_v48  ;;  %v544_v37 = vcvt.s32.f32 %v537_v46  ;;  %v833_v56 = vadd.s32 536870912, %v832_v57  ;;  %v968_v34 = vshll.u32 %v10343_v60, 16 }
  0xb4   : > { %vm7964_vm7 = vcmp.lt.s32.totalorder %v7963_v55, 0  ;;  %v945_v21 = vmul.u32 %v941_v32, %v939_v10  ;;  %v967_v59 = vmul.u32 %v963_v15, %v939_v10  ;;  %v13081_v16 = vshll.u32 %v10355_v36, 16 }
  0xb5   : > { %v542_v17 = vand.u32 2147483647, %v541_v38  ;;  %v13226_v20 = vmov 0   ;;  %vm972_vm8 = vc.u32 %v964_v52, %v968_v34  ;;  %v10364_v45 = vadd.s32 %v968_v34, %v964_v52 }
  0xb6   : > { %v951_v31 = vsel %vm950_vm6, 1, %v13226_v20  ;;  %v10367_v12 = vadd.s32 3, %v10347_v5  ;;  %vm954_vm9 = vc.u32 %v952_v50, %v948_v14  ;;  %v973_v62 = vsel %vm972_vm8, 1, %v13226_v20 }
  0xb7   : > { %v7971_v23 = vadd.s32 4294967169, %v1048_v33  ;;  %v10372_v19 = vsel %vm10351_vm5, 0, %v549_v30  ;;  %v10374_v32 = vsel %vm7964_vm7, 0, %v7963_v55  ;;  %v10376_v10 = vshrl.u32 %v833_v56, 30 }
  0xb8   : > { %13227 = vst [vmem:[#allocation30_spill] sm:$0xff] %v10372_v19  ;;  %vm976_vm10 = vc.u32 %v10364_v45, %v13081_v16  ;;  %v400_v34 = vmul.f32 %v399_v6, %v10324_v13  ;;  %v953_v15 = vadd.s32 %v951_v31, %v945_v21  ;;  %v975_v43 = vadd.s32 %v973_v62, %v967_v59 }
  0xb9   : > { %v1054_v27 = vadd.s32 1, %v7971_v23  ;;  %v407_v48 = vmul.f32 %v406_v41, %v10324_v13  ;;  %v545_v46 = vmul.f32 %v544_v37, %v542_v17  ;;  %v955_v38 = vsel %vm954_vm9, 1, %v13226_v20 }
  0xba   : > { %v977_v30 = vsel %vm976_vm10, 1, %v13226_v20  ;;  %v673_v55 = vadd.s32 %v10124_v24, %v10119_v47  ;;  %v689_v52 = vsub.s32 32, %v10374_v32  ;;  %v693_v14 = vsub.s32 4294967266, %v10374_v32 }
  0xbb   : > { %vm1055_vm11 = vcmp.gt.s32.totalorder %v1054_v27, 0  ;;  %v835_v6 = vshll.u32 %v10376_v10, 30  ;;  %v947_v31 = vshrl.u32 %v10330_v54, 16  ;;  %v13083_v59 = vand.u32 2147483647, %v10174_v49 }
  0xbc   : > { %v1056_v50 = vsel %vm1055_vm11, %v1054_v27, 0  ;;  %v957_v33 = vadd.s32 %v955_v38, %v953_v15  ;;  %v969_v41 = vshrl.u32 %v10343_v60, 16  ;;  %v979_v37 = vadd.s32 %v977_v30, %v975_v43 }
  0xbd   : > { %v1058_v56 = vand.u32 31, %v1056_v50  ;;  %v10393_v21 = vadd.f32 -0.4999988, %v400_v34  ;;  %v408_v47 = vadd.f32 -0.16666654, %v407_v48  ;;  %v546_v24 = vxor.u32 2147483648, %v545_v46 }
  0xbe   : > { %v690_v17 = vshll.u32 %v10241_v29, %v10374_v32  ;;  %v691_v62 = vshrl.u32 %v673_v55, %v689_v52  ;;  %v694_v23 = vadd.s32 127, %v693_v14  ;;  %v13228_v16 = vmov 683565275  }
  0xbf   : > { %v905_v54 = vshrl.u32 %v13228_v16, %v10194_v1  ;;  %v10399_v5 = vsub.s32 32, %v1058_v56  ;;  %v10401_v27 = vsub.s32 %v832_v57, %v835_v6  ;;  %v926_v60 = vsel %vm924_vm15, %v10254_v51, 2102212464 }
  0xc0   : > { %v949_v34 = vshrl.u32 %v10338_v25, 16  ;;  %v1051_v15 = vand.u32 8388607, %v13083_v59  ;;  %v958_v43 = vadd.s32 %v957_v33, %v947_v31  ;;  %v971_v29 = vshrl.u32 %v10355_v36, 16 }
  0xc1   : > { %v980_v32 = vadd.s32 %v979_v37, %v969_v41  ;;  %v13229_v48 = vmov 2102212464   ;;  %v10411_v1 = vshrl.u32 %v1056_v50, 5  ;;  %v1061_v57 = vshll.u32 %v13228_v16, %v1058_v56 }
  0xc2   : > { %v1070_v38 = vshll.u32 %v13229_v48, %v1058_v56  ;;  %v13230_v30 = vmov 2475754826   ;;  %v13231_v52 = vmov 920167782   ;;  %v13232_v14 = vmov 2131351028  }
  0xc3   : > { %v1064_v55 = vshll.u32 %v13230_v30, %v1058_v56  ;;  %v1071_v51 = vshrl.u32 %v13231_v52, %v10399_v5  ;;  %v1062_v25 = vshrl.u32 %v13230_v30, %v10399_v5  ;;  %v1065_v6 = vshrl.u32 %v13232_v14, %v10399_v5 }
  0xc4   : > { %v1067_v31 = vshll.u32 %v13232_v14, %v1058_v56  ;;  %v1068_v33 = vshrl.u32 %v13229_v48, %v10399_v5  ;;  %v695_v50 = vshll.u32 %v694_v23, 23  ;;  %v925_v41 = vsel %vm921_vm14, %v905_v54, %v10256_v28 }
  0xc5   : > { %v927_v37 = vsel %vm923_vm0, %v10252_v42, %v926_v60  ;;  %v1073_v59 = vshll.u32 %v13231_v52, %v1058_v56  ;;  %v981_v26 = vadd.s32 %v980_v32, %v971_v29  ;;  %v1052_v39 = vor.u32 8388608, %v1051_v15 }
  0xc6   : > { %v1072_v2 = vor.u32 %v1071_v51, %v1070_v38  ;;  %v13233_v49 = vmov 1326507024   ;;  %vm837_vm12 = vcmp.lt.s32.totalorder %v10401_v27, 0  ;;  %v838_v23 = vsub.s32 0, %v10401_v27 }
  0xc7   : > { %v1074_v22 = vshrl.u32 %v13233_v49, %v10399_v5  ;;  %v10435_v8 = vadd.s32 %v958_v43, %v949_v34  ;;  %v13234_v28 = vshll.u32 %v10355_v36, 16  ;;  %v10442_v42 = vor.u32 %v1062_v25, %v1061_v57  ;;  %v251_v57 = vld [vmem:[#allocation3 + $0x78] sm:$0xff] }
  0xc8   : > { %v10444_v56 = vor.u32 %v1065_v6, %v1064_v55  ;;  %v10446_v60 = vor.u32 %v1068_v33, %v1067_v31  ;;  %vm1079_vm13 = vcmp.lt.s32.totalorder %v10411_v1, 4  ;;  %v547_v15 = vsel %vm426_vm3, %v546_v24, %v545_v46 }
  0xc9   : > { %v10440_v54 = vadd.s32 %v10364_v45, %v13234_v28  ;;  %v1075_v29 = vor.u32 %v1074_v22, %v1073_v59  ;;  %vm1076_vm14 = vcmp.lt.s32.totalorder %v10411_v1, 1  ;;  %vm1078_vm15 = vcmp.lt.s32.totalorder %v10411_v1, 3 }
  0xca   : > { %v928_v36 = vsel %vm922_vm1, %v925_v41, %v927_v37  ;;  %v985_v45 = vadd.s32 1, %v981_v26  ;;  %v1085_v34 = vsel %vm1079_vm13, %v1072_v2, 920167782  ;;  %v10457_v43 = vshll.u32 %v1052_v39, 8 }
  0xcb   : > { %v692_v32 = vor.u32 %v691_v62, %v690_v17  ;;  %v696_v38 = vor.u32 4788187, %v695_v50  ;;  %v839_v46 = vsel %vm837_vm12, %v838_v23, %v10401_v27  ;;  %vm984_vm0 = vc.u32 %v10435_v8, %v10440_v54 }
  0xcc   : > { %vm1077_vm2 = vcmp.lt.s32.totalorder %v10411_v1, 2  ;;  %v1084_v22 = vsel %vm1076_vm14, %v10442_v42, %v10444_v56  ;;  %v1086_v39 = vsel %vm1078_vm15, %v10446_v60, %v1085_v34  ;;  %v1088_v35 = vsel %vm1076_vm14, %v10444_v56, %v10446_v60 }
  0xcd   : > { %v409_v59 = vmul.f32 %v408_v47, %v10324_v13  ;;  %v10480_v24 = vsel %vm10351_vm5, %v9760_v4, %v547_v15  ;;  %v982_v17 = vmul.u32 %v10273_v58, %v928_v36  ;;  %v1089_v62 = vsel %vm1079_vm13, %v1075_v29, 1326507024 }
  0xce   : > { %v840_v55 = vclz %v839_v46  ;;  %v986_v51 = vsel %vm984_vm0, %v985_v45, %v981_v26  ;;  %v1090_v25 = vsel %vm1078_vm15, %v1072_v2, %v1089_v62  ;;  %v1093_v6 = vand.u32 65535, %v10457_v43 }
  0xcf   : > { %v697_v31 = vand.u32 2147483647, %v696_v38  ;;  %v699_v47 = vcvt.s32.f32 %v692_v32  ;;  %v1087_v61 = vsel %vm1077_vm2, %v1084_v22, %v1086_v39  ;;  %v1091_v33 = vsel %vm1077_vm2, %v1088_v35, %v1090_v25 }
  0xd0   : > { %v402_v58 = vmul.f32 %v10393_v21, %v10324_v13  ;;  %v1094_v50 = vshrl.u32 %v10457_v43, 16  ;;  %v1095_v41 = vand.u32 65535, %v1091_v33  ;;  %v1096_v26 = vshrl.u32 %v1091_v33, 16 }
  0xd1   : > { %v10496_v37 = vmul.f32 %v9754_v0, %v251_v57  ;;  %v10500_v2 = vmul.f32 %v10480_v24, %v10480_v24  ;;  %v568_v23 = vadd.s32 3, %v10372_v19  ;;  %v10503_v28 = vadd.s32 %v986_v51, %v982_v17 }
  0xd2   : > { %v7966_v15 = vadd.s32 4294967294, %v840_v55  ;;  %v10505_v29 = vmul.u32 %v1096_v26, %v1093_v6  ;;  %v1117_v36 = vand.u32 65535, %v1087_v61  ;;  %v1118_v13 = vshrl.u32 %v1087_v61, 16 }
  0xd3   : > { %13235 = vst [vmem:[#allocation31_spill] sm:$0xff] %v10496_v37  ;;  %v410_v21 = vadd.f32 1.0, %v409_v59  ;;  %v10508_v45 = vand.u32 3, %v10367_v12  ;;  %v553_v0 = vmul.f32 -0.001358992, %v10500_v2  ;;  %v700_v34 = vmul.f32 %v699_v47, %v697_v31 }
  0xd4   : > { %v10511_v32 = vadd.f32 1.0, %v402_v58  ;;  %v1097_v38 = vmul.u32 %v1095_v41, %v1093_v6  ;;  %v10513_v46 = vmul.u32 %v1095_v41, %v1094_v50  ;;  %v1101_v22 = vshll.u32 %v10505_v29, 16 }
  0xd5   : > { %v13237_v39 = vand.u32 2147483647, %v9829_v7  ;;  %vm581_vm4 = vcmp.lt.s32.totalorder %v9829_v7, 0  ;;  %v988_v12 = vadd.s32 536870912, %v10503_v28  ;;  %v1202_v59 = vand.u32 2139095040, %v10177_v53 }
  0xd6   : > { %13236 = vst [vmem:[#allocation32_spill] sm:$0xff] %v10511_v32  ;;  %v10525_v17 = vand.u32 3, %v568_v23  ;;  %vm7967_vm3 = vcmp.lt.s32.totalorder %v7966_v15, 0  ;;  %v10527_v62 = vmul.u32 %v1118_v13, %v1093_v6  ;;  %v10529_v57 = vmul.u32 %v1117_v36, %v1094_v50 }
  0xd7   : > { %vm10518_vm1 = vcmp.le.f32.partialorder %v13237_v39, 0.7853982  ;;  %v10532_v55 = vmul.f32 %v410_v21, %v10308_v18  ;;  %v554_v51 = vadd.f32 0.041655596, %v553_v0  ;;  %v560_v25 = vmul.f32 -0.00019511016, %v10500_v2 }
  0xd8   : > { %v701_v31 = vxor.u32 2147483648, %v700_v34  ;;  %v1103_v61 = vshll.u32 %v10513_v46, 16  ;;  %vm1105_vm5 = vc.u32 %v1097_v38, %v1101_v22  ;;  %v1119_v33 = vmul.u32 %v1117_v36, %v1093_v6 }
  0xd9   : > { %13240 = vst [vmem:[#allocation33_spill] sm:$0xff] %v10532_v55  ;;  %v843_v58 = vsel %vm7967_vm3, 0, %v7966_v15  ;;  %v10537_v41 = vshrl.u32 %v988_v12, 30  ;;  %v1107_v23 = vadd.s32 %v1101_v22, %v1097_v38  ;;  %v1203_v39 = vshrl.u32 %v1202_v59, 23 }
  0xda   : > { %v1100_v19 = vmul.u32 %v1096_v26, %v1094_v50  ;;  %v1122_v37 = vmul.u32 %v1118_v13, %v1094_v50  ;;  %v1123_v18 = vshll.u32 %v10527_v62, 16  ;;  %v1125_v21 = vshll.u32 %v10529_v57, 16 }
  0xdb   : > { %v555_v0 = vmul.f32 %v554_v51, %v10500_v2  ;;  %v561_v4 = vadd.f32 0.008332121, %v560_v25  ;;  %v702_v47 = vsel %vm581_vm4, %v701_v31, %v700_v34  ;;  %v1106_v3 = vsel %vm1105_vm5, 1, %v13226_v20 }
  0xdc   : > { %vm419_vm6 = vcmp.eq.s32.totalorder %v10508_v45, 2  ;;  %v848_v6 = vsub.s32 4294967266, %v843_v58  ;;  %vm1109_vm7 = vc.u32 %v1107_v23, %v1103_v61  ;;  %vm1127_vm8 = vc.u32 %v1119_v33, %v1123_v18 }
  0xdd   : > { %v1129_v15 = vadd.s32 %v1123_v18, %v1119_v33  ;;  %v828_v50 = vadd.s32 %v10278_v40, %v10285_v44  ;;  %v844_v26 = vsub.s32 32, %v843_v58  ;;  %v990_v36 = vshll.u32 %v10537_v41, 30 }
  0xde   : > { %v1128_v13 = vsel %vm1127_vm8, 1, %v13226_v20  ;;  %v1108_v38 = vadd.s32 %v1106_v3, %v1100_v19  ;;  %v7974_v34 = vadd.s32 4294967169, %v1203_v39  ;;  %v556_v12 = vadd.f32 -0.4999988, %v555_v0 }
  0xdf   : > { %v1130_v22 = vadd.s32 %v1128_v13, %v1122_v37  ;;  %vm1131_vm9 = vc.u32 %v1129_v15, %v1125_v21  ;;  %v562_v59 = vmul.f32 %v561_v4, %v10500_v2  ;;  %v1110_v51 = vsel %vm1109_vm7, 1, %v13226_v20 }
  0xe0   : > { %v1132_v25 = vsel %vm1131_vm9, 1, %v13226_v20  ;;  %v10558_v40 = vsel %vm10518_vm1, %v9829_v7, %v702_v47  ;;  %v845_v44 = vshll.u32 %v10401_v27, %v843_v58  ;;  %v849_v3 = vadd.s32 127, %v848_v6 }
  0xe1   : > { %v1209_v19 = vadd.s32 1, %v7974_v34  ;;  %v846_v37 = vshrl.u32 %v828_v50, %v844_v26  ;;  %v1060_v31 = vshrl.u32 %v13228_v16, %v10399_v5  ;;  %v1124_v61 = vshrl.u32 %v10527_v62, 16 }
  0xe2   : > { %v1134_v4 = vadd.s32 %v1132_v25, %v1130_v22  ;;  %v10565_v33 = vsub.s32 %v10503_v28, %v990_v36  ;;  %v1102_v23 = vshrl.u32 %v10505_v29, 16  ;;  %v1112_v39 = vadd.s32 %v1110_v51, %v1108_v38 }
  0xe3   : > { %vm1210_vm10 = vcmp.gt.s32.totalorder %v1209_v19, 0  ;;  %v13100_v47 = vxor.u32 2147483648, %v10532_v55  ;;  %v563_v18 = vadd.f32 -0.16666654, %v562_v59  ;;  %v1081_v27 = vsel %vm1079_vm13, %v10446_v60, 2102212464 }
  0xe4   : > { %v1211_v58 = vsel %vm1210_vm10, %v1209_v19, 0  ;;  %v557_v5 = vmul.f32 %v556_v12, %v10500_v2  ;;  %v10575_v62 = vmul.f32 %v10558_v40, %v10558_v40  ;;  %v850_v28 = vshll.u32 %v849_v3, 23 }
  0xe5   : > { %v1213_v0 = vand.u32 31, %v1211_v58  ;;  %v847_v6 = vor.u32 %v846_v37, %v845_v44  ;;  %v1080_v29 = vsel %vm1076_vm14, %v1060_v31, %v10442_v42  ;;  %v1126_v50 = vshrl.u32 %v10529_v57, 16 }
  0xe6   : > { %v1135_v26 = vadd.s32 %v1134_v4, %v1124_v61  ;;  %v993_v36 = vsub.s32 0, %v10565_v33  ;;  %v1082_v60 = vsel %vm1078_vm15, %v10444_v56, %v1081_v27  ;;  %v1104_v13 = vshrl.u32 %v10513_v46, 16 }
  0xe7   : > { %v1113_v38 = vadd.s32 %v1112_v39, %v1102_v23  ;;  %v13241_v22 = vxor.u32 2147483648, %v10511_v32  ;;  %vm992_vm11 = vcmp.lt.s32.totalorder %v10565_v33, 0  ;;  %v10595_v12 = vsub.s32 32, %v1213_v0 }
  0xe8   : > { %vm416_vm12 = vcmp.eq.s32.totalorder %v10508_v45, 0  ;;  %v10598_v59 = vadd.f32 1.0, %v557_v5  ;;  %v564_v56 = vmul.f32 %v563_v18, %v10500_v2  ;;  %v715_v46 = vmul.f32 -0.00019511016, %v10575_v62 }
  0xe9   : > { %v10591_v34 = vsel %vm419_vm6, %v13241_v22, %v10532_v55  ;;  %v851_v51 = vor.u32 4788187, %v850_v28  ;;  %v854_v25 = vcvt.s32.f32 %v847_v6  ;;  %v1083_v44 = vsel %vm1077_vm2, %v1080_v29, %v1082_v60 }
  0xea   : > { %13242 = vst [vmem:[#allocation34_spill] sm:$0xff] %v10598_v59  ;;  %v1136_v3 = vadd.s32 %v1135_v26, %v1126_v50  ;;  %v13101_v19 = vand.u32 2147483647, %v10177_v53  ;;  %v994_v37 = vsel %vm992_vm11, %v993_v36, %v10565_v33  ;;  %v10606_v31 = vadd.s32 %v1113_v38, %v1104_v13 }
  0xeb   : > { %v10610_v61 = vadd.s32 %v1129_v15, %v1125_v21  ;;  %v1225_v2 = vshll.u32 %v13229_v48, %v1213_v0  ;;  %v10613_v4 = vshrl.u32 %v1211_v58, 5  ;;  %v1219_v23 = vshll.u32 %v13230_v30, %v1213_v0 }
  0xec   : > { %v1222_v1 = vshll.u32 %v13232_v14, %v1213_v0  ;;  %v1226_v39 = vshrl.u32 %v13231_v52, %v10595_v12  ;;  %v1220_v18 = vshrl.u32 %v13232_v14, %v10595_v12  ;;  %v1223_v27 = vshrl.u32 %v13229_v48, %v10595_v12 }
  0xed   : > { %v1228_v57 = vshll.u32 %v13231_v52, %v1213_v0  ;;  %v1229_v21 = vshrl.u32 %v13233_v49, %v10595_v12  ;;  %v995_v15 = vclz %v994_v37  ;;  %v1140_v58 = vadd.s32 1, %v1136_v3 }
  0xee   : > { %v1216_v5 = vshll.u32 %v13228_v16, %v1213_v0  ;;  %v1217_v28 = vshrl.u32 %v13230_v30, %v10595_v12  ;;  %vm415_vm13 = vcmp.lt.s32.totalorder %v10508_v45, 2  ;;  %v852_v6 = vand.u32 2147483647, %v851_v51 }
  0xef   : > { %vm1139_vm14 = vc.u32 %v10606_v31, %v10610_v61  ;;  %v1206_v29 = vand.u32 8388607, %v13101_v19  ;;  %v1227_v50 = vor.u32 %v1226_v39, %v1225_v2  ;;  %v565_v26 = vadd.f32 1.0, %v564_v56 }
  0xf0   : > { %v708_v36 = vmul.f32 -0.001358992, %v10575_v62  ;;  %v716_v60 = vadd.f32 0.008332121, %v715_v46  ;;  %vm1234_vm15 = vcmp.lt.s32.totalorder %v10613_v4, 4  ;;  %v1137_v0 = vmul.u32 %v10457_v43, %v1083_v44 }
  0xf1   : > { %v10637_v13 = vor.u32 %v1220_v18, %v1219_v23  ;;  %v10639_v38 = vor.u32 %v1223_v27, %v1222_v1  ;;  %v1230_v22 = vor.u32 %v1229_v21, %v1228_v57  ;;  %v7969_v51 = vadd.s32 4294967294, %v995_v15 }
  0xf2   : > { %v1141_v37 = vsel %vm1139_vm14, %v1140_v58, %v1136_v3  ;;  %v10641_v42 = vor.u32 %v1217_v28, %v1216_v5  ;;  %vm1231_vm0 = vcmp.lt.s32.totalorder %v10613_v4, 1  ;;  %v855_v2 = vmul.f32 %v854_v25, %v852_v6 }
  0xf3   : > { %v1207_v56 = vor.u32 8388608, %v1206_v29  ;;  %vm1233_vm2 = vcmp.lt.s32.totalorder %v10613_v4, 3  ;;  %v1240_v46 = vsel %vm1234_vm15, %v1227_v50, 920167782  ;;  %v418_v43 = vsel %vm416_vm12, %v10511_v32, %v13100_v47 }
  0xf4   : > { %v10653_v44 = vmul.f32 %v565_v26, %v10480_v24  ;;  %vm571_vm3 = vcmp.eq.s32.totalorder %v10525_v17, 0  ;;  %v709_v3 = vadd.f32 0.041655596, %v708_v36  ;;  %v717_v25 = vmul.f32 %v716_v60, %v10575_v62 }
  0xf5   : > { %v10657_v23 = vadd.s32 %v1141_v37, %v1137_v0  ;;  %vm1232_vm5 = vcmp.lt.s32.totalorder %v10613_v4, 2  ;;  %v1243_v1 = vsel %vm1231_vm0, %v10637_v13, %v10639_v38  ;;  %v1244_v39 = vsel %vm1234_vm15, %v1230_v22, 1326507024 }
  0xf6   : > { %13243 = vst [vmem:[#allocation35_spill] sm:$0xff] %v10653_v44  ;;  %vm7970_vm6 = vcmp.lt.s32.totalorder %v7969_v51, 0  ;;  %v1239_v24 = vsel %vm1231_vm0, %v10641_v42, %v10637_v13  ;;  %v1241_v18 = vsel %vm1233_vm2, %v10639_v38, %v1240_v46  ;;  %v1245_v27 = vsel %vm1233_vm2, %v1227_v50, %v1244_v39 }
  0xf7   : > { %v13098_v57 = vxor.u32 2147483648, %v10598_v59  ;;  %v13244_v21 = vsub.s32 4, %v10188_v63  ;;  %v856_v58 = vxor.u32 2147483648, %v855_v2  ;;  %v10681_v5 = vshll.u32 %v1207_v56, 8 }
  0xf8   : > { %v710_v28 = vmul.f32 %v709_v3, %v10575_v62  ;;  %v718_v6 = vadd.f32 -0.16666654, %v717_v25  ;;  %vm736_vm7 = vcmp.lt.s32.totalorder %v10012_v11, 0  ;;  %v10687_v29 = vsel %vm1232_vm5, %v1243_v1, %v1245_v27 }
  0xf9   : > { %v704_v15 = vsel %vm581_vm4, %v13244_v21, %v10188_v63  ;;  %v998_v50 = vsel %vm7970_vm6, 0, %v7969_v51  ;;  %v1143_v26 = vadd.s32 536870912, %v10657_v23  ;;  %v1242_v36 = vsel %vm1232_vm5, %v1239_v24, %v1241_v18 }
  0xfa   : > { %v1357_v63 = vand.u32 2139095040, %v10180_v9  ;;  %v10696_v60 = vsel %vm415_vm13, %v418_v43, %v10591_v34  ;;  %v13099_v0 = vxor.u32 2147483648, %v10653_v44  ;;  %vm574_vm4 = vcmp.eq.s32.totalorder %v10525_v17, 2 }
  0xfb   : > { %v10702_v22 = vsel %vm10518_vm1, 0, %v704_v15  ;;  %v13246_v51 = vand.u32 2147483647, %v10012_v11  ;;  %v857_v56 = vsel %vm736_vm7, %v856_v58, %v855_v2  ;;  %v1248_v45 = vand.u32 65535, %v10681_v5 }
  0xfc   : > { %13245 = vst [vmem:[#allocation36_spill] sm:$0xff] %v10702_v22  ;;  %v1251_v34 = vshrl.u32 %v10687_v29, 16  ;;  %v711_v46 = vadd.f32 -0.4999988, %v710_v28  ;;  %v719_v43 = vmul.f32 %v718_v6, %v10575_v62  ;;  %v1003_v3 = vsub.s32 4294967266, %v998_v50 }
  0xfd   : > { %vm10706_vm8 = vcmp.le.f32.partialorder %v13246_v51, 0.7853982  ;;  %v1273_v35 = vshrl.u32 %v1242_v36, 16  ;;  %v10718_v25 = vsel %vm574_vm4, %v13098_v57, %v10653_v44  ;;  %v983_v1 = vadd.s32 %v10440_v54, %v10435_v8 }
  0xfe   : > { %v10722_v39 = vshrl.u32 %v1143_v26, 30  ;;  %v1358_v2 = vshrl.u32 %v1357_v63, 23  ;;  %v10727_v24 = vsel %vm10706_vm8, %v10012_v11, %v857_v56  ;;  %v999_v18 = vsub.s32 32, %v998_v50 }
  0xff   : > { %v1249_v27 = vshrl.u32 %v10681_v5, 16  ;;  %v1272_v21 = vand.u32 65535, %v1242_v36  ;;  %v10735_v15 = vsel %vm571_vm3, %v10598_v59, %v13099_v0  ;;  %v723_v8 = vadd.s32 3, %v10702_v22 }
 0x100   : > { %13249 = vst [vmem:[#allocation37_spill] sm:$0xff] %v10722_v39  ;;  %v1250_v54 = vand.u32 65535, %v10687_v29  ;;  %v10739_v58 = vmul.u32 %v1251_v34, %v1248_v45  ;;  %v712_v28 = vmul.f32 %v711_v46, %v10575_v62  ;;  %v720_v6 = vadd.f32 1.0, %v719_v43 }
 0x101   : > { %v1004_v26 = vadd.s32 127, %v1003_v3  ;;  %v10742_v63 = vmul.u32 %v1273_v35, %v1248_v45  ;;  %v10746_v36 = vmul.f32 %v10727_v24, %v10727_v24  ;;  %v1000_v51 = vshll.u32 %v10565_v33, %v998_v50 }
 0x102   : > { %v1145_v56 = vshll.u32 %v10722_v39, 30  ;;  %v7977_v57 = vadd.s32 4294967169, %v1358_v2  ;;  %v1001_v0 = vshrl.u32 %v983_v1, %v999_v18  ;;  %v1274_v47 = vmul.u32 %v1272_v21, %v1248_v45 }
 0x103   : > { %v10750_v29 = vmul.u32 %v1272_v21, %v1249_v27  ;;  %v1278_v19 = vshll.u32 %v10742_v63, 16  ;;  %v10753_v62 = vand.u32 3, %v723_v8  ;;  %v1252_v46 = vmul.u32 %v1250_v54, %v1248_v45 }
 0x104   : > { %v10755_v43 = vmul.u32 %v1250_v54, %v1249_v27  ;;  %v1256_v3 = vshll.u32 %v10739_v58, 16  ;;  %v10758_v59 = vadd.f32 1.0, %v712_v28  ;;  %v10761_v33 = vmul.f32 %v720_v6, %v10558_v40 }
 0x105   : > { %v1005_v1 = vshll.u32 %v1004_v26, 23  ;;  %v863_v2 = vmul.f32 -0.001358992, %v10746_v36  ;;  %v870_v18 = vmul.f32 -0.00019511016, %v10746_v36  ;;  %v10767_v21 = vsub.s32 %v10657_v23, %v1145_v56 }
 0x106   : > { %13250 = vst [vmem:[#allocation38_spill] sm:$0xff] %v10758_v59  ;;  %v1364_v45 = vadd.s32 1, %v7977_v57  ;;  %v10769_v8 = vor.u32 %v1001_v0, %v1000_v51  ;;  %v13110_v54 = vshll.u32 %v10750_v29, 16  ;;  %vm1282_vm1 = vc.u32 %v1274_v47, %v1278_v19 }
 0x107   : > { %13251 = vst [vmem:[#allocation39_spill] sm:$0xff] %v10761_v33  ;;  %v10772_v28 = vadd.s32 %v1278_v19, %v1274_v47  ;;  %v1258_v40 = vshll.u32 %v10755_v43, 16  ;;  %vm1260_vm9 = vc.u32 %v1252_v46, %v1256_v3  ;;  %v1262_v6 = vadd.s32 %v1256_v3, %v1252_v46 }
 0x108   : > { %vm1365_vm10 = vcmp.gt.s32.totalorder %v1364_v45, 0  ;;  %v1006_v26 = vor.u32 4788187, %v1005_v1  ;;  %v1277_v50 = vmul.u32 %v1273_v35, %v1249_v27  ;;  %v1148_v23 = vsub.s32 0, %v10767_v21 }
 0x109   : > { %v1366_v32 = vsel %vm1365_vm10, %v1364_v45, 0  ;;  %v1255_v57 = vmul.u32 %v1251_v34, %v1249_v27  ;;  %v1283_v0 = vsel %vm1282_vm1, 1, %v13226_v20  ;;  %vm1147_vm11 = vcmp.lt.s32.totalorder %v10767_v21, 0 }
 0x10a   : > { %v1368_v51 = vand.u32 31, %v1366_v32  ;;  %v1261_v47 = vsel %vm1260_vm9, 1, %v13226_v20  ;;  %vm1286_vm12 = vc.u32 %v10772_v28, %v13110_v54  ;;  %v10785_v35 = vadd.f32 0.041655596, %v863_v2 }
 0x10b   : > { %vm1264_vm13 = vc.u32 %v1262_v6, %v1258_v40  ;;  %v871_v34 = vadd.f32 0.008332121, %v870_v18  ;;  %v1007_v27 = vand.u32 2147483647, %v1006_v26  ;;  %v1009_v3 = vcvt.s32.f32 %v10769_v8 }
 0x10c   : > { %v10787_v46 = vsub.s32 32, %v1368_v51  ;;  %v1285_v1 = vadd.s32 %v1283_v0, %v1277_v50  ;;  %v1149_v45 = vsel %vm1147_vm11, %v1148_v23, %v10767_v21  ;;  %v1263_v56 = vadd.s32 %v1261_v47, %v1255_v57 }
 0x10d   : > { %v1287_v44 = vsel %vm1286_vm12, 1, %v13226_v20  ;;  %v13252_v55 = vand.u32 2147483647, %v10180_v9  ;;  %v1265_v19 = vsel %vm1264_vm13, 1, %v13226_v20  ;;  %v1380_v2 = vshll.u32 %v13229_v48, %v1368_v51 }
 0x10e   : > { %v1381_v40 = vshrl.u32 %v13231_v52, %v10787_v46  ;;  %v1383_v18 = vshll.u32 %v13231_v52, %v1368_v51  ;;  %vm729_vm14 = vcmp.eq.s32.totalorder %v10753_v62, 2  ;;  %v1374_v50 = vshll.u32 %v13230_v30, %v1368_v51 }
 0x10f   : > { %v1361_v54 = vand.u32 8388607, %v13252_v55  ;;  %v1375_v8 = vshrl.u32 %v13232_v14, %v10787_v46  ;;  %v1377_v6 = vshll.u32 %v13232_v14, %v1368_v51  ;;  %v1378_v55 = vshrl.u32 %v13229_v48, %v10787_v46 }
 0x110   : > { %vm726_vm3 = vcmp.eq.s32.totalorder %v10753_v62, 0  ;;  %v1279_v26 = vshrl.u32 %v10742_v63, 16  ;;  %v1289_v23 = vadd.s32 %v1287_v44, %v1285_v1  ;;  %v10808_v57 = vshrl.u32 %v1366_v32, 5 }
 0x111   : > { %v1384_v0 = vshrl.u32 %v13233_v49, %v10787_v46  ;;  %v1257_v47 = vshrl.u32 %v10739_v58, 16  ;;  %v1267_v22 = vadd.s32 %v1265_v19, %v1263_v56  ;;  %v1371_v9 = vshll.u32 %v13228_v16, %v1368_v51 }
 0x112   : > { %v1372_v53 = vshrl.u32 %v13230_v30, %v10787_v46  ;;  %v1215_v39 = vshrl.u32 %v13228_v16, %v10595_v12  ;;  %v1362_v52 = vor.u32 8388608, %v1361_v54  ;;  %v1382_v14 = vor.u32 %v1381_v40, %v1380_v2 }
 0x113   : > { %v1385_v63 = vor.u32 %v1384_v0, %v1383_v18  ;;  %vm570_vm6 = vcmp.lt.s32.totalorder %v10525_v17, 2  ;;  %v1150_v32 = vclz %v1149_v45  ;;  %v1236_v44 = vsel %vm1234_vm15, %v10639_v38, 2102212464  ;;  %v13253_v18 = vld [vmem:[#allocation14_spill] sm:$0xff] }
 0x114   : > { %v10822_v58 = vor.u32 %v1375_v8, %v1374_v50  ;;  %v10824_v56 = vor.u32 %v1378_v55, %v1377_v6  ;;  %vm725_vm4 = vcmp.lt.s32.totalorder %v10753_v62, 2  ;;  %v1281_v51 = vshrl.u32 %v10750_v29, 16  ;;  %v13254_v50 = vld [vmem:[#allocation15_spill] sm:$0xff]  ;;  %v13258_v55 = vld [vmem:[#allocation18_spill] sm:$0xff] }
 0x115   : > { %v1290_v19 = vadd.s32 %v1289_v23, %v1279_v26  ;;  %vm1386_vm1 = vcmp.lt.s32.totalorder %v10808_v57, 1  ;;  %vm1389_vm9 = vcmp.lt.s32.totalorder %v10808_v57, 4  ;;  %v1259_v12 = vshrl.u32 %v10755_v43, 16 }
 0x116   : > { %v1268_v54 = vadd.s32 %v1267_v22, %v1257_v47  ;;  %v10831_v1 = vor.u32 %v1372_v53, %v1371_v9  ;;  %vm1388_vm15 = vcmp.lt.s32.totalorder %v10808_v57, 3  ;;  %v872_v38 = vmul.f32 %v871_v34, %v10746_v36 }
 0x117   : > { %v1010_v45 = vmul.f32 %v1009_v3, %v1007_v27  ;;  %v1395_v2 = vsel %vm1389_vm9, %v1382_v14, 920167782  ;;  %v1399_v40 = vsel %vm1389_vm9, %v1385_v63, 1326507024  ;;  %vm412_vm10 = vweird.f32 %v13253_v18 }
 0x118   : > { %vm567_vm11 = vweird.f32 %v13254_v50  ;;  %v1235_v53 = vsel %vm1231_vm0, %v1215_v39, %v10641_v42  ;;  %v1237_v9 = vsel %vm1233_vm2, %v10637_v13, %v1236_v44  ;;  %vm1387_vm12 = vcmp.lt.s32.totalorder %v10808_v57, 2 }
 0x119   : > { %v1398_v22 = vsel %vm1386_vm1, %v10822_v58, %v10824_v56  ;;  %v7972_v43 = vadd.s32 4294967294, %v1150_v32  ;;  %v1291_v34 = vadd.s32 %v1290_v19, %v1281_v51  ;;  %v1400_v27 = vsel %vm1388_vm15, %v1382_v14, %v1399_v40 }
 0x11a   : > { %v10854_v3 = vshll.u32 %v1362_v52, 8  ;;  %v10856_v8 = vadd.s32 %v1268_v54, %v1259_v12  ;;  %v13255_v42 = vshll.u32 %v10750_v29, 16  ;;  %v1394_v39 = vsel %vm1386_vm1, %v10831_v1, %v10822_v58  ;;  %v13260_v54 = vld [vmem:[#allocation22_spill] sm:$0xff] }
 0x11b   : > { %v1396_v6 = vsel %vm1388_vm15, %v10824_v56, %v1395_v2  ;;  %v13256_v52 = vxor.u32 2147483648, %v10758_v59  ;;  %v13257_v29 = vsub.s32 4, %v10376_v10  ;;  %vm891_vm0 = vcmp.lt.s32.totalorder %v13258_v55, 0 }
 0x11c   : > { %v10861_v13 = vadd.s32 %v10772_v28, %v13255_v42  ;;  %v10883_v26 = vsel %vm1387_vm12, %v1398_v22, %v1400_v27  ;;  %v13259_v23 = vxor.u32 2147483648, %v10761_v33  ;;  %v865_v47 = vmul.f32 %v10785_v35, %v10746_v36 }
 0x11d   : > { %v731_v14 = vsel %vm729_vm14, %v13256_v52, %v10761_v33  ;;  %v859_v28 = vsel %vm736_vm7, %v13257_v29, %v10376_v10  ;;  %v873_v63 = vadd.f32 -0.16666654, %v872_v38  ;;  %v1011_v32 = vxor.u32 2147483648, %v1010_v45 }
 0x11e   : > { %v728_v0 = vsel %vm726_vm3, %v10758_v59, %v13259_v23  ;;  %vm7973_vm2 = vcmp.lt.s32.totalorder %v7972_v43, 0  ;;  %v1238_v10 = vsel %vm1232_vm5, %v1235_v53, %v1237_v9  ;;  %v1295_v44 = vadd.s32 1, %v1291_v34 }
 0x11f   : > { %v10896_v51 = vsel %vm1387_vm12, %v1394_v39, %v1396_v6  ;;  %vm1294_vm7 = vc.u32 %v10856_v8, %v10861_v13  ;;  %v1403_v19 = vand.u32 65535, %v10854_v3  ;;  %v1406_v12 = vshrl.u32 %v10883_v26, 16 }
 0x120   : > { %v1512_v35 = vand.u32 2139095040, %v13260_v54  ;;  %v577_v4 = vsel %vm570_vm6, %v10735_v15, %v10718_v25  ;;  %vm722_vm5 = vweird.f32 %v9829_v7  ;;  %v10910_v38 = vsel %vm10706_vm8, 0, %v859_v28 }
 0x121   : > { %13261 = vst [vmem:[#allocation40_spill] sm:$0xff] %v10910_v38  ;;  %v13262_v2 = vand.u32 2147483647, %v13258_v55  ;;  %v732_v53 = vsel %vm725_vm4, %v728_v0, %v731_v14  ;;  %v866_v9 = vadd.f32 -0.4999988, %v865_v47  ;;  %v1292_v22 = vmul.u32 %v10681_v5, %v1238_v10 }
 0x122   : > { %v1428_v17 = vshrl.u32 %v10896_v51, 16  ;;  %v874_v25 = vmul.f32 %v873_v63, %v10746_v36  ;;  %v1012_v37 = vsel %vm891_vm0, %v1011_v32, %v1010_v45  ;;  %v1153_v15 = vsel %vm7973_vm2, 0, %v7972_v43 }
 0x123   : > { %vm10914_vm13 = vcmp.le.f32.partialorder %v13262_v2, 0.7853982  ;;  %v1296_v27 = vsel %vm1294_vm7, %v1295_v44, %v1291_v34  ;;  %v1404_v42 = vshrl.u32 %v10854_v3, 16  ;;  %v1405_v39 = vand.u32 65535, %v10883_v26 }
 0x124   : > { %v10928_v6 = vmul.u32 %v1406_v12, %v1403_v19  ;;  %v1513_v62 = vshrl.u32 %v1512_v35, 23  ;;  %v10933_v5 = vsel %vm412_vm10, nan, %v10696_v60  ;;  %v10937_v52 = vsel %vm567_vm11, nan, %v577_v4 }
 0x125   : > { %13265 = vst [vmem:[#allocation41_spill] sm:$0xff] %v10933_v5  ;;  %v10941_v45 = vsel %vm722_vm5, nan, %v732_v53  ;;  %v1427_v43 = vand.u32 65535, %v10896_v51  ;;  %v10947_v34 = vsel %vm10914_vm13, %v13258_v55, %v1012_v37  ;;  %v1158_v14 = vsub.s32 4294967266, %v1153_v15 }
 0x126   : > { %13266 = vst [vmem:[#allocation42_spill] sm:$0xff] %v10937_v52  ;;  %v10949_v29 = vadd.s32 %v1296_v27, %v1292_v22  ;;  %v10951_v60 = vmul.u32 %v1428_v17, %v1403_v19  ;;  %v867_v28 = vmul.f32 %v866_v9, %v10746_v36  ;;  %v875_v26 = vadd.f32 1.0, %v874_v25 }
 0x127   : > { %13267 = vst [vmem:[#allocation43_spill] sm:$0xff] %v10941_v45  ;;  %v878_v23 = vadd.s32 3, %v10910_v38  ;;  %v1013_v0 = vsub.s32 4, %v10537_v41  ;;  %v1407_v47 = vmul.u32 %v1405_v39, %v1403_v19  ;;  %v10956_v63 = vmul.u32 %v1405_v39, %v1404_v42 }
 0x128   : > { %v1411_v32 = vshll.u32 %v10928_v6, 16  ;;  %v7980_v10 = vadd.s32 4294967169, %v1513_v62  ;;  %v10961_v44 = vmul.f32 %v10947_v34, %v10947_v34  ;;  %v1138_v51 = vadd.s32 %v10610_v61, %v10606_v31 }
 0x129   : > { %v1429_v35 = vmul.u32 %v1427_v43, %v1403_v19  ;;  %v10965_v36 = vmul.u32 %v1427_v43, %v1404_v42  ;;  %v1154_v4 = vsub.s32 32, %v1153_v15  ;;  %v1159_v2 = vadd.s32 127, %v1158_v14 }
 0x12a   : > { %v1298_v53 = vadd.s32 536870912, %v10949_v29  ;;  %v1433_v9 = vshll.u32 %v10951_v60, 16  ;;  %v10969_v22 = vadd.f32 1.0, %v867_v28  ;;  %v10972_v25 = vmul.f32 %v875_v26, %v10727_v24 }
 0x12b   : > { %v10974_v37 = vand.u32 3, %v878_v23  ;;  %v10979_v31 = vsel %vm891_vm0, %v1013_v0, %v10537_v41  ;;  %v1018_v61 = vmul.f32 -0.001358992, %v10961_v44  ;;  %v1413_v19 = vshll.u32 %v10956_v63, 16 }
 0x12c   : > { %13268 = vst [vmem:[#allocation44_spill] sm:$0xff] %v10969_v22  ;;  %v1417_v27 = vadd.s32 %v1411_v32, %v1407_v47  ;;  %v1519_v39 = vadd.s32 1, %v7980_v10  ;;  %v1155_v62 = vshll.u32 %v10767_v21, %v1153_v15  ;;  %vm1415_vm8 = vc.u32 %v1407_v47, %v1411_v32 }
 0x12d   : > { %13269 = vst [vmem:[#allocation45_spill] sm:$0xff] %v10972_v25  ;;  %v13121_v43 = vshll.u32 %v10965_v36, 16  ;;  %v10985_v24 = vadd.s32 %v1433_v9, %v1429_v35  ;;  %v1156_v14 = vshrl.u32 %v1138_v51, %v1154_v4  ;;  %v1160_v28 = vshll.u32 %v1159_v2, 23 }
 0x12e   : > { %v10987_v26 = vshrl.u32 %v1298_v53, 30  ;;  %vm1437_vm14 = vc.u32 %v1429_v35, %v1433_v9  ;;  %v1410_v23 = vmul.u32 %v1406_v12, %v1404_v42  ;;  %v13120_v0 = vand.u32 2147483647, %v13260_v54 }
 0x12f   : > { %vm1520_vm3 = vcmp.gt.s32.totalorder %v1519_v39, 0  ;;  %v1416_v10 = vsel %vm1415_vm8, 1, %v13226_v20  ;;  %vm1419_vm6 = vc.u32 %v1417_v27, %v1413_v19  ;;  %v1432_v21 = vmul.u32 %v1428_v17, %v1404_v42 }
 0x130   : > { %v1521_v15 = vsel %vm1520_vm3, %v1519_v39, 0  ;;  %v1025_v47 = vmul.f32 -0.00019511016, %v10961_v44  ;;  %v1438_v32 = vsel %vm1437_vm14, 1, %v13226_v20  ;;  %vm1441_vm4 = vc.u32 %v10985_v24, %v13121_v43 }
 0x131   : > { %v1523_v51 = vand.u32 31, %v1521_v15  ;;  %v1019_v35 = vadd.f32 0.041655596, %v1018_v61  ;;  %v10997_v4 = vor.u32 %v1156_v14, %v1155_v62  ;;  %v10999_v12 = vor.u32 4788187, %v1160_v28 }
 0x132   : > { %v1300_v2 = vshll.u32 %v10987_v26, 30  ;;  %v1418_v53 = vadd.s32 %v1416_v10, %v1410_v23  ;;  %v1420_v17 = vsel %vm1419_vm6, 1, %v13226_v20  ;;  %v1516_v42 = vand.u32 8388607, %v13120_v0 }
 0x133   : > { %v11005_v9 = vsub.s32 32, %v1523_v51  ;;  %v1440_v19 = vadd.s32 %v1438_v32, %v1432_v21  ;;  %v1442_v27 = vsel %vm1441_vm4, 1, %v13226_v20  ;;  %v11008_v39 = vshrl.u32 %v1521_v15, 5 }
 0x134   : > { %v1535_v61 = vshll.u32 %v13229_v48, %v1523_v51  ;;  %v1526_v62 = vshll.u32 %v13228_v16, %v1523_v51  ;;  %v1529_v28 = vshll.u32 %v13230_v30, %v1523_v51  ;;  %v13270_v23 = vmov 2131351028  }
 0x135   : > { %v1527_v14 = vshrl.u32 %v13230_v30, %v11005_v9  ;;  %v1530_v10 = vshrl.u32 %v13270_v23, %v11005_v9  ;;  %v1532_v0 = vshll.u32 %v13270_v23, %v1523_v51  ;;  %v1533_v21 = vshrl.u32 %v13229_v48, %v11005_v9 }
 0x136   : > { %v13271_v15 = vmov 920167782   ;;  %v1026_v43 = vadd.f32 0.008332121, %v1025_v47  ;;  %v1162_v7 = vand.u32 2147483647, %v10999_v12  ;;  %v1164_v50 = vcvt.s32.f32 %v10997_v4 }
 0x137   : > { %v1536_v32 = vshrl.u32 %v13271_v15, %v11005_v9  ;;  %v1538_v41 = vshll.u32 %v13271_v15, %v1523_v51  ;;  %v1539_v59 = vshrl.u32 %v13233_v49, %v11005_v9  ;;  %vm884_vm0 = vcmp.eq.s32.totalorder %v10974_v37, 2 }
 0x138   : > { %v11029_v33 = vsub.s32 %v10949_v29, %v1300_v2  ;;  %v1434_v38 = vshrl.u32 %v10951_v60, 16  ;;  %v1444_v18 = vadd.s32 %v1442_v27, %v1440_v19  ;;  %v1412_v52 = vshrl.u32 %v10928_v6, 16 }
 0x139   : > { %v1537_v45 = vor.u32 %v1536_v32, %v1535_v61  ;;  %v1422_v51 = vadd.s32 %v1420_v17, %v1418_v53  ;;  %v11033_v47 = vor.u32 %v1527_v14, %v1526_v62  ;;  %v11035_v12 = vor.u32 %v1530_v10, %v1529_v28 }
 0x13a   : > { %vm881_vm2 = vcmp.eq.s32.totalorder %v10974_v37, 0  ;;  %v1517_v4 = vor.u32 8388608, %v1516_v42  ;;  %v11038_v5 = vor.u32 %v1533_v21, %v1532_v0  ;;  %v1540_v54 = vor.u32 %v1539_v59, %v1538_v41 }
 0x13b   : > { %vm1541_vm7 = vcmp.lt.s32.totalorder %v11008_v39, 1  ;;  %v1370_v29 = vshrl.u32 %v13228_v16, %v10787_v46  ;;  %v1391_v6 = vsel %vm1389_vm9, %v10824_v56, 2102212464  ;;  %vm1543_vm8 = vcmp.lt.s32.totalorder %v11008_v39, 3 }
 0x13c   : > { %vm1544_vm14 = vcmp.lt.s32.totalorder %v11008_v39, 4  ;;  %v1303_v60 = vsub.s32 0, %v11029_v33  ;;  %v1436_v2 = vshrl.u32 %v10965_v36, 16  ;;  %v1445_v0 = vadd.s32 %v1444_v18, %v1434_v38 }
 0x13d   : > { %v1550_v59 = vsel %vm1544_vm14, %v1537_v45, 920167782  ;;  %v1414_v41 = vshrl.u32 %v10956_v63, 16  ;;  %v1423_v53 = vadd.s32 %v1422_v51, %v1412_v52  ;;  %vm1542_vm3 = vcmp.lt.s32.totalorder %v11008_v39, 2 }
 0x13e   : > { %v1549_v46 = vsel %vm1541_vm7, %v11033_v47, %v11035_v12  ;;  %vm880_vm9 = vcmp.lt.s32.totalorder %v10974_v37, 2  ;;  %vm1302_vm6 = vcmp.lt.s32.totalorder %v11029_v33, 0  ;;  %v1551_v56 = vsel %vm1543_vm8, %v11038_v5, %v1550_v59  ;;  %v13275_v59 = vld [vmem:[#allocation19_spill] sm:$0xff] }
 0x13f   : > { %v1554_v18 = vsel %vm1544_vm14, %v1540_v54, 1326507024  ;;  %v11065_v38 = vshll.u32 %v1517_v4, 8  ;;  %v13131_v52 = vxor.u32 2147483648, %v10972_v25  ;;  %v1020_v63 = vmul.f32 %v1019_v35, %v10961_v44 }
 0x140   : > { %v1390_v17 = vsel %vm1386_vm1, %v1370_v29, %v10831_v1  ;;  %v1553_v42 = vsel %vm1541_vm7, %v11035_v12, %v11038_v5  ;;  %v1392_v19 = vsel %vm1388_vm15, %v10822_v58, %v1391_v6  ;;  %v1446_v54 = vadd.s32 %v1445_v0, %v1436_v2 }
 0x141   : > { %v1552_v27 = vsel %vm1542_vm3, %v1549_v46, %v1551_v56  ;;  %v1555_v35 = vsel %vm1543_vm8, %v1537_v45, %v1554_v18  ;;  %v1027_v61 = vmul.f32 %v1026_v43, %v10961_v44  ;;  %v1304_v1 = vsel %vm1302_vm6, %v1303_v60, %v11029_v33 }
 0x142   : > { %v11085_v62 = vadd.s32 %v1423_v53, %v1414_v41  ;;  %v13272_v14 = vshll.u32 %v10965_v36, 16  ;;  %v1165_v10 = vmul.f32 %v1164_v50, %v1162_v7  ;;  %v1556_v58 = vsel %vm1542_vm3, %v1553_v42, %v1555_v35 }
 0x143   : > { %v1558_v21 = vand.u32 65535, %v11065_v38  ;;  %v1559_v32 = vshrl.u32 %v11065_v38, 16  ;;  %v13273_v45 = vxor.u32 2147483648, %v10969_v22  ;;  %v11104_v36 = vsel %vm10914_vm13, 0, %v10979_v31 }
 0x144   : > { %v11090_v28 = vadd.s32 %v10985_v24, %v13272_v14  ;;  %13274 = vst [vmem:[#allocation46_spill] sm:$0xff] %v11104_v36  ;;  %v1393_v7 = vsel %vm1387_vm12, %v1390_v17, %v1392_v19  ;;  %v1583_v50 = vshrl.u32 %v1552_v27, 16  ;;  %v1305_v24 = vclz %v1304_v1 }
 0x145   : > { %v886_v43 = vsel %vm884_vm0, %v13273_v45, %v10972_v25  ;;  %v1450_v51 = vadd.s32 1, %v1446_v54  ;;  %v1560_v4 = vand.u32 65535, %v1556_v58  ;;  %v1561_v29 = vshrl.u32 %v1556_v58, 16 }
 0x146   : > { %v883_v6 = vsel %vm881_vm2, %v10969_v22, %v13131_v52  ;;  %v1021_v60 = vadd.f32 -0.4999988, %v1020_v63  ;;  %v1028_v2 = vadd.f32 -0.16666654, %v1027_v61  ;;  %vm1449_vm1 = vc.u32 %v11085_v62, %v11090_v28 }
 0x147   : > { %v1166_v40 = vxor.u32 2147483648, %v1165_v10  ;;  %v1562_v31 = vmul.u32 %v1560_v4, %v1558_v21  ;;  %v11115_v57 = vmul.u32 %v1561_v29, %v1558_v21  ;;  %v11117_v0 = vmul.u32 %v1560_v4, %v1559_v32 }
 0x148   : > { %vm1046_vm15 = vcmp.lt.s32.totalorder %v13275_v59, 0  ;;  %v1447_v41 = vmul.u32 %v10854_v3, %v1393_v7  ;;  %v1582_v53 = vand.u32 65535, %v1552_v27  ;;  %v11121_v46 = vmul.u32 %v1583_v50, %v1558_v21  ;;  %v13279_v27 = vld [vmem:[#allocation23_spill] sm:$0xff]  ;;  %v13280_v7 = vld [vmem:[#allocation37_spill] sm:$0xff] }
 0x149   : > { %v13276_v56 = vand.u32 2147483647, %v13275_v59  ;;  %v7975_v63 = vadd.s32 4294967294, %v1305_v24  ;;  %v1451_v17 = vsel %vm1449_vm1, %v1450_v51, %v1446_v54  ;;  %v1566_v42 = vshll.u32 %v11115_v57, 16 }
 0x14a   : > { %v11132_v19 = vsel %vm880_vm9, %v883_v6, %v886_v43  ;;  %v1022_v35 = vmul.f32 %v1021_v60, %v10961_v44  ;;  %v1033_v3 = vadd.s32 3, %v11104_v36  ;;  %v1667_v61 = vand.u32 2139095040, %v13279_v27 }
 0x14b   : > { %vm11125_vm12 = vcmp.le.f32.partialorder %v13276_v56, 0.7853982  ;;  %v1029_v1 = vmul.f32 %v1028_v2, %v10961_v44  ;;  %v1167_v14 = vsel %vm1046_vm15, %v1166_v40, %v1165_v10  ;;  %v1568_v58 = vshll.u32 %v11117_v0, 16 }
 0x14c   : > { %vm1570_vm13 = vc.u32 %v1562_v31, %v1566_v42  ;;  %v11141_v54 = vadd.s32 %v1451_v17, %v1447_v41  ;;  %v1584_v45 = vmul.u32 %v1582_v53, %v1558_v21  ;;  %v11143_v37 = vmul.u32 %v1582_v53, %v1559_v32 }
 0x14d   : > { %v1588_v43 = vshll.u32 %v11121_v46, 16  ;;  %v1168_v24 = vsub.s32 4, %v13280_v7  ;;  %vm7976_vm4 = vcmp.lt.s32.totalorder %v7975_v63, 0  ;;  %v1565_v51 = vmul.u32 %v1561_v29, %v1559_v32 }
 0x14e   : > { %v1572_v4 = vadd.s32 %v1566_v42, %v1562_v31  ;;  %v11150_v44 = vsel %vm11125_vm12, %v13275_v59, %v1167_v14  ;;  %v1571_v10 = vsel %vm1570_vm13, 1, %v13226_v20  ;;  %v1587_v6 = vmul.u32 %v1583_v50, %v1559_v32 }
 0x14f   : > { %v1668_v60 = vshrl.u32 %v1667_v61, 23  ;;  %v11153_v2 = vadd.f32 1.0, %v1022_v35  ;;  %v1030_v21 = vadd.f32 1.0, %v1029_v1  ;;  %v11155_v40 = vand.u32 3, %v1033_v3 }
 0x150   : > { %vm1574_vm0 = vc.u32 %v1572_v4, %v1568_v58  ;;  %v1308_v41 = vsel %vm7976_vm4, 0, %v7975_v63  ;;  %v1453_v53 = vadd.s32 536870912, %v11141_v54  ;;  %v1590_v29 = vshll.u32 %v11143_v37, 16 }
 0x151   : > { %13281 = vst [vmem:[#allocation23_spill] sm:$0xff] %v11153_v2  ;;  %vm1592_vm2 = vc.u32 %v1584_v45, %v1588_v43  ;;  %v11162_v31 = vsel %vm1046_vm15, %v1168_v24, %v13280_v7  ;;  %v11166_v32 = vmul.f32 %v11150_v44, %v11150_v44  ;;  %v1573_v50 = vadd.s32 %v1571_v10, %v1565_v51 }
 0x152   : > { %v1593_v56 = vsel %vm1592_vm2, 1, %v13226_v20  ;;  %v1575_v17 = vsel %vm1574_vm0, 1, %v13226_v20  ;;  %v1594_v63 = vadd.s32 %v1588_v43, %v1584_v45  ;;  %v7983_v35 = vadd.s32 4294967169, %v1668_v60 }
 0x153   : > { %v1595_v42 = vadd.s32 %v1593_v56, %v1587_v6  ;;  %v11171_v3 = vmul.f32 %v1030_v21, %v10947_v34  ;;  %v1293_v61 = vadd.s32 %v10861_v13, %v10856_v8  ;;  %v1309_v1 = vsub.s32 32, %v1308_v41 }
 0x154   : > { %v1313_v14 = vsub.s32 4294967266, %v1308_v41  ;;  %v13133_v58 = vxor.u32 2147483648, %v11153_v2  ;;  %v11176_v7 = vshrl.u32 %v1453_v53, 30  ;;  %vm1596_vm9 = vc.u32 %v1594_v63, %v1590_v29 }
 0x155   : > { %13282 = vst [vmem:[#allocation37_spill] sm:$0xff] %v11171_v3  ;;  %v1674_v24 = vadd.s32 1, %v7983_v35  ;;  %v1567_v51 = vshrl.u32 %v11115_v57, 16  ;;  %v1577_v4 = vadd.s32 %v1575_v17, %v1573_v50  ;;  %v1589_v45 = vshrl.u32 %v11121_v46, 16 }
 0x156   : > { %v1597_v43 = vsel %vm1596_vm9, 1, %v13226_v20  ;;  %v1180_v34 = vmul.f32 -0.00019511016, %v11166_v32  ;;  %v1310_v10 = vshll.u32 %v11029_v33, %v1308_v41  ;;  %v1311_v13 = vshrl.u32 %v1293_v61, %v1309_v1 }
 0x157   : > { %v1599_v8 = vadd.s32 %v1597_v43, %v1595_v42  ;;  %vm1675_vm6 = vcmp.gt.s32.totalorder %v1674_v24, 0  ;;  %v1314_v6 = vadd.s32 127, %v1313_v14  ;;  %v1525_v60 = vshrl.u32 %v13228_v16, %v11005_v9 }
 0x158   : > { %v1676_v21 = vsel %vm1675_vm6, %v1674_v24, 0  ;;  %v1455_v53 = vshll.u32 %v11176_v7, 30  ;;  %v1546_v57 = vsel %vm1544_vm14, %v11038_v5, 2102212464  ;;  %v13132_v46 = vand.u32 2147483647, %v13279_v27 }
 0x159   : > { %v1678_v50 = vand.u32 31, %v1676_v21  ;;  %v1569_v56 = vshrl.u32 %v11117_v0, 16  ;;  %v1578_v33 = vadd.s32 %v1577_v4, %v1567_v51  ;;  %v1591_v41 = vshrl.u32 %v11143_v37, 16 }
 0x15a   : > { %v1600_v17 = vadd.s32 %v1599_v8, %v1589_v45  ;;  %v13134_v42 = vxor.u32 2147483648, %v11171_v3  ;;  %v1173_v9 = vmul.f32 -0.001358992, %v11166_v32  ;;  %v1181_v35 = vadd.f32 0.008332121, %v1180_v34 }
 0x15b   : > { %v11194_v61 = vsub.s32 32, %v1678_v50  ;;  %v1312_v1 = vor.u32 %v1311_v13, %v1310_v10  ;;  %v1315_v14 = vshll.u32 %v1314_v6, 23  ;;  %v1545_v5 = vsel %vm1541_vm7, %v1525_v60, %v11033_v47 }
 0x15c   : > { %v1547_v0 = vsel %vm1543_vm8, %v11035_v12, %v1546_v57  ;;  %v11203_v37 = vsub.s32 %v11141_v54, %v1455_v53  ;;  %v11205_v24 = vadd.s32 %v1594_v63, %v1590_v29  ;;  %v1671_v51 = vand.u32 8388607, %v13132_v46 }
 0x15d   : > { %v1690_v4 = vshll.u32 %v13229_v48, %v1678_v50  ;;  %v11210_v45 = vadd.s32 %v1578_v33, %v1569_v56  ;;  %v1601_v43 = vadd.s32 %v1600_v17, %v1591_v41  ;;  %v11212_v34 = vshrl.u32 %v1676_v21, 5 }
 0x15e   : > { %v1691_v47 = vshrl.u32 %v13271_v15, %v11194_v61  ;;  %vm1036_vm7 = vcmp.eq.s32.totalorder %v11155_v40, 0  ;;  %vm1039_vm8 = vcmp.eq.s32.totalorder %v11155_v40, 2  ;;  %v1681_v12 = vshll.u32 %v13228_v16, %v1678_v50 }
 0x15f   : > { %v1684_v54 = vshll.u32 %v13230_v30, %v1678_v50  ;;  %v1693_v29 = vshll.u32 %v13271_v15, %v1678_v50  ;;  %v1694_v63 = vshrl.u32 %v13233_v49, %v11194_v61  ;;  %v1682_v10 = vshrl.u32 %v13230_v30, %v11194_v61 }
 0x160   : > { %v1685_v8 = vshrl.u32 %v13270_v23, %v11194_v61  ;;  %v1687_v13 = vshll.u32 %v13270_v23, %v1678_v50  ;;  %v1688_v6 = vshrl.u32 %v13229_v48, %v11194_v61  ;;  %v1174_v60 = vadd.f32 0.041655596, %v1173_v9 }
 0x161   : > { %v1182_v21 = vmul.f32 %v1181_v35, %v11166_v32  ;;  %v1316_v53 = vor.u32 4788187, %v1315_v14  ;;  %v1692_v57 = vor.u32 %v1691_v47, %v1690_v4  ;;  %v1319_v56 = vcvt.s32.f32 %v1312_v1 }
 0x162   : > { %vm1457_vm14 = vcmp.lt.s32.totalorder %v11203_v37, 0  ;;  %v1458_v33 = vsub.s32 0, %v11203_v37  ;;  %v1548_v41 = vsel %vm1542_vm3, %v1545_v5, %v1547_v0  ;;  %v1605_v17 = vadd.s32 1, %v1601_v43 }
 0x163   : > { %v1672_v52 = vor.u32 8388608, %v1671_v51  ;;  %v1695_v46 = vor.u32 %v1694_v63, %v1693_v29  ;;  %vm1699_vm1 = vcmp.lt.s32.totalorder %v11212_v34, 4  ;;  %vm1604_vm15 = vc.u32 %v11210_v45, %v11205_v24 }
 0x164   : > { %v11238_v50 = vor.u32 %v1682_v10, %v1681_v12  ;;  %v11240_v9 = vor.u32 %v1685_v8, %v1684_v54  ;;  %v11242_v35 = vor.u32 %v1688_v6, %v1687_v13  ;;  %vm13190_vm13 = vweird.f32 %v10012_v11  ;;  %v13283_v54 = vld [vmem:[#allocation24_spill] sm:$0xff] }
 0x165   : > { %v1317_v1 = vand.u32 2147483647, %v1316_v53  ;;  %vm1696_vm4 = vcmp.lt.s32.totalorder %v11212_v34, 1  ;;  %vm1698_vm3 = vcmp.lt.s32.totalorder %v11212_v34, 3  ;;  %v1705_v39 = vsel %vm1699_vm1, %v1692_v57, 920167782 }
 0x166   : > { %v1175_v14 = vmul.f32 %v1174_v60, %v11166_v32  ;;  %v1183_v5 = vadd.f32 -0.16666654, %v1182_v21  ;;  %v1459_v0 = vsel %vm1457_vm14, %v1458_v33, %v11203_v37  ;;  %v1602_v51 = vmul.u32 %v11065_v38, %v1548_v41  ;;  %v13285_v33 = vld [vmem:[#allocation20_spill] sm:$0xff] }
 0x167   : > { %vm13189_vm0 = vweird.f32 %v13258_v55  ;;  %v1606_v4 = vsel %vm1604_vm15, %v1605_v17, %v1601_v43  ;;  %v1709_v47 = vsel %vm1699_vm1, %v1695_v46, 1326507024  ;;  %v11257_v12 = vshll.u32 %v1672_v52, 8 }
 0x168   : > { %v1822_v29 = vand.u32 2139095040, %v13283_v54  ;;  %vm1697_vm2 = vcmp.lt.s32.totalorder %v11212_v34, 2  ;;  %v1704_v63 = vsel %vm1696_vm4, %v11238_v50, %v11240_v9  ;;  %v1706_v38 = vsel %vm1698_vm3, %v11242_v35, %v1705_v39 }
 0x169   : > { %v1708_v46 = vsel %vm1696_vm4, %v11240_v9, %v11242_v35  ;;  %vm1035_vm9 = vcmp.lt.s32.totalorder %v11155_v40, 2  ;;  %v11276_v52 = vsel %vm11125_vm12, 0, %v11162_v31  ;;  %v1320_v43 = vmul.f32 %v1319_v56, %v1317_v1 }
 0x16a   : > { %13284 = vst [vmem:[#allocation47_spill] sm:$0xff] %v11276_v52  ;;  %v1710_v10 = vsel %vm1698_vm3, %v1692_v57, %v1709_v47  ;;  %v1038_v8 = vsel %vm1036_vm7, %v11153_v2, %v13134_v42  ;;  %v1041_v13 = vsel %vm1039_vm8, %v13133_v58, %v11171_v3  ;;  %v1176_v6 = vadd.f32 -0.4999988, %v1175_v14 }
 0x16b   : > { %v1607_v18 = vadd.s32 %v1606_v4, %v1602_v51  ;;  %v1460_v31 = vclz %v1459_v0  ;;  %v1707_v60 = vsel %vm1697_vm2, %v1704_v63, %v1706_v38  ;;  %v1711_v21 = vsel %vm1697_vm2, %v1708_v46, %v1710_v10 }
 0x16c   : > { %v1713_v53 = vand.u32 65535, %v11257_v12  ;;  %v1184_v57 = vmul.f32 %v1183_v5, %v11166_v32  ;;  %v1188_v56 = vadd.s32 3, %v11276_v52  ;;  %vm1201_vm12 = vcmp.lt.s32.totalorder %v13285_v33, 0 }
 0x16d   : > { %v1823_v41 = vshrl.u32 %v1822_v29, 23  ;;  %v1321_v17 = vxor.u32 2147483648, %v1320_v43  ;;  %v1714_v1 = vshrl.u32 %v11257_v12, 16  ;;  %v1715_v39 = vand.u32 65535, %v1711_v21 }
 0x16e   : > { %v1716_v14 = vshrl.u32 %v1711_v21, 16  ;;  %v1042_v0 = vsel %vm1035_vm9, %v1038_v8, %v1041_v13  ;;  %v1608_v51 = vadd.s32 536870912, %v1607_v18  ;;  %v1737_v4 = vand.u32 65535, %v1707_v60 }
 0x16f   : > { %v1738_v47 = vshrl.u32 %v1707_v60, 16  ;;  %v1177_v63 = vmul.f32 %v1176_v6, %v11166_v32  ;;  %v1323_v5 = vsub.s32 4, %v10987_v26  ;;  %v7978_v38 = vadd.s32 4294967294, %v1460_v31 }
 0x170   : > { %v11303_v46 = vmul.u32 %v1716_v14, %v1713_v53  ;;  %v11308_v29 = vsel %vm13190_vm13, nan, %v11132_v19  ;;  %v1185_v10 = vadd.f32 1.0, %v1184_v57  ;;  %v13287_v21 = vand.u32 2147483647, %v13285_v33 }
 0x171   : > { %13286 = vst [vmem:[#allocation48_spill] sm:$0xff] %v11308_v29  ;;  %v7986_v8 = vadd.s32 4294967169, %v1823_v41  ;;  %v1322_v32 = vsel %vm1201_vm12, %v1321_v17, %v1320_v43  ;;  %v1717_v13 = vmul.u32 %v1715_v39, %v1713_v53  ;;  %v11318_v6 = vmul.u32 %v1715_v39, %v1714_v1 }
 0x172   : > { %vm11312_vm6 = vcmp.le.f32.partialorder %v13287_v21, 0.7853982  ;;  %v1721_v31 = vshll.u32 %v11303_v46, 16  ;;  %v11323_v19 = vsel %vm13189_vm0, nan, %v1042_v0  ;;  %v11325_v60 = vshrl.u32 %v1608_v51, 30 }
 0x173   : > { %13290 = vst [vmem:[#allocation49_spill] sm:$0xff] %v11323_v19  ;;  %v11327_v57 = vmul.u32 %v1738_v47, %v1713_v53  ;;  %v11329_v21 = vmul.u32 %v1737_v4, %v1714_v1  ;;  %v11331_v58 = vadd.f32 1.0, %v1177_v63  ;;  %v11333_v41 = vand.u32 3, %v1188_v56 }
 0x174   : > { %v11338_v43 = vsel %vm1201_vm12, %v1323_v5, %v10987_v26  ;;  %vm7979_vm7 = vcmp.lt.s32.totalorder %v7978_v38, 0  ;;  %v11341_v17 = vmul.f32 %v1185_v10, %v11150_v44  ;;  %v11346_v39 = vsel %vm11312_vm6, %v13285_v33, %v1322_v32 }
 0x175   : > { %13291 = vst [vmem:[#allocation50_spill] sm:$0xff] %v11331_v58  ;;  %v1739_v0 = vmul.u32 %v1737_v4, %v1713_v53  ;;  %v1829_v51 = vadd.s32 1, %v7986_v8  ;;  %v1448_v56 = vadd.s32 %v11090_v28, %v11085_v62  ;;  %v1723_v63 = vshll.u32 %v11318_v6, 16 }
 0x176   : > { %13292 = vst [vmem:[#allocation51_spill] sm:$0xff] %v11341_v17  ;;  %vm1725_vm8 = vc.u32 %v1717_v13, %v1721_v31  ;;  %v1727_v42 = vadd.s32 %v1721_v31, %v1717_v13  ;;  %v11351_v26 = vsel %vm7979_vm7, 0, %v7978_v38  ;;  %v1610_v5 = vshll.u32 %v11325_v60, 30 }
 0x177   : > { %v1743_v44 = vshll.u32 %v11327_v57, 16  ;;  %v11358_v32 = vmul.f32 %v11346_v39, %v11346_v39  ;;  %v1464_v53 = vsub.s32 32, %v11351_v26  ;;  %v1720_v4 = vmul.u32 %v1716_v14, %v1714_v1 }
 0x178   : > { %v1742_v62 = vmul.u32 %v1738_v47, %v1714_v1  ;;  %v1726_v28 = vsel %vm1725_vm8, 1, %v13226_v20  ;;  %vm1830_vm15 = vcmp.gt.s32.totalorder %v1829_v51, 0  ;;  %v1468_v38 = vsub.s32 4294967266, %v11351_v26 }
 0x179   : > { %vm1747_vm14 = vc.u32 %v1739_v0, %v1743_v44  ;;  %v11362_v8 = vadd.s32 %v1743_v44, %v1739_v0  ;;  %vm1729_vm9 = vc.u32 %v1727_v42, %v1723_v63  ;;  %v11368_v55 = vsub.s32 %v1607_v18, %v1610_v5 }
 0x17a   : > { %v1748_v13 = vsel %vm1747_vm14, 1, %v13226_v20  ;;  %v13293_v14 = vshll.u32 %v11329_v21, 16  ;;  %v1831_v1 = vsel %vm1830_vm15, %v1829_v51, 0  ;;  %v1328_v0 = vmul.f32 -0.001358992, %v11358_v32 }
 0x17b   : > { %v1728_v44 = vadd.s32 %v1726_v28, %v1720_v4  ;;  %v1750_v11 = vadd.s32 %v1748_v13, %v1742_v62  ;;  %v1335_v42 = vmul.f32 -0.00019511016, %v11358_v32  ;;  %v1730_v63 = vsel %vm1729_vm9, 1, %v13226_v20 }
 0x17c   : > { %vm1751_vm12 = vc.u32 %v11362_v8, %v13293_v14  ;;  %v1833_v10 = vand.u32 31, %v1831_v1  ;;  %v1465_v18 = vshll.u32 %v11203_v37, %v11351_v26  ;;  %v1466_v5 = vshrl.u32 %v1448_v56, %v1464_v53 }
 0x17d   : > { %v1752_v31 = vsel %vm1751_vm12, 1, %v13226_v20  ;;  %v1469_v2 = vadd.s32 127, %v1468_v38  ;;  %v13294_v51 = vand.u32 2147483647, %v13283_v54  ;;  %vm1612_vm7 = vcmp.lt.s32.totalorder %v11368_v55, 0 }
 0x17e   : > { %v1613_v4 = vsub.s32 0, %v11368_v55  ;;  %v1722_v62 = vshrl.u32 %v11303_v46, 16  ;;  %v11385_v28 = vsub.s32 32, %v1833_v10  ;;  %v1732_v13 = vadd.s32 %v1730_v63, %v1728_v44 }
 0x17f   : > { %v1826_v14 = vand.u32 8388607, %v13294_v51  ;;  %v1744_v47 = vshrl.u32 %v11327_v57, 16  ;;  %v1754_v3 = vadd.s32 %v1752_v31, %v1750_v11  ;;  %v11388_v22 = vshrl.u32 %v1831_v1, 5 }
 0x180   : > { %v1836_v37 = vshll.u32 %v13228_v16, %v1833_v10  ;;  %v1837_v56 = vshrl.u32 %v13230_v30, %v11385_v28  ;;  %v1839_v26 = vshll.u32 %v13230_v30, %v1833_v10  ;;  %v1842_v53 = vshll.u32 %v13270_v23, %v1833_v10 }
 0x181   : > { %v1840_v46 = vshrl.u32 %v13270_v23, %v11385_v28  ;;  %v1843_v38 = vshrl.u32 %v13229_v48, %v11385_v28  ;;  %v1845_v57 = vshll.u32 %v13229_v48, %v1833_v10  ;;  %v1846_v11 = vshrl.u32 %v13271_v15, %v11385_v28 }
 0x182   : > { %vm1194_vm8 = vcmp.eq.s32.totalorder %v11333_v41, 2  ;;  %v1470_v31 = vshll.u32 %v1469_v2, 23  ;;  %v1680_v1 = vshrl.u32 %v13228_v16, %v11194_v61  ;;  %v1701_v44 = vsel %vm1699_vm1, %v11242_v35, 2102212464 }
 0x183   : > { %v1827_v63 = vor.u32 8388608, %v1826_v14  ;;  %v1614_v51 = vsel %vm1612_vm7, %v1613_v4, %v11368_v55  ;;  %v1746_v25 = vshrl.u32 %v11329_v21, 16  ;;  %v1755_v52 = vadd.s32 %v1754_v3, %v1744_v47 }
 0x184   : > { %v1848_v36 = vshll.u32 %v13271_v15, %v1833_v10  ;;  %vm1191_vm14 = vcmp.eq.s32.totalorder %v11333_v41, 0  ;;  %v1724_v2 = vshrl.u32 %v11318_v6, 16  ;;  %v1733_v19 = vadd.s32 %v1732_v13, %v1722_v62 }
 0x185   : > { %v1847_v61 = vor.u32 %v1846_v11, %v1845_v57  ;;  %v1849_v29 = vshrl.u32 %v13233_v49, %v11385_v28  ;;  %v11417_v35 = vor.u32 %v1837_v56, %v1836_v37  ;;  %v11419_v14 = vor.u32 %v1840_v46, %v1839_v26 }
 0x186   : > { %v11421_v54 = vor.u32 %v1843_v38, %v1842_v53  ;;  %vm1854_vm1 = vcmp.lt.s32.totalorder %v11388_v22, 4  ;;  %v1615_v3 = vclz %v1614_v51  ;;  %vm1851_vm15 = vcmp.lt.s32.totalorder %v11388_v22, 1 }
 0x187   : > { %v1850_v47 = vor.u32 %v1849_v29, %v1848_v36  ;;  %vm1853_vm9 = vcmp.lt.s32.totalorder %v11388_v22, 3  ;;  %v1467_v6 = vor.u32 %v1466_v5, %v1465_v18  ;;  %v1700_v10 = vsel %vm1696_vm4, %v1680_v1, %v11238_v50 }
 0x188   : > { %v1702_v4 = vsel %vm1698_vm3, %v11240_v9, %v1701_v44  ;;  %v1756_v62 = vadd.s32 %v1755_v52, %v1746_v25  ;;  %v1471_v13 = vor.u32 4788187, %v1470_v31  ;;  %v11432_v37 = vadd.s32 %v1733_v19, %v1724_v2 }
 0x189   : > { %v13295_v56 = vshll.u32 %v11329_v21, 16  ;;  %v1860_v29 = vsel %vm1854_vm1, %v1847_v61, 920167782  ;;  %v1329_v18 = vadd.f32 0.041655596, %v1328_v0  ;;  %vm1852_vm12 = vcmp.lt.s32.totalorder %v11388_v22, 2 }
 0x18a   : > { %v1859_v50 = vsel %vm1851_vm15, %v11417_v35, %v11419_v14  ;;  %v1861_v25 = vsel %vm1853_vm9, %v11421_v54, %v1860_v29  ;;  %v7981_v9 = vadd.s32 4294967294, %v1615_v3  ;;  %v1703_v52 = vsel %vm1697_vm2, %v1700_v10, %v1702_v4 }
 0x18b   : > { %v11437_v36 = vadd.s32 %v11362_v8, %v13295_v56  ;;  %v1864_v19 = vsel %vm1854_vm1, %v1850_v47, 1326507024  ;;  %v11453_v21 = vshll.u32 %v1827_v63, 8  ;;  %v1336_v8 = vadd.f32 0.008332121, %v1335_v42 }
 0x18c   : > { %v1474_v0 = vcvt.s32.f32 %v1467_v6  ;;  %v1760_v5 = vadd.s32 1, %v1756_v62  ;;  %v1863_v26 = vsel %vm1851_vm15, %v11419_v14, %v11421_v54  ;;  %v1472_v53 = vand.u32 2147483647, %v1471_v13  ;;  %v13299_v6 = vld [vmem:[#allocation21_spill] sm:$0xff] }
 0x18d   : > { %vm1759_vm4 = vc.u32 %v11432_v37, %v11437_v36  ;;  %v1862_v34 = vsel %vm1852_vm12, %v1859_v50, %v1861_v25  ;;  %v1865_v46 = vsel %vm1853_vm9, %v1847_v61, %v1864_v19  ;;  %vm1190_vm3 = vcmp.lt.s32.totalorder %v11333_v41, 2 }
 0x18e   : > { %v13296_v42 = vxor.u32 2147483648, %v11331_v58  ;;  %v11474_v57 = vsel %vm11312_vm6, 0, %v11338_v43  ;;  %v1757_v11 = vmul.u32 %v11257_v12, %v1703_v52  ;;  %vm7982_vm2 = vcmp.lt.s32.totalorder %v7981_v9, 0 }
 0x18f   : > { %13297 = vst [vmem:[#allocation52_spill] sm:$0xff] %v11474_v57  ;;  %v1866_v31 = vsel %vm1852_vm12, %v1863_v26, %v1865_v46  ;;  %v1868_v1 = vand.u32 65535, %v11453_v21  ;;  %v1869_v44 = vshrl.u32 %v11453_v21, 16  ;;  %v13298_v63 = vxor.u32 2147483648, %v11341_v17 }
 0x190   : > { %v1196_v38 = vsel %vm1194_vm8, %v13296_v42, %v11341_v17  ;;  %v1330_v40 = vmul.f32 %v1329_v18, %v11358_v32  ;;  %v1761_v43 = vsel %vm1759_vm4, %v1760_v5, %v1756_v62  ;;  %v1893_v2 = vshrl.u32 %v1862_v34, 16 }
 0x191   : > { %v1193_v51 = vsel %vm1191_vm14, %v11331_v58, %v13298_v63  ;;  %v1337_v12 = vmul.f32 %v1336_v8, %v11358_v32  ;;  %v1475_v61 = vmul.f32 %v1474_v0, %v1472_v53  ;;  %v1870_v3 = vand.u32 65535, %v1866_v31 }
 0x192   : > { %v1871_v47 = vshrl.u32 %v1866_v31, 16  ;;  %v13300_v10 = vand.u32 2147483647, %v13299_v6  ;;  %vm1356_vm7 = vcmp.lt.s32.totalorder %v13299_v6, 0  ;;  %v1618_v13 = vsel %vm7982_vm2, 0, %v7981_v9 }
 0x193   : > { %v1892_v56 = vand.u32 65535, %v1862_v34  ;;  %v11495_v29 = vadd.s32 %v1761_v43, %v1757_v11  ;;  %v1872_v18 = vmul.u32 %v1870_v3, %v1868_v1  ;;  %v11497_v50 = vmul.u32 %v1870_v3, %v1869_v44 }
 0x194   : > { %vm11490_vm6 = vcmp.le.f32.partialorder %v13300_v10, 0.7853982  ;;  %v1873_v62 = vmul.u32 %v1871_v47, %v1868_v1  ;;  %v11501_v25 = vsel %vm1190_vm3, %v1193_v51, %v1196_v38  ;;  %v1331_v52 = vadd.f32 -0.4999988, %v1330_v40 }
 0x195   : > { %v1343_v19 = vadd.s32 3, %v11474_v57  ;;  %v1895_v8 = vmul.u32 %v1893_v2, %v1868_v1  ;;  %v1338_v0 = vadd.f32 -0.16666654, %v1337_v12  ;;  %v1476_v5 = vxor.u32 2147483648, %v1475_v61 }
 0x196   : > { %v1623_v26 = vsub.s32 4294967266, %v1618_v13  ;;  %v1876_v53 = vshll.u32 %v1873_v62, 16  ;;  %v1478_v9 = vsub.s32 4, %v11176_v7  ;;  %v1603_v34 = vadd.s32 %v11205_v24, %v11210_v45 }
 0x197   : > { %v1875_v46 = vmul.u32 %v1871_v47, %v1869_v44  ;;  %v1896_v42 = vmul.u32 %v1892_v56, %v1869_v44  ;;  %v1619_v11 = vsub.s32 32, %v1618_v13  ;;  %v1763_v41 = vadd.s32 536870912, %v11495_v29 }
 0x198   : > { %v1878_v38 = vshll.u32 %v11497_v50, 16  ;;  %vm1880_vm8 = vc.u32 %v1872_v18, %v1876_v53  ;;  %v1332_v31 = vmul.f32 %v1331_v52, %v11358_v32  ;;  %v1894_v51 = vmul.u32 %v1892_v56, %v1868_v1 }
 0x199   : > { %v1881_v63 = vsel %vm1880_vm8, 1, %v13226_v20  ;;  %v1898_v40 = vshll.u32 %v1895_v8, 16  ;;  %v1339_v43 = vmul.f32 %v1338_v0, %v11358_v32  ;;  %v1477_v12 = vsel %vm1356_vm7, %v1476_v5, %v1475_v61  ;;  %v13303_v32 = vld [vmem:[#allocation25_spill] sm:$0xff] }
 0x19a   : > { %v1624_v24 = vadd.s32 127, %v1623_v26  ;;  %v1882_v45 = vadd.s32 %v1876_v53, %v1872_v18  ;;  %v1620_v3 = vshll.u32 %v11368_v55, %v1618_v13  ;;  %v1883_v47 = vadd.s32 %v1881_v63, %v1875_v46 }
 0x19b   : > { %v1897_v10 = vmul.u32 %v1893_v2, %v1869_v44  ;;  %v1900_v57 = vshll.u32 %v1896_v42, 16  ;;  %v1621_v58 = vshrl.u32 %v1603_v34, %v1619_v11  ;;  %v11515_v17 = vshrl.u32 %v1763_v41, 30 }
 0x19c   : > { %v1877_v52 = vshrl.u32 %v1873_v62, 16  ;;  %vm1884_vm14 = vc.u32 %v1882_v45, %v1878_v38  ;;  %vm1902_vm4 = vc.u32 %v1894_v51, %v1898_v40  ;;  %v1904_v56 = vadd.s32 %v1898_v40, %v1894_v51 }
 0x19d   : > { %v1885_v1 = vsel %vm1884_vm14, 1, %v13226_v20  ;;  %v1977_v0 = vand.u32 2139095040, %v13303_v32  ;;  %v11522_v61 = vsel %vm11490_vm6, %v13299_v6, %v1477_v12  ;;  %v1625_v55 = vshll.u32 %v1624_v24, 23 }
 0x19e   : > { %v1887_v13 = vadd.s32 %v1885_v1, %v1883_v47  ;;  %v1903_v44 = vsel %vm1902_vm4, 1, %v13226_v20  ;;  %v1899_v2 = vshrl.u32 %v1895_v8, 16  ;;  %vm1906_vm3 = vc.u32 %v1904_v56, %v1900_v57 }
 0x19f   : > { %v1905_v18 = vadd.s32 %v1903_v44, %v1897_v10  ;;  %v1978_v62 = vshrl.u32 %v1977_v0, 23  ;;  %v1622_v5 = vor.u32 %v1621_v58, %v1620_v3  ;;  %v1765_v26 = vshll.u32 %v11515_v17, 30 }
 0x1a0   : > { %v1879_v53 = vshrl.u32 %v11497_v50, 16  ;;  %v1907_v34 = vsel %vm1906_vm3, 1, %v13226_v20  ;;  %v1888_v46 = vadd.s32 %v1887_v13, %v1877_v52  ;;  %v1901_v11 = vshrl.u32 %v1896_v42, 16 }
 0x1a1   : > { %v1909_v41 = vadd.s32 %v1907_v34, %v1905_v18  ;;  %v7989_v38 = vadd.s32 4294967169, %v1978_v62  ;;  %v11528_v63 = vand.u32 3, %v1343_v19  ;;  %v1479_v8 = vsel %vm1356_vm7, %v1478_v9, %v11176_v7 }
 0x1a2   : > { %v1626_v51 = vor.u32 4788187, %v1625_v55  ;;  %v1835_v58 = vshrl.u32 %v13228_v16, %v11385_v28  ;;  %v1340_v40 = vadd.f32 1.0, %v1339_v43  ;;  %v1856_v50 = vsel %vm1854_vm1, %v11421_v54, 2102212464  ;;  %v13307_v55 = vld [vmem:[#allocation22_spill] sm:$0xff] }
 0x1a3   : > { %v1910_v12 = vadd.s32 %v1909_v41, %v1899_v2  ;;  %v1984_v24 = vadd.s32 1, %v7989_v38  ;;  %v11538_v42 = vadd.f32 1.0, %v1332_v31  ;;  %v11542_v19 = vmul.f32 %v11522_v61, %v11522_v61 }
 0x1a4   : > { %v1629_v45 = vcvt.s32.f32 %v1622_v5  ;;  %v11545_v7 = vsub.s32 %v11495_v29, %v1765_v26  ;;  %v11547_v9 = vadd.s32 %v1888_v46, %v1879_v53  ;;  %v11549_v28 = vadd.s32 %v1904_v56, %v1900_v57 }
 0x1a5   : > { %13304 = vst [vmem:[#allocation21_spill] sm:$0xff] %v11538_v42  ;;  %v1911_v43 = vadd.s32 %v1910_v12, %v1901_v11  ;;  %vm1985_vm2 = vcmp.gt.s32.totalorder %v1984_v24, 0  ;;  %v1627_v3 = vand.u32 2147483647, %v1626_v51  ;;  %v1855_v54 = vsel %vm1851_vm15, %v1835_v58, %v11417_v35 }
 0x1a6   : > { %v1857_v31 = vsel %vm1853_vm9, %v11419_v14, %v1856_v50  ;;  %v1986_v47 = vsel %vm1985_vm2, %v1984_v24, 0  ;;  %v11558_v10 = vmul.f32 %v1340_v40, %v11346_v39  ;;  %v1483_v29 = vmul.f32 -0.001358992, %v11542_v19 }
 0x1a7   : > { %v13155_v57 = vand.u32 2147483647, %v13303_v32  ;;  %v1988_v52 = vand.u32 31, %v1986_v47  ;;  %vm1346_vm1 = vcmp.eq.s32.totalorder %v11528_v63, 0  ;;  %vm1349_vm7 = vcmp.eq.s32.totalorder %v11528_v63, 2 }
 0x1a8   : > { %13305 = vst [vmem:[#allocation25_spill] sm:$0xff] %v11558_v10  ;;  %v1768_v1 = vsub.s32 0, %v11545_v7  ;;  %v1915_v35 = vadd.s32 1, %v1911_v43  ;;  %vm1767_vm15 = vcmp.lt.s32.totalorder %v11545_v7, 0  ;;  %v1858_v14 = vsel %vm1852_vm12, %v1855_v54, %v1857_v31 }
 0x1a9   : > { %vm1914_vm9 = vc.u32 %v11547_v9, %v11549_v28  ;;  %v11570_v39 = vsub.s32 32, %v1988_v52  ;;  %v11574_v56 = vsel %vm11490_vm6, 0, %v1479_v8  ;;  %v1490_v0 = vmul.f32 -0.00019511016, %v11542_v19 }
 0x1aa   : > { %13306 = vst [vmem:[#allocation53_spill] sm:$0xff] %v11574_v56  ;;  %vm1511_vm8 = vcmp.lt.s32.totalorder %v13307_v55, 0  ;;  %v1630_v13 = vmul.f32 %v1629_v45, %v1627_v3  ;;  %vm1345_vm14 = vcmp.lt.s32.totalorder %v11528_v63, 2  ;;  %v13154_v44 = vxor.u32 2147483648, %v11558_v10 }
 0x1ab   : > { %v13153_v22 = vxor.u32 2147483648, %v11538_v42  ;;  %v1484_v2 = vadd.f32 0.041655596, %v1483_v29  ;;  %v1981_v18 = vand.u32 8388607, %v13155_v57  ;;  %v1769_v5 = vsel %vm1767_vm15, %v1768_v1, %v11545_v7 }
 0x1ac   : > { %v13308_v62 = vand.u32 2147483647, %v13307_v55  ;;  %v1912_v26 = vmul.u32 %v11453_v21, %v1858_v14  ;;  %v1916_v53 = vsel %vm1914_vm9, %v1915_v35, %v1911_v43  ;;  %v1994_v34 = vshll.u32 %v13230_v30, %v1988_v52 }
 0x1ad   : > { %v1995_v46 = vshrl.u32 %v13270_v23, %v11570_v39  ;;  %v1997_v11 = vshll.u32 %v13270_v23, %v1988_v52  ;;  %v1998_v41 = vshrl.u32 %v13229_v48, %v11570_v39  ;;  %v2000_v38 = vshll.u32 %v13229_v48, %v1988_v52 }
 0x1ae   : > { %vm11585_vm12 = vcmp.le.f32.partialorder %v13308_v62, 0.7853982  ;;  %v1491_v8 = vadd.f32 0.008332121, %v1490_v0  ;;  %v1631_v51 = vxor.u32 2147483648, %v1630_v13  ;;  %v11598_v58 = vshrl.u32 %v1986_v47, 5 }
 0x1af   : > { %v2001_v21 = vshrl.u32 %v13271_v15, %v11570_v39  ;;  %vm13187_vm6 = vweird.f32 %v13275_v59  ;;  %vm13163_vm4 = vweird.f32 %v13285_v33  ;;  %v1770_v40 = vclz %v1769_v5 }
 0x1b0   : > { %v1982_v50 = vor.u32 8388608, %v1981_v18  ;;  %v2003_v12 = vshll.u32 %v13271_v15, %v1988_v52  ;;  %v2004_v24 = vshrl.u32 %v13233_v49, %v11570_v39  ;;  %v1351_v45 = vsel %vm1349_vm7, %v13153_v22, %v11558_v10 }
 0x1b1   : > { %v11612_v43 = vadd.s32 %v1916_v53, %v1912_v26  ;;  %v1991_v3 = vshll.u32 %v13228_v16, %v1988_v52  ;;  %v1992_v54 = vshrl.u32 %v13230_v30, %v11570_v39  ;;  %v11617_v31 = vor.u32 %v1995_v46, %v1994_v34  ;;  %v13311_v53 = vld [vmem:[#allocation26_spill] sm:$0xff] }
 0x1b2   : > { %v11619_v47 = vor.u32 %v1998_v41, %v1997_v11  ;;  %v2002_v29 = vor.u32 %v2001_v21, %v2000_v38  ;;  %v2005_v1 = vor.u32 %v2004_v24, %v2003_v12  ;;  %v1348_v35 = vsel %vm1346_vm1, %v11538_v42, %v13154_v44 }
 0x1b3   : > { %v1485_v14 = vmul.f32 %v1484_v2, %v11542_v19  ;;  %v1492_v0 = vmul.f32 %v1491_v8, %v11542_v19  ;;  %vm2006_vm3 = vcmp.lt.s32.totalorder %v11598_v58, 1  ;;  %v1632_v52 = vsel %vm1511_vm8, %v1631_v51, %v1630_v13 }
 0x1b4   : > { %v7984_v18 = vadd.s32 4294967294, %v1770_v40  ;;  %vm2009_vm2 = vcmp.lt.s32.totalorder %v11598_v58, 4  ;;  %v11632_v62 = vshll.u32 %v1982_v50, 8  ;;  %v1918_v5 = vadd.s32 536870912, %v11612_v43 }
 0x1b5   : > { %v11635_v26 = vor.u32 %v1992_v54, %v1991_v3  ;;  %vm2008_vm1 = vcmp.lt.s32.totalorder %v11598_v58, 3  ;;  %v2132_v2 = vand.u32 2139095040, %v13311_v53  ;;  %vm2007_vm7 = vcmp.lt.s32.totalorder %v11598_v58, 2 }
 0x1b6   : > { %v2015_v34 = vsel %vm2009_vm2, %v2002_v29, 920167782  ;;  %v2018_v13 = vsel %vm2006_vm3, %v11617_v31, %v11619_v47  ;;  %v2019_v46 = vsel %vm2009_vm2, %v2005_v1, 1326507024  ;;  %v1352_v11 = vsel %vm1345_vm14, %v1348_v35, %v1351_v45 }
 0x1b7   : > { %v1486_v41 = vadd.f32 -0.4999988, %v1485_v14  ;;  %v1493_v38 = vadd.f32 -0.16666654, %v1492_v0  ;;  %v1498_v8 = vadd.s32 3, %v11574_v56  ;;  %v11654_v51 = vsel %vm11585_vm12, %v13307_v55, %v1632_v52 }
 0x1b8   : > { %vm7985_vm15 = vcmp.lt.s32.totalorder %v7984_v18, 0  ;;  %v2020_v21 = vsel %vm2008_vm1, %v2002_v29, %v2019_v46  ;;  %v2023_v40 = vand.u32 65535, %v11632_v62  ;;  %v2014_v63 = vsel %vm2006_vm3, %v11635_v26, %v11617_v31 }
 0x1b9   : > { %v2016_v50 = vsel %vm2008_vm1, %v11619_v47, %v2015_v34  ;;  %v2021_v12 = vsel %vm2007_vm7, %v2018_v13, %v2020_v21  ;;  %v2024_v24 = vshrl.u32 %v11632_v62, 16  ;;  %v11669_v45 = vshrl.u32 %v1918_v5, 30 }
 0x1ba   : > { %v2025_v3 = vand.u32 65535, %v2021_v12  ;;  %v2026_v54 = vshrl.u32 %v2021_v12, 16  ;;  %v2133_v29 = vshrl.u32 %v2132_v2, 23  ;;  %v11674_v1 = vsel %vm13187_vm6, nan, %v11501_v25 }
 0x1bb   : > { %13312 = vst [vmem:[#allocation22_spill] sm:$0xff] %v11674_v1  ;;  %v11678_v35 = vsel %vm13163_vm4, nan, %v1352_v11  ;;  %v1487_v14 = vmul.f32 %v1486_v41, %v11542_v19  ;;  %v1633_v0 = vsub.s32 4, %v11325_v60  ;;  %v11682_v52 = vand.u32 3, %v1498_v8 }
 0x1bc   : > { %13313 = vst [vmem:[#allocation26_spill] sm:$0xff] %v11678_v35  ;;  %v11685_v5 = vsel %vm7985_vm15, 0, %v7984_v18  ;;  %v2017_v2 = vsel %vm2007_vm7, %v2014_v63, %v2016_v50  ;;  %v2028_v34 = vmul.u32 %v2026_v54, %v2023_v40  ;;  %v11691_v25 = vmul.f32 %v11654_v51, %v11654_v51 }
 0x1bd   : > { %v1758_v13 = vadd.s32 %v11437_v36, %v11432_v37  ;;  %v1774_v46 = vsub.s32 32, %v11685_v5  ;;  %v2029_v11 = vmul.u32 %v2025_v3, %v2024_v24  ;;  %v11697_v41 = vmul.f32 %v1493_v38, %v11542_v19 }
 0x1be   : > { %v1920_v18 = vshll.u32 %v11669_v45, 30  ;;  %v2027_v8 = vmul.u32 %v2025_v3, %v2023_v40  ;;  %v7992_v21 = vadd.s32 4294967169, %v2133_v29  ;;  %v11700_v12 = vadd.f32 1.0, %v1487_v14 }
 0x1bf   : > { %v11705_v63 = vsel %vm1511_vm8, %v1633_v0, %v11325_v60  ;;  %v2047_v50 = vand.u32 65535, %v2017_v2  ;;  %v2048_v22 = vshrl.u32 %v2017_v2, 16  ;;  %v11708_v37 = vmul.f32 -0.001358992, %v11691_v25 }
 0x1c0   : > { %13314 = vst [vmem:[#allocation54_spill] sm:$0xff] %v11700_v12  ;;  %v1778_v36 = vsub.s32 4294967266, %v11685_v5  ;;  %v2030_v19 = vmul.u32 %v2026_v54, %v2024_v24  ;;  %v2031_v38 = vshll.u32 %v2028_v34, 16  ;;  %v1645_v44 = vmul.f32 -0.00019511016, %v11691_v25 }
 0x1c1   : > { %v1775_v3 = vshll.u32 %v11545_v7, %v11685_v5  ;;  %v1776_v29 = vshrl.u32 %v1758_v13, %v1774_v46  ;;  %v2033_v14 = vshll.u32 %v2029_v11, 16  ;;  %v11715_v57 = vsub.s32 %v11612_v43, %v1920_v18 }
 0x1c2   : > { %vm2035_vm9 = vc.u32 %v2027_v8, %v2031_v38  ;;  %v2037_v60 = vadd.s32 %v2031_v38, %v2027_v8  ;;  %v2139_v0 = vadd.s32 1, %v7992_v21  ;;  %v2049_v33 = vmul.u32 %v2047_v50, %v2023_v40 }
 0x1c3   : > { %v2036_v2 = vsel %vm2035_vm9, 1, %v13226_v20  ;;  %v2050_v59 = vmul.u32 %v2048_v22, %v2023_v40  ;;  %v2051_v42 = vmul.u32 %v2047_v50, %v2024_v24  ;;  %v1779_v54 = vadd.s32 127, %v1778_v36 }
 0x1c4   : > { %v2032_v10 = vshrl.u32 %v2028_v34, 16  ;;  %v2038_v56 = vadd.s32 %v2036_v2, %v2030_v19  ;;  %vm2039_vm8 = vc.u32 %v2037_v60, %v2033_v14  ;;  %v2052_v7 = vmul.u32 %v2048_v22, %v2024_v24 }
 0x1c5   : > { %v2040_v35 = vsel %vm2039_vm8, 1, %v13226_v20  ;;  %v2053_v5 = vshll.u32 %v2050_v59, 16  ;;  %v2055_v13 = vshll.u32 %v2051_v42, 16  ;;  %v1923_v43 = vsub.s32 0, %v11715_v57 }
 0x1c6   : > { %v1990_v46 = vshrl.u32 %v13228_v16, %v11570_v39  ;;  %v2042_v18 = vadd.s32 %v2040_v35, %v2038_v56  ;;  %v13165_v8 = vand.u32 2147483647, %v13311_v53  ;;  %vm1922_vm14 = vcmp.lt.s32.totalorder %v11715_v57, 0 }
 0x1c7   : > { %vm2057_vm15 = vc.u32 %v2049_v33, %v2053_v5  ;;  %v2059_v40 = vadd.s32 %v2053_v5, %v2049_v33  ;;  %vm2140_vm9 = vcmp.gt.s32.totalorder %v2139_v0, 0  ;;  %v2034_v34 = vshrl.u32 %v2029_v11, 16 }
 0x1c8   : > { %v2043_v21 = vadd.s32 %v2042_v18, %v2032_v10  ;;  %v2058_v50 = vsel %vm2057_vm15, 1, %v13226_v20  ;;  %v2141_v22 = vsel %vm2140_vm9, %v2139_v0, 0  ;;  %v2011_v24 = vsel %vm2009_vm2, %v11619_v47, 2102212464 }
 0x1c9   : > { %v2054_v36 = vshrl.u32 %v2050_v59, 16  ;;  %v2060_v19 = vadd.s32 %v2058_v50, %v2052_v7  ;;  %vm2061_vm8 = vc.u32 %v2059_v40, %v2055_v13  ;;  %v1646_v39 = vadd.f32 0.008332121, %v1645_v44 }
 0x1ca   : > { %v1924_v56 = vsel %vm1922_vm14, %v1923_v43, %v11715_v57  ;;  %v2062_v35 = vsel %vm2061_vm8, 1, %v13226_v20  ;;  %v2143_v38 = vand.u32 31, %v2141_v22  ;;  %v1780_v33 = vshll.u32 %v1779_v54, 23 }
 0x1cb   : > { %v2010_v10 = vsel %vm2006_vm3, %v1990_v46, %v11635_v26  ;;  %v2056_v11 = vshrl.u32 %v2051_v42, 16  ;;  %v2064_v14 = vadd.s32 %v2062_v35, %v2060_v19  ;;  %v2012_v47 = vsel %vm2008_vm1, %v11617_v31, %v2011_v24 }
 0x1cc   : > { %v11736_v59 = vadd.s32 %v2043_v21, %v2034_v34  ;;  %v11738_v60 = vadd.s32 %v2059_v40, %v2055_v13  ;;  %v11740_v44 = vsub.s32 32, %v2143_v38  ;;  %v1777_v0 = vor.u32 %v1776_v29, %v1775_v3 }
 0x1cd   : > { %v1925_v2 = vclz %v1924_v56  ;;  %v2065_v7 = vadd.s32 %v2064_v14, %v2054_v36  ;;  %v2136_v54 = vand.u32 8388607, %v13165_v8  ;;  %v2146_v26 = vshll.u32 %v13228_v16, %v2143_v38 }
 0x1ce   : > { %v2147_v42 = vshrl.u32 %v13230_v30, %v11740_v44  ;;  %v2149_v5 = vshll.u32 %v13230_v30, %v2143_v38  ;;  %v2150_v31 = vshrl.u32 %v13270_v23, %v11740_v44  ;;  %v2013_v13 = vsel %vm2007_vm7, %v2010_v10, %v2012_v47 }
 0x1cf   : > { %v2066_v43 = vadd.s32 %v2065_v7, %v2056_v11  ;;  %v11752_v3 = vshrl.u32 %v2141_v22, 5  ;;  %v2155_v29 = vshll.u32 %v13229_v48, %v2143_v38  ;;  %v1781_v46 = vor.u32 4788187, %v1780_v33 }
 0x1d0   : > { %vm2069_vm3 = vc.u32 %v11736_v59, %v11738_v60  ;;  %v2152_v18 = vshll.u32 %v13270_v23, %v2143_v38  ;;  %v2153_v40 = vshrl.u32 %v13229_v48, %v11740_v44  ;;  %vm1504_vm2 = vcmp.eq.s32.totalorder %v11682_v52, 2 }
 0x1d1   : > { %v2070_v34 = vadd.s32 1, %v2066_v43  ;;  %v2137_v21 = vor.u32 8388608, %v2136_v54  ;;  %v2156_v58 = vshrl.u32 %v13271_v15, %v11740_v44  ;;  %v2158_v50 = vshll.u32 %v13271_v15, %v2143_v38 }
 0x1d2   : > { %v2067_v22 = vmul.u32 %v11632_v62, %v2013_v13  ;;  %v11765_v24 = vor.u32 %v2147_v42, %v2146_v26  ;;  %v11767_v36 = vor.u32 %v2150_v31, %v2149_v5  ;;  %v2159_v19 = vshrl.u32 %v13233_v49, %v11740_v44 }
 0x1d3   : > { %v7987_v56 = vadd.s32 4294967294, %v1925_v2  ;;  %v2071_v35 = vsel %vm2069_vm3, %v2070_v34, %v2066_v43  ;;  %v2157_v33 = vor.u32 %v2156_v58, %v2155_v29  ;;  %vm2161_vm1 = vcmp.lt.s32.totalorder %v11752_v3, 1 }
 0x1d4   : > { %v1495_v10 = vadd.f32 1.0, %v11697_v41  ;;  %v1639_v11 = vadd.f32 0.041655596, %v11708_v37  ;;  %v11774_v14 = vor.u32 %v2153_v40, %v2152_v18  ;;  %vm2164_vm7 = vcmp.lt.s32.totalorder %v11752_v3, 4 }
 0x1d5   : > { %vm1501_vm14 = vcmp.eq.s32.totalorder %v11682_v52, 0  ;;  %v1647_v62 = vmul.f32 %v1646_v39, %v11691_v25  ;;  %v1784_v38 = vcvt.s32.f32 %v1777_v0  ;;  %v2160_v47 = vor.u32 %v2159_v19, %v2158_v50 }
 0x1d6   : > { %vm2163_vm15 = vcmp.lt.s32.totalorder %v11752_v3, 3  ;;  %v1782_v2 = vand.u32 2147483647, %v1781_v46  ;;  %v11780_v7 = vadd.s32 %v2071_v35, %v2067_v22  ;;  %vm2162_vm9 = vcmp.lt.s32.totalorder %v11752_v3, 2 }
 0x1d7   : > { %v2169_v41 = vsel %vm2161_vm1, %v11765_v24, %v11767_v36  ;;  %vm1666_vm8 = vcmp.lt.s32.totalorder %v13279_v27, 0  ;;  %vm7988_vm3 = vcmp.lt.s32.totalorder %v7987_v56, 0  ;;  %v2170_v37 = vsel %vm2164_vm7, %v2157_v33, 920167782 }
 0x1d8   : > { %v2174_v39 = vsel %vm2164_vm7, %v2160_v47, 1326507024  ;;  %v11792_v0 = vshll.u32 %v2137_v21, 8  ;;  %v11795_v54 = vmul.f32 %v1495_v10, %v11522_v61  ;;  %v13164_v26 = vxor.u32 2147483648, %v11700_v12 }
 0x1d9   : > { %v2171_v42 = vsel %vm2163_vm15, %v11774_v14, %v2170_v37  ;;  %v2173_v5 = vsel %vm2161_vm1, %v11767_v36, %v11774_v14  ;;  %v11808_v31 = vsel %vm11585_vm12, 0, %v11705_v63  ;;  %v1640_v13 = vmul.f32 %v1639_v11, %v11691_v25 }
 0x1da   : > { %13315 = vst [vmem:[#allocation55_spill] sm:$0xff] %v11795_v54  ;;  %v2172_v61 = vsel %vm2162_vm9, %v2169_v41, %v2171_v42  ;;  %v2175_v43 = vsel %vm2163_vm15, %v2157_v33, %v2174_v39  ;;  %v1648_v29 = vadd.f32 -0.16666654, %v1647_v62  ;;  %v1785_v46 = vmul.f32 %v1784_v38, %v1782_v2 }
 0x1db   : > { %13316 = vst [vmem:[#allocation56_spill] sm:$0xff] %v11808_v31  ;;  %v1928_v18 = vsel %vm7988_vm3, 0, %v7987_v56  ;;  %v2073_v40 = vadd.s32 536870912, %v11780_v7  ;;  %v13317_v34 = vand.u32 2147483647, %v13279_v27  ;;  %v2176_v4 = vsel %vm2162_vm9, %v2173_v5, %v2175_v43 }
 0x1dc   : > { %v2178_v63 = vand.u32 65535, %v11792_v0  ;;  %v2179_v58 = vshrl.u32 %v11792_v0, 16  ;;  %v13166_v50 = vxor.u32 2147483648, %v11795_v54  ;;  %v11832_v22 = vsel %vm1504_vm2, %v13164_v26, %v11795_v54 }
 0x1dd   : > { %vm11818_vm4 = vcmp.le.f32.partialorder %v13317_v34, 0.7853982  ;;  %v1653_v19 = vadd.s32 3, %v11808_v31  ;;  %v2203_v56 = vshrl.u32 %v2172_v61, 16  ;;  %v1641_v35 = vadd.f32 -0.4999988, %v1640_v13 }
 0x1de   : > { %v1933_v33 = vsub.s32 4294967266, %v1928_v18  ;;  %v2180_v10 = vand.u32 65535, %v2176_v4  ;;  %v2181_v11 = vshrl.u32 %v2176_v4, 16  ;;  %v1649_v62 = vmul.f32 %v1648_v29, %v11691_v25 }
 0x1df   : > { %v1786_v38 = vxor.u32 2147483648, %v1785_v46  ;;  %v1913_v47 = vadd.s32 %v11549_v28, %v11547_v9  ;;  %v11838_v2 = vshrl.u32 %v2073_v40, 30  ;;  %v1929_v41 = vsub.s32 32, %v1928_v18 }
 0x1e0   : > { %v2182_v37 = vmul.u32 %v2180_v10, %v2178_v63  ;;  %v2183_v39 = vmul.u32 %v2181_v11, %v2178_v63  ;;  %v11840_v42 = vmul.u32 %v2180_v10, %v2179_v58  ;;  %v11847_v5 = vsel %vm1501_vm14, %v11700_v12, %v13166_v50 }
 0x1e1   : > { %v11849_v13 = vand.u32 3, %v1653_v19  ;;  %v2202_v43 = vand.u32 65535, %v2172_v61  ;;  %v11851_v29 = vmul.u32 %v2203_v56, %v2178_v63  ;;  %v1642_v9 = vmul.f32 %v1641_v35, %v11691_v25 }
 0x1e2   : > { %v1934_v28 = vadd.s32 127, %v1933_v33  ;;  %v2185_v40 = vmul.u32 %v2181_v11, %v2179_v58  ;;  %v2186_v34 = vshll.u32 %v2183_v39, 16  ;;  %v1650_v4 = vadd.f32 1.0, %v1649_v62 }
 0x1e3   : > { %v1787_v10 = vsel %vm1666_vm8, %v1786_v38, %v1785_v46  ;;  %v2075_v26 = vshll.u32 %v11838_v2, 30  ;;  %v2188_v8 = vshll.u32 %v11840_v42, 16  ;;  %v1930_v50 = vshll.u32 %v11715_v57, %v1928_v18 }
 0x1e4   : > { %v1931_v19 = vshrl.u32 %v1913_v47, %v1929_v41  ;;  %vm2190_vm12 = vc.u32 %v2182_v37, %v2186_v34  ;;  %v2192_v61 = vadd.s32 %v2186_v34, %v2182_v37  ;;  %v2204_v54 = vmul.u32 %v2202_v43, %v2178_v63 }
 0x1e5   : > { %v2191_v12 = vsel %vm2190_vm12, 1, %v13226_v20  ;;  %v2206_v25 = vmul.u32 %v2202_v43, %v2179_v58  ;;  %v2208_v35 = vshll.u32 %v11851_v29, 16  ;;  %v11864_v33 = vsel %vm11818_vm4, %v13279_v27, %v1787_v10 }
 0x1e6   : > { %v1935_v46 = vshll.u32 %v1934_v28, 23  ;;  %v2193_v11 = vadd.s32 %v2191_v12, %v2185_v40  ;;  %vm2194_vm2 = vc.u32 %v2192_v61, %v2188_v8  ;;  %v1788_v62 = vsub.s32 4, %v11515_v17 }
 0x1e7   : > { %v11868_v57 = vsub.s32 %v11780_v7, %v2075_v26  ;;  %v2195_v18 = vsel %vm2194_vm2, 1, %v13226_v20  ;;  %v2207_v38 = vmul.u32 %v2203_v56, %v2179_v58  ;;  %v11871_v63 = vadd.f32 1.0, %v1642_v9  ;;  %v13322_v9 = vld [vmem:[#allocation27_spill] sm:$0xff] }
 0x1e8   : > { %v11874_v47 = vmul.f32 %v1650_v4, %v11654_v51  ;;  %v2187_v41 = vshrl.u32 %v2183_v39, 16  ;;  %v2197_v37 = vadd.s32 %v2195_v18, %v2193_v11  ;;  %v11878_v43 = vmul.f32 %v11864_v33, %v11864_v33 }
 0x1e9   : > { %13320 = vst [vmem:[#allocation57_spill] sm:$0xff] %v11871_v63  ;;  %v1932_v12 = vor.u32 %v1931_v19, %v1930_v50  ;;  %v2210_v8 = vshll.u32 %v2206_v25, 16  ;;  %vm2212_vm14 = vc.u32 %v2204_v54, %v2208_v35  ;;  %v1936_v28 = vor.u32 4788187, %v1935_v46 }
 0x1ea   : > { %13321 = vst [vmem:[#allocation58_spill] sm:$0xff] %v11874_v47  ;;  %v2145_v7 = vshrl.u32 %v13228_v16, %v11740_v44  ;;  %v2166_v26 = vsel %vm2164_vm7, %v11774_v14, 2102212464  ;;  %v2213_v51 = vsel %vm2212_vm14, 1, %v13226_v20  ;;  %vm1656_vm3 = vcmp.eq.s32.totalorder %v11849_v13, 0 }
 0x1eb   : > { %v2078_v58 = vsub.s32 0, %v11868_v57  ;;  %v2214_v56 = vadd.s32 %v2208_v35, %v2204_v54  ;;  %v2215_v39 = vadd.s32 %v2213_v51, %v2207_v38  ;;  %v2287_v50 = vand.u32 2139095040, %v13322_v9 }
 0x1ec   : > { %vm1500_vm12 = vcmp.lt.s32.totalorder %v11682_v52, 2  ;;  %v1793_v40 = vmul.f32 -0.001358992, %v11878_v43  ;;  %vm2077_vm2 = vcmp.lt.s32.totalorder %v11868_v57, 0  ;;  %v2189_v44 = vshrl.u32 %v11840_v42, 16 }
 0x1ed   : > { %v2198_v34 = vadd.s32 %v2197_v37, %v2187_v41  ;;  %v1939_v14 = vcvt.s32.f32 %v1932_v12  ;;  %v2209_v4 = vshrl.u32 %v11851_v29, 16  ;;  %vm2216_vm7 = vc.u32 %v2214_v56, %v2210_v8 }
 0x1ee   : > { %v2288_v10 = vshrl.u32 %v2287_v50, 23  ;;  %vm1655_vm14 = vcmp.lt.s32.totalorder %v11849_v13, 2  ;;  %v1937_v54 = vand.u32 2147483647, %v1936_v28  ;;  %v2165_v19 = vsel %vm2161_vm1, %v2145_v7, %v11765_v24 }
 0x1ef   : > { %v2167_v61 = vsel %vm2163_vm15, %v11767_v36, %v2166_v26  ;;  %v2217_v35 = vsel %vm2216_vm7, 1, %v13226_v20  ;;  %v2079_v42 = vsel %vm2077_vm2, %v2078_v58, %v11868_v57  ;;  %v2211_v46 = vshrl.u32 %v2206_v25, 16 }
 0x1f0   : > { %v2219_v11 = vadd.s32 %v2217_v35, %v2215_v39  ;;  %v7995_v29 = vadd.s32 4294967169, %v2288_v10  ;;  %v1789_v18 = vsel %vm1666_vm8, %v1788_v62, %v11515_v17  ;;  %v1800_v38 = vmul.f32 -0.00019511016, %v11878_v43 }
 0x1f1   : > { %v11907_v41 = vadd.s32 %v2198_v34, %v2189_v44  ;;  %v11909_v24 = vadd.s32 %v2214_v56, %v2210_v8  ;;  %v1794_v37 = vadd.f32 0.041655596, %v1793_v40  ;;  %v2168_v36 = vsel %vm2162_vm9, %v2165_v19, %v2167_v61 }
 0x1f2   : > { %v2220_v12 = vadd.s32 %v2219_v11, %v2209_v4  ;;  %v2294_v28 = vadd.s32 1, %v7995_v29  ;;  %v13172_v25 = vxor.u32 2147483648, %v11874_v47  ;;  %v13171_v7 = vxor.u32 2147483648, %v11871_v63  ;;  %v13324_v4 = vld [vmem:[#allocation24_spill] sm:$0xff] }
 0x1f3   : > { %v1940_v26 = vmul.f32 %v1939_v14, %v1937_v54  ;;  %v2080_v51 = vclz %v2079_v42  ;;  %vm1659_vm1 = vcmp.eq.s32.totalorder %v11849_v13, 2  ;;  %v11918_v17 = vsel %vm11818_vm4, 0, %v1789_v18 }
 0x1f4   : > { %13323 = vst [vmem:[#allocation27_spill] sm:$0xff] %v11918_v17  ;;  %v2221_v62 = vadd.s32 %v2220_v12, %v2211_v46  ;;  %vm2295_vm15 = vcmp.gt.s32.totalorder %v2294_v28, 0  ;;  %v1801_v8 = vadd.f32 0.008332121, %v1800_v38  ;;  %v2222_v3 = vmul.u32 %v11792_v0, %v2168_v36 }
 0x1f5   : > { %vm2224_vm9 = vc.u32 %v11907_v41, %v11909_v24  ;;  %v2296_v58 = vsel %vm2295_vm15, %v2294_v28, 0  ;;  %v1795_v56 = vmul.f32 %v1794_v37, %v11878_v43  ;;  %v13173_v50 = vand.u32 2147483647, %v13322_v9 }
 0x1f6   : > { %v2225_v39 = vadd.s32 1, %v2221_v62  ;;  %v2298_v40 = vand.u32 31, %v2296_v58  ;;  %v1658_v21 = vsel %vm1656_vm3, %v11871_v63, %v13172_v25  ;;  %v1661_v0 = vsel %vm1659_vm1, %v13171_v7, %v11874_v47 }
 0x1f7   : > { %v1941_v44 = vxor.u32 2147483648, %v1940_v26  ;;  %v7990_v34 = vadd.s32 4294967294, %v2080_v51  ;;  %v11937_v14 = vsel %vm1500_vm12, %v11847_v5, %v11832_v22  ;;  %vm1821_vm4 = vcmp.lt.s32.totalorder %v13324_v4, 0 }
 0x1f8   : > { %v2226_v10 = vsel %vm2224_vm9, %v2225_v39, %v2221_v62  ;;  %v11940_v54 = vsub.s32 32, %v2298_v40  ;;  %v1802_v19 = vmul.f32 %v1801_v8, %v11878_v43  ;;  %v11944_v61 = vadd.s32 3, %v11918_v17 }
 0x1f9   : > { %v13325_v35 = vand.u32 2147483647, %v13324_v4  ;;  %v2227_v46 = vadd.s32 %v2226_v10, %v2222_v3  ;;  %v11954_v52 = vsel %vm1655_vm14, %v1658_v21, %v1661_v0  ;;  %v1796_v22 = vadd.f32 -0.4999988, %v1795_v56 }
 0x1fa   : > { %v1943_v5 = vsub.s32 4, %v11669_v45  ;;  %v2291_v11 = vand.u32 8388607, %v13173_v50  ;;  %v1942_v29 = vsel %vm1821_vm4, %v1941_v44, %v1940_v26  ;;  %vm7991_vm3 = vcmp.lt.s32.totalorder %v7990_v34, 0  ;;  %v13328_v44 = vld [vmem:[#allocation28_spill] sm:$0xff] }
 0x1fb   : > { %vm11948_vm8 = vcmp.le.f32.partialorder %v13325_v35, 0.7853982  ;;  %v2228_v18 = vadd.s32 536870912, %v2227_v46  ;;  %v2304_v38 = vshll.u32 %v13230_v30, %v2298_v40  ;;  %v2305_v37 = vshrl.u32 %v13270_v23, %v11940_v54 }
 0x1fc   : > { %v2307_v13 = vshll.u32 %v13270_v23, %v2298_v40  ;;  %v2308_v36 = vshrl.u32 %v13229_v48, %v11940_v54  ;;  %v2310_v12 = vshll.u32 %v13229_v48, %v2298_v40  ;;  %v1803_v28 = vadd.f32 -0.16666654, %v1802_v19 }
 0x1fd   : > { %v11968_v51 = vshrl.u32 %v2228_v18, 30  ;;  %v11970_v62 = vshrl.u32 %v2296_v58, 5  ;;  %v2311_v26 = vshrl.u32 %v13271_v15, %v11940_v54  ;;  %v11977_v8 = vsel %vm11948_vm8, %v13324_v4, %v1942_v29 }
 0x1fe   : > { %v2292_v3 = vor.u32 8388608, %v2291_v11  ;;  %v2313_v56 = vshll.u32 %v13271_v15, %v2298_v40  ;;  %v2314_v39 = vshrl.u32 %v13233_v49, %v11940_v54  ;;  %v2083_v21 = vsel %vm7991_vm3, 0, %v7990_v34 }
 0x1ff   : > { %v2301_v0 = vshll.u32 %v13228_v16, %v2298_v40  ;;  %v2302_v58 = vshrl.u32 %v13230_v30, %v11940_v54  ;;  %v2442_v10 = vand.u32 2139095040, %v13328_v44  ;;  %v11986_v19 = vor.u32 %v2305_v37, %v2304_v38 }
 0x200   : > { %v11988_v35 = vor.u32 %v2308_v36, %v2307_v13  ;;  %v2312_v29 = vor.u32 %v2311_v26, %v2310_v12  ;;  %v2315_v18 = vor.u32 %v2314_v39, %v2313_v56  ;;  %v1797_v11 = vmul.f32 %v1796_v22, %v11878_v43 }
 0x201   : > { %v1944_v7 = vsel %vm1821_vm4, %v1943_v5, %v11669_v45  ;;  %v2230_v34 = vshll.u32 %v11968_v51, 30  ;;  %vm2316_vm12 = vcmp.lt.s32.totalorder %v11970_v62, 1  ;;  %v1804_v40 = vmul.f32 %v1803_v28, %v11878_v43 }
 0x202   : > { %v2088_v25 = vsub.s32 4294967266, %v2083_v21  ;;  %vm2319_vm2 = vcmp.lt.s32.totalorder %v11970_v62, 4  ;;  %v11998_v38 = vshll.u32 %v2292_v3, 8  ;;  %v12002_v37 = vmul.f32 %v11977_v8, %v11977_v8 }
 0x203   : > { %v12004_v22 = vor.u32 %v2302_v58, %v2301_v0  ;;  %vm2318_vm7 = vcmp.lt.s32.totalorder %v11970_v62, 3  ;;  %v2443_v45 = vshrl.u32 %v2442_v10, 23  ;;  %vm2317_vm14 = vcmp.lt.s32.totalorder %v11970_v62, 2 }
 0x204   : > { %v2325_v5 = vsel %vm2319_vm2, %v2312_v29, 920167782  ;;  %v2328_v43 = vsel %vm2316_vm12, %v11986_v19, %v11988_v35  ;;  %v2329_v13 = vsel %vm2319_vm2, %v2315_v18, 1326507024  ;;  %v1948_v36 = vmul.f32 -0.001358992, %v12002_v37 }
 0x205   : > { %v2068_v12 = vadd.s32 %v11738_v60, %v11736_v59  ;;  %v2084_v28 = vsub.s32 32, %v2083_v21  ;;  %v12019_v26 = vsub.s32 %v2227_v46, %v2230_v34  ;;  %v2089_v3 = vadd.s32 127, %v2088_v25 }
 0x206   : > { %v2330_v56 = vsel %vm2318_vm7, %v2312_v29, %v2329_v13  ;;  %v2333_v39 = vand.u32 65535, %v11998_v38  ;;  %v2334_v0 = vshrl.u32 %v11998_v38, 16  ;;  %v2324_v58 = vsel %vm2316_vm12, %v12004_v22, %v11986_v19 }
 0x207   : > { %v2326_v59 = vsel %vm2318_vm7, %v11988_v35, %v2325_v5  ;;  %v2331_v60 = vsel %vm2317_vm14, %v2328_v43, %v2330_v56  ;;  %v7998_v25 = vadd.s32 4294967169, %v2443_v45  ;;  %v12034_v46 = vadd.f32 1.0, %v1797_v11 }
 0x208   : > { %v1805_v10 = vadd.f32 1.0, %v1804_v40  ;;  %v2335_v29 = vand.u32 65535, %v2331_v60  ;;  %v2336_v18 = vshrl.u32 %v2331_v60, 16  ;;  %v1949_v34 = vadd.f32 0.041655596, %v1948_v36 }
 0x209   : > { %13329 = vst [vmem:[#allocation28_spill] sm:$0xff] %v12034_v46  ;;  %v1955_v13 = vmul.f32 -0.00019511016, %v12002_v37  ;;  %v2085_v50 = vshll.u32 %v11868_v57, %v2083_v21  ;;  %v2233_v63 = vsub.s32 0, %v12019_v26  ;;  %v2086_v47 = vshrl.u32 %v2068_v12, %v2084_v28 }
 0x20a   : > { %vm2232_vm1 = vcmp.lt.s32.totalorder %v12019_v26, 0  ;;  %v2327_v5 = vsel %vm2317_vm14, %v2324_v58, %v2326_v59  ;;  %v2338_v43 = vmul.u32 %v2336_v18, %v2333_v39  ;;  %v12043_v11 = vand.u32 3, %v11944_v61 }
 0x20b   : > { %v2090_v40 = vshll.u32 %v2089_v3, 23  ;;  %v2339_v45 = vmul.u32 %v2335_v29, %v2334_v0  ;;  %v2449_v56 = vadd.s32 1, %v7998_v25  ;;  %v12046_v36 = vmul.f32 %v1805_v10, %v11864_v33 }
 0x20c   : > { %v12051_v21 = vsel %vm11948_vm8, 0, %v1944_v7  ;;  %v2337_v12 = vmul.u32 %v2335_v29, %v2333_v39  ;;  %v1956_v28 = vadd.f32 0.008332121, %v1955_v13  ;;  %v2234_v58 = vsel %vm2232_vm1, %v2233_v63, %v12019_v26 }
 0x20d   : > { %13330 = vst [vmem:[#allocation59_spill] sm:$0xff] %v12046_v36  ;;  %v2357_v59 = vand.u32 65535, %v2327_v5  ;;  %v2358_v60 = vshrl.u32 %v2327_v5, 16  ;;  %v12055_v61 = vmul.f32 %v1949_v34, %v12002_v37  ;;  %v2087_v3 = vor.u32 %v2086_v47, %v2085_v50 }
 0x20e   : > { %13331 = vst [vmem:[#allocation60_spill] sm:$0xff] %v12051_v21  ;;  %v2340_v25 = vmul.u32 %v2336_v18, %v2334_v0  ;;  %v2341_v17 = vshll.u32 %v2338_v43, 16  ;;  %v2091_v33 = vor.u32 4788187, %v2090_v40  ;;  %v2343_v10 = vshll.u32 %v2339_v45, 16 }
 0x20f   : > { %vm2450_vm15 = vcmp.gt.s32.totalorder %v2449_v56, 0  ;;  %v2235_v42 = vclz %v2234_v58  ;;  %v2300_v7 = vshrl.u32 %v13228_v16, %v11940_v54  ;;  %v2359_v13 = vmul.u32 %v2357_v59, %v2333_v39 }
 0x210   : > { %vm2345_vm9 = vc.u32 %v2337_v12, %v2341_v17  ;;  %v2347_v29 = vadd.s32 %v2341_v17, %v2337_v12  ;;  %v2360_v5 = vmul.u32 %v2358_v60, %v2333_v39  ;;  %v2361_v34 = vmul.u32 %v2357_v59, %v2334_v0 }
 0x211   : > { %v2346_v63 = vsel %vm2345_vm9, 1, %v13226_v20  ;;  %v2321_v47 = vsel %vm2319_vm2, %v11988_v35, 2102212464  ;;  %v2342_v50 = vshrl.u32 %v2338_v43, 16  ;;  %v2362_v58 = vmul.u32 %v2358_v60, %v2334_v0 }
 0x212   : > { %v2348_v18 = vadd.s32 %v2346_v63, %v2340_v25  ;;  %vm2349_vm4 = vc.u32 %v2347_v29, %v2343_v10  ;;  %v2363_v57 = vshll.u32 %v2360_v5, 16  ;;  %v2365_v31 = vshll.u32 %v2361_v34, 16 }
 0x213   : > { %v2350_v40 = vsel %vm2349_vm4, 1, %v13226_v20  ;;  %v2092_v54 = vand.u32 2147483647, %v2091_v33  ;;  %v2094_v1 = vcvt.s32.f32 %v2087_v3  ;;  %v7993_v17 = vadd.s32 4294967294, %v2235_v42 }
 0x214   : > { %v2352_v12 = vadd.s32 %v2350_v40, %v2348_v18  ;;  %v2320_v39 = vsel %vm2316_vm12, %v2300_v7, %v12004_v22  ;;  %vm2367_vm8 = vc.u32 %v2359_v13, %v2363_v57  ;;  %v2369_v59 = vadd.s32 %v2363_v57, %v2359_v13 }
 0x215   : > { %v2451_v35 = vsel %vm2450_vm15, %v2449_v56, 0  ;;  %v2322_v43 = vsel %vm2318_vm7, %v11986_v19, %v2321_v47  ;;  %v2344_v25 = vshrl.u32 %v2339_v45, 16  ;;  %v2368_v60 = vsel %vm2367_vm8, 1, %v13226_v20 }
 0x216   : > { %v2353_v0 = vadd.s32 %v2352_v12, %v2342_v50  ;;  %v2364_v33 = vshrl.u32 %v2360_v5, 16  ;;  %v2370_v3 = vadd.s32 %v2368_v60, %v2362_v58  ;;  %vm2371_vm3 = vc.u32 %v2369_v59, %v2365_v31 }
 0x217   : > { %v2453_v10 = vand.u32 31, %v2451_v35  ;;  %v1957_v42 = vmul.f32 %v1956_v28, %v12002_v37  ;;  %vm7994_vm2 = vcmp.lt.s32.totalorder %v7993_v17, 0  ;;  %v2372_v22 = vsel %vm2371_vm3, 1, %v13226_v20 }
 0x218   : > { %v13332_v57 = vand.u32 2147483647, %v13328_v44  ;;  %v2095_v7 = vmul.f32 %v2094_v1, %v2092_v54  ;;  %v2366_v29 = vshrl.u32 %v2361_v34, 16  ;;  %v2374_v63 = vadd.s32 %v2372_v22, %v2370_v3 }
 0x219   : > { %v12077_v19 = vsub.s32 32, %v2453_v10  ;;  %vm1976_vm12 = vcmp.lt.s32.totalorder %v13303_v32, 0  ;;  %v2323_v45 = vsel %vm2317_vm14, %v2320_v39, %v2322_v43  ;;  %v12082_v13 = vadd.s32 %v2353_v0, %v2344_v25 }
 0x21a   : > { %v2446_v56 = vand.u32 8388607, %v13332_v57  ;;  %v12084_v5 = vadd.s32 %v2369_v59, %v2365_v31  ;;  %v2456_v28 = vshll.u32 %v13228_v16, %v2453_v10  ;;  %v12087_v47 = vsel %vm7994_vm2, 0, %v7993_v17 }
 0x21b   : > { %v2375_v50 = vadd.s32 %v2374_v63, %v2364_v33  ;;  %v2457_v1 = vshrl.u32 %v13230_v30, %v12077_v19  ;;  %v2459_v34 = vshll.u32 %v13230_v30, %v2453_v10  ;;  %v12092_v18 = vshrl.u32 %v2451_v35, 5 }
 0x21c   : > { %v2460_v62 = vshrl.u32 %v13270_v23, %v12077_v19  ;;  %v2462_v40 = vshll.u32 %v13270_v23, %v2453_v10  ;;  %v2465_v31 = vshll.u32 %v13229_v48, %v2453_v10  ;;  %vm1814_vm7 = vcmp.eq.s32.totalorder %v12043_v11, 2 }
 0x21d   : > { %v2376_v58 = vadd.s32 %v2375_v50, %v2366_v29  ;;  %v2463_v54 = vshrl.u32 %v13229_v48, %v12077_v19  ;;  %v2466_v17 = vshrl.u32 %v13271_v15, %v12077_v19  ;;  %v2468_v12 = vshll.u32 %v13271_v15, %v2453_v10 }
 0x21e   : > { %vm1811_vm14 = vcmp.eq.s32.totalorder %v12043_v11, 0  ;;  %v2377_v39 = vmul.u32 %v11998_v38, %v2323_v45  ;;  %vm2379_vm1 = vc.u32 %v12082_v13, %v12084_v5  ;;  %v2447_v59 = vor.u32 8388608, %v2446_v56 }
 0x21f   : > { %v12108_v35 = vor.u32 %v2457_v1, %v2456_v28  ;;  %v13333_v43 = vand.u32 2147483647, %v13303_v32  ;;  %v2380_v0 = vadd.s32 1, %v2376_v58  ;;  %v12116_v60 = vor.u32 %v2460_v62, %v2459_v34 }
 0x220   : > { %v2467_v33 = vor.u32 %v2466_v17, %v2465_v31  ;;  %v2469_v3 = vshrl.u32 %v13233_v49, %v12077_v19  ;;  %v1951_v38 = vadd.f32 -0.4999988, %v12055_v61  ;;  %v2243_v10 = vsub.s32 4294967266, %v12087_v47 }
 0x221   : > { %vm12112_vm15 = vcmp.le.f32.partialorder %v13333_v43, 0.7853982  ;;  %vm2471_vm9 = vcmp.lt.s32.totalorder %v12092_v18, 1  ;;  %vm2474_vm4 = vcmp.lt.s32.totalorder %v12092_v18, 4  ;;  %v2096_v22 = vxor.u32 2147483648, %v2095_v7 }
 0x222   : > { %v2381_v57 = vsel %vm2379_vm1, %v2380_v0, %v2376_v58  ;;  %v12124_v56 = vor.u32 %v2463_v54, %v2462_v40  ;;  %v2470_v29 = vor.u32 %v2469_v3, %v2468_v12  ;;  %v2223_v63 = vadd.s32 %v11909_v24, %v11907_v41 }
 0x223   : > { %v2382_v45 = vadd.s32 %v2381_v57, %v2377_v39  ;;  %vm2473_vm8 = vcmp.lt.s32.totalorder %v12092_v18, 3  ;;  %v12129_v28 = vshll.u32 %v2447_v59, 8  ;;  %v2239_v61 = vsub.s32 32, %v12087_v47 }
 0x224   : > { %vm2472_vm3 = vcmp.lt.s32.totalorder %v12092_v18, 2  ;;  %v2479_v50 = vsel %vm2471_vm9, %v12108_v35, %v12116_v60  ;;  %v2480_v1 = vsel %vm2474_vm4, %v2467_v33, 920167782  ;;  %v13180_v34 = vxor.u32 2147483648, %v12046_v36 }
 0x225   : > { %v1958_v41 = vadd.f32 -0.16666654, %v1957_v42  ;;  %v2244_v24 = vadd.s32 127, %v2243_v10  ;;  %v2383_v62 = vadd.s32 536870912, %v2382_v45  ;;  %v1952_v40 = vmul.f32 %v1951_v38, %v12002_v37 }
 0x226   : > { %v2097_v31 = vsel %vm1976_vm12, %v2096_v22, %v2095_v7  ;;  %v2481_v58 = vsel %vm2473_vm8, %v12124_v56, %v2480_v1  ;;  %v2484_v54 = vsel %vm2474_vm4, %v2470_v29, 1326507024  ;;  %v2483_v42 = vsel %vm2471_vm9, %v12116_v60, %v12124_v56 }
 0x227   : > { %v12148_v17 = vshrl.u32 %v2383_v62, 30  ;;  %v2482_v12 = vsel %vm2472_vm3, %v2479_v50, %v2481_v58  ;;  %v2488_v39 = vand.u32 65535, %v12129_v28  ;;  %v2240_v7 = vshll.u32 %v12019_v26, %v12087_v47 }
 0x228   : > { %v2241_v59 = vshrl.u32 %v2223_v63, %v2239_v61  ;;  %v2485_v43 = vsel %vm2473_vm8, %v2467_v33, %v2484_v54  ;;  %v2513_v0 = vshrl.u32 %v2482_v12, 16  ;;  %v13336_v3 = vxor.u32 2147483648, %v12034_v46 }
 0x229   : > { %v1959_v10 = vmul.f32 %v1958_v41, %v12002_v37  ;;  %v2245_v22 = vshll.u32 %v2244_v24, 23  ;;  %v2385_v57 = vshll.u32 %v12148_v17, 30  ;;  %v12175_v26 = vsel %vm1811_vm14, %v12034_v46, %v13180_v34 }
 0x22a   : > { %v12166_v38 = vsel %vm1814_vm7, %v13336_v3, %v12046_v36  ;;  %v12178_v47 = vadd.s32 3, %v12051_v21  ;;  %v2486_v33 = vsel %vm2472_vm3, %v2483_v42, %v2485_v43  ;;  %v2489_v29 = vshrl.u32 %v12129_v28, 16 }
 0x22b   : > { %v12186_v37 = vsel %vm12112_vm15, %v13303_v32, %v2097_v31  ;;  %v2386_v63 = vsub.s32 %v2382_v45, %v2385_v57  ;;  %v2512_v61 = vand.u32 65535, %v2482_v12  ;;  %v12188_v50 = vmul.u32 %v2513_v0, %v2488_v39 }
 0x22c   : > { %13337 = vst [vmem:[#allocation61_spill] sm:$0xff] %v12186_v37  ;;  %v12190_v1 = vadd.f32 1.0, %v1952_v40  ;;  %v2242_v41 = vor.u32 %v2241_v59, %v2240_v7  ;;  %v2490_v24 = vand.u32 65535, %v2486_v33  ;;  %v2491_v62 = vshrl.u32 %v2486_v33, 16 }
 0x22d   : > { %v1960_v58 = vadd.f32 1.0, %v1959_v10  ;;  %v2246_v54 = vor.u32 4788187, %v2245_v22  ;;  %vm2387_vm2 = vcmp.lt.s32.totalorder %v2386_v63, 0  ;;  %v2388_v42 = vsub.s32 0, %v2386_v63 }
 0x22e   : > { %v12194_v43 = vmul.f32 %v12186_v37, %v12186_v37  ;;  %v2492_v3 = vmul.u32 %v2490_v24, %v2488_v39  ;;  %v2493_v31 = vmul.u32 %v2491_v62, %v2488_v39  ;;  %v2494_v34 = vmul.u32 %v2490_v24, %v2489_v29 }
 0x22f   : > { %v2389_v45 = vsel %vm2387_vm2, %v2388_v42, %v2386_v63  ;;  %v2514_v12 = vmul.u32 %v2512_v61, %v2488_v39  ;;  %v12196_v57 = vmul.u32 %v2512_v61, %v2489_v29  ;;  %v2518_v40 = vshll.u32 %v12188_v50, 16 }
 0x230   : > { %v2249_v7 = vcvt.s32.f32 %v2242_v41  ;;  %v2390_v59 = vclz %v2389_v45  ;;  %v2495_v33 = vmul.u32 %v2491_v62, %v2489_v29  ;;  %v2496_v10 = vshll.u32 %v2493_v31, 16 }
 0x231   : > { %v2247_v22 = vand.u32 2147483647, %v2246_v54  ;;  %v2378_v21 = vadd.s32 %v12084_v5, %v12082_v13  ;;  %v2455_v46 = vshrl.u32 %v13228_v16, %v12077_v19  ;;  %v2498_v36 = vshll.u32 %v2494_v34, 16 }
 0x232   : > { %v7996_v37 = vadd.s32 4294967294, %v2390_v59  ;;  %vm2500_vm7 = vc.u32 %v2492_v3, %v2496_v10  ;;  %v2502_v24 = vadd.s32 %v2496_v10, %v2492_v3  ;;  %v2517_v39 = vmul.u32 %v2513_v0, %v2489_v29 }
 0x233   : > { %v2497_v61 = vshrl.u32 %v2493_v31, 16  ;;  %v2501_v42 = vsel %vm2500_vm7, 1, %v13226_v20  ;;  %v2520_v41 = vshll.u32 %v12196_v57, 16  ;;  %vm2522_vm14 = vc.u32 %v2514_v12, %v2518_v40 }
 0x234   : > { %vm2131_vm1 = vcmp.lt.s32.totalorder %v13311_v53, 0  ;;  %vm7997_vm2 = vcmp.lt.s32.totalorder %v7996_v37, 0  ;;  %v2503_v62 = vadd.s32 %v2501_v42, %v2495_v33  ;;  %vm2504_vm6 = vc.u32 %v2502_v24, %v2498_v36  ;;  %v13338_v42 = vld [vmem:[#allocation31_spill] sm:$0xff] }
 0x235   : > { %v2524_v13 = vadd.s32 %v2518_v40, %v2514_v12  ;;  %v2393_v5 = vsel %vm7997_vm2, 0, %v7996_v37  ;;  %v2476_v19 = vsel %vm2474_vm4, %v12124_v56, 2102212464  ;;  %v2505_v54 = vsel %vm2504_vm6, 1, %v13226_v20 }
 0x236   : > { %v2523_v0 = vsel %vm2522_vm14, 1, %v13226_v20  ;;  %v2394_v29 = vsub.s32 32, %v2393_v5  ;;  %v2395_v3 = vshll.u32 %v2386_v63, %v2393_v5  ;;  %v2398_v31 = vsub.s32 4294967266, %v2393_v5 }
 0x237   : > { %v2507_v45 = vadd.s32 %v2505_v54, %v2503_v62  ;;  %v2250_v59 = vmul.f32 %v2249_v7, %v2247_v22  ;;  %v2499_v10 = vshrl.u32 %v2494_v34, 16  ;;  %v2519_v4 = vshrl.u32 %v12188_v50, 16 }
 0x238   : > { %v2525_v33 = vadd.s32 %v2523_v0, %v2517_v39  ;;  %vm1810_vm7 = vcmp.lt.s32.totalorder %v12043_v11, 2  ;;  %v2396_v36 = vshrl.u32 %v2378_v21, %v2394_v29  ;;  %v2399_v37 = vadd.s32 127, %v2398_v31 }
 0x239   : > { %v2508_v12 = vadd.s32 %v2507_v45, %v2497_v61  ;;  %vm2526_vm2 = vc.u32 %v2524_v13, %v2520_v41  ;;  %v2110_v56 = vmul.f32 -0.00019511016, %v12194_v43  ;;  %v2475_v40 = vsel %vm2471_vm9, %v2455_v46, %v12108_v35 }
 0x23a   : > { %v2477_v63 = vsel %vm2473_vm8, %v12116_v60, %v2476_v19  ;;  %v2527_v34 = vsel %vm2526_vm2, 1, %v13226_v20  ;;  %v2397_v50 = vor.u32 %v2396_v36, %v2395_v3  ;;  %v2400_v7 = vshll.u32 %v2399_v37, 23 }
 0x23b   : > { %v2521_v22 = vshrl.u32 %v12196_v57, 16  ;;  %v2529_v21 = vadd.s32 %v2527_v34, %v2525_v33  ;;  %v2251_v24 = vxor.u32 2147483648, %v2250_v59  ;;  %v12222_v39 = vadd.s32 %v2508_v12, %v2499_v10 }
 0x23c   : > { %v12224_v61 = vadd.s32 %v2524_v13, %v2520_v41  ;;  %v2597_v62 = vand.u32 2139095040, %v13338_v42  ;;  %v12228_v46 = vmul.f32 %v1960_v58, %v11977_v8  ;;  %v2401_v35 = vor.u32 4788187, %v2400_v7 }
 0x23d   : > { %v2478_v60 = vsel %vm2472_vm3, %v2475_v40, %v2477_v63  ;;  %v2530_v5 = vadd.s32 %v2529_v21, %v2519_v4  ;;  %vm1497_vm6 = vweird.f32 %v13299_v6  ;;  %vm1652_vm9 = vweird.f32 %v13307_v55 }
 0x23e   : > { %vm1807_vm4 = vweird.f32 %v13279_v27  ;;  %v1964_v57 = vand.u32 3, %v12178_v47  ;;  %v13339_v41 = vand.u32 2147483647, %v13311_v53  ;;  %v2404_v8 = vcvt.s32.f32 %v2397_v50 }
 0x23f   : > { %v2598_v58 = vshrl.u32 %v2597_v62, 23  ;;  %v2103_v18 = vmul.f32 -0.001358992, %v12194_v43  ;;  %v2111_v19 = vadd.f32 0.008332121, %v2110_v56  ;;  %v2531_v54 = vadd.s32 %v2530_v5, %v2521_v22 }
 0x240   : > { %vm12238_vm8 = vcmp.le.f32.partialorder %v13339_v41, 0.7853982  ;;  %v2402_v4 = vand.u32 2147483647, %v2401_v35  ;;  %v2252_v0 = vsel %vm2131_vm1, %v2251_v24, %v2250_v59  ;;  %v2532_v29 = vmul.u32 %v12129_v28, %v2478_v60 }
 0x241   : > { %vm2534_vm3 = vc.u32 %v12222_v39, %v12224_v61  ;;  %v8001_v47 = vadd.s32 4294967169, %v2598_v58  ;;  %v13192_v3 = vxor.u32 2147483648, %v12228_v46  ;;  %v13191_v31 = vxor.u32 2147483648, %v12190_v1 }
 0x242   : > { %v2098_v45 = vsub.s32 4, %v11838_v2  ;;  %v2535_v10 = vadd.s32 1, %v2531_v54  ;;  %vm1966_vm14 = vcmp.eq.s32.totalorder %v1964_v57, 0  ;;  %vm1969_vm2 = vcmp.eq.s32.totalorder %v1964_v57, 2 }
 0x243   : > { %v2405_v33 = vmul.f32 %v2404_v8, %v2402_v4  ;;  %v2604_v36 = vadd.s32 1, %v8001_v47  ;;  %v2104_v37 = vadd.f32 0.041655596, %v2103_v18  ;;  %v2112_v59 = vmul.f32 %v2111_v19, %v12194_v43 }
 0x244   : > { %v12255_v28 = vsel %vm12238_vm8, %v13311_v53, %v2252_v0  ;;  %v2536_v12 = vsel %vm2534_vm3, %v2535_v10, %v2531_v54  ;;  %v1817_v56 = vsel %vm1810_vm7, %v12175_v26, %v12166_v38  ;;  %vm1965_vm0 = vcmp.lt.s32.totalorder %v1964_v57, 2 }
 0x245   : > { %v2537_v40 = vadd.s32 %v2536_v12, %v2532_v29  ;;  %vm2605_vm13 = vcmp.gt.s32.totalorder %v2604_v36, 0  ;;  %v1968_v63 = vsel %vm1966_vm14, %v12190_v1, %v13192_v3  ;;  %v1971_v34 = vsel %vm1969_vm2, %v13191_v31, %v12228_v46 }
 0x246   : > { %v2099_v50 = vsel %vm1976_vm12, %v2098_v45, %v11838_v2  ;;  %v2606_v7 = vsel %vm2605_vm13, %v2604_v36, 0  ;;  %v12272_v11 = vmul.f32 %v12255_v28, %v12255_v28  ;;  %v2406_v38 = vxor.u32 2147483648, %v2405_v33 }
 0x247   : > { %v2538_v26 = vadd.s32 536870912, %v2537_v40  ;;  %v2608_v22 = vand.u32 31, %v2606_v7  ;;  %v2105_v21 = vmul.f32 %v2104_v37, %v12194_v43  ;;  %v2113_v24 = vadd.f32 -0.16666654, %v2112_v59 }
 0x248   : > { %v2253_v62 = vsub.s32 4, %v11968_v51  ;;  %vm2286_vm7 = vcmp.lt.s32.totalorder %v13322_v9, 0  ;;  %v12279_v35 = vsel %vm12112_vm15, 0, %v2099_v50  ;;  %v2258_v2 = vmul.f32 -0.001358992, %v12272_v11 }
 0x249   : > { %v12282_v60 = vshrl.u32 %v2538_v26, 30  ;;  %v13193_v5 = vand.u32 2147483647, %v13338_v42  ;;  %v12288_v41 = vsel %vm1497_vm6, nan, %v11937_v14  ;;  %v12293_v8 = vsel %vm1652_vm9, nan, %v11954_v52 }
 0x24a   : > { %v12297_v25 = vsel %vm1807_vm4, nan, %v1817_v56  ;;  %v12299_v58 = vsub.s32 32, %v2608_v22  ;;  %v12302_v18 = vsel %vm1965_vm0, %v1968_v63, %v1971_v34  ;;  %v13342_v19 = vand.u32 2147483647, %v13322_v9 }
 0x24b   : > { %v2407_v14 = vsel %vm2286_vm7, %v2406_v38, %v2405_v33  ;;  %v2540_v52 = vshll.u32 %v12282_v60, 30  ;;  %v2106_v54 = vadd.f32 -0.4999988, %v2105_v21  ;;  %v2114_v0 = vmul.f32 %v2113_v24, %v12194_v43 }
 0x24c   : > { %vm12306_vm13 = vcmp.le.f32.partialorder %v13342_v19, 0.7853982  ;;  %v12315_v29 = vadd.s32 3, %v12279_v35  ;;  %v2254_v57 = vsel %vm2131_vm1, %v2253_v62, %v11968_v51  ;;  %v2259_v47 = vadd.f32 0.041655596, %v2258_v2 }
 0x24d   : > { %v2265_v45 = vmul.f32 -0.00019511016, %v12272_v11  ;;  %v2541_v10 = vsub.s32 %v2537_v40, %v2540_v52  ;;  %v2601_v36 = vand.u32 8388607, %v13193_v5  ;;  %v12326_v33 = vsel %vm12306_vm13, %v13322_v9, %v2407_v14 }
 0x24e   : > { %v12328_v37 = vshrl.u32 %v2606_v7, 5  ;;  %v2620_v59 = vshll.u32 %v13229_v48, %v2608_v22  ;;  %v2621_v12 = vshrl.u32 %v13271_v15, %v12299_v58  ;;  %v2611_v56 = vshll.u32 %v13228_v16, %v2608_v22 }
 0x24f   : > { %vm2542_vm0 = vcmp.lt.s32.totalorder %v2541_v10, 0  ;;  %v2543_v51 = vsub.s32 0, %v2541_v10  ;;  %v2614_v40 = vshll.u32 %v13230_v30, %v2608_v22  ;;  %v2612_v63 = vshrl.u32 %v13230_v30, %v12299_v58 }
 0x250   : > { %v2615_v34 = vshrl.u32 %v13270_v23, %v12299_v58  ;;  %v2623_v50 = vshll.u32 %v13271_v15, %v2608_v22  ;;  %v2624_v7 = vshrl.u32 %v13233_v49, %v12299_v58  ;;  %v2266_v38 = vadd.f32 0.008332121, %v2265_v45 }
 0x251   : > { %v2544_v26 = vsel %vm2542_vm0, %v2543_v51, %v2541_v10  ;;  %v2617_v21 = vshll.u32 %v13270_v23, %v2608_v22  ;;  %v2618_v24 = vshrl.u32 %v13229_v48, %v12299_v58  ;;  %v12346_v62 = vmul.f32 %v2106_v54, %v12194_v43 }
 0x252   : > { %v12350_v30 = vsel %vm12238_vm8, 0, %v2254_v57  ;;  %v2545_v2 = vclz %v2544_v26  ;;  %v2622_v19 = vor.u32 %v2621_v12, %v2620_v59  ;;  %v12354_v15 = vmul.f32 %v12326_v33, %v12326_v33 }
 0x253   : > { %v2602_v49 = vor.u32 8388608, %v2601_v36  ;;  %v2625_v14 = vor.u32 %v2624_v7, %v2623_v50  ;;  %vm2629_vm12 = vcmp.lt.s32.totalorder %v12328_v37, 4  ;;  %v12357_v23 = vadd.f32 1.0, %v2114_v0 }
 0x254   : > { %v7999_v48 = vadd.s32 4294967294, %v2545_v2  ;;  %v2613_v22 = vor.u32 %v2612_v63, %v2611_v56  ;;  %v2616_v43 = vor.u32 %v2615_v34, %v2614_v40  ;;  %v12360_v52 = vmul.f32 %v2259_v47, %v12272_v11 }
 0x255   : > { %v2267_v13 = vmul.f32 %v2266_v38, %v12272_v11  ;;  %v2619_v54 = vor.u32 %v2618_v24, %v2617_v21  ;;  %vm2626_vm15 = vcmp.lt.s32.totalorder %v12328_v37, 1  ;;  %v2533_v57 = vadd.s32 %v12224_v61, %v12222_v39 }
 0x256   : > { %vm8000_vm1 = vcmp.lt.s32.totalorder %v7999_v48, 0  ;;  %vm2628_vm8 = vcmp.lt.s32.totalorder %v12328_v37, 3  ;;  %v2635_v0 = vsel %vm2629_vm12, %v2622_v19, 920167782  ;;  %v2420_v45 = vmul.f32 -0.00019511016, %v12354_v15 }
 0x257   : > { %v2548_v36 = vsel %vm8000_vm1, 0, %v7999_v48  ;;  %v2639_v47 = vsel %vm2629_vm12, %v2625_v14, 1326507024  ;;  %v12372_v59 = vshll.u32 %v2602_v49, 8  ;;  %vm2627_vm3 = vcmp.lt.s32.totalorder %v12328_v37, 2 }
 0x258   : > { %v2549_v12 = vsub.s32 32, %v2548_v36  ;;  %v2550_v51 = vshll.u32 %v2541_v10, %v2548_v36  ;;  %v2634_v39 = vsel %vm2626_vm15, %v2613_v22, %v2616_v43  ;;  %v12377_v61 = vadd.f32 -0.16666654, %v2267_v13 }
 0x259   : > { %v2553_v56 = vsub.s32 4294967266, %v2548_v36  ;;  %v2636_v40 = vsel %vm2628_vm8, %v2619_v54, %v2635_v0  ;;  %v2638_v63 = vsel %vm2626_vm15, %v2616_v43, %v2619_v54  ;;  %v2413_v50 = vmul.f32 -0.001358992, %v12354_v15 }
 0x25a   : > { %v2551_v7 = vshrl.u32 %v2533_v57, %v2549_v12  ;;  %v2640_v10 = vsel %vm2628_vm8, %v2622_v19, %v2639_v47  ;;  %v2637_v26 = vsel %vm2627_vm3, %v2634_v39, %v2636_v40  ;;  %v2643_v21 = vand.u32 65535, %v12372_v59 }
 0x25b   : > { %v2554_v38 = vadd.s32 127, %v2553_v56  ;;  %v2644_v24 = vshrl.u32 %v12372_v59, 16  ;;  %v2421_v2 = vadd.f32 0.008332121, %v2420_v45  ;;  %vm2441_vm14 = vcmp.lt.s32.totalorder %v13328_v44, 0 }
 0x25c   : > { %v2552_v49 = vor.u32 %v2551_v7, %v2550_v51  ;;  %v2610_v14 = vshrl.u32 %v13228_v16, %v12299_v58  ;;  %v2641_v48 = vsel %vm2627_vm3, %v2638_v63, %v2640_v10  ;;  %v13345_v19 = vand.u32 2147483647, %v13328_v44 }
 0x25d   : > { %v2555_v57 = vshll.u32 %v2554_v38, 23  ;;  %v2645_v0 = vand.u32 65535, %v2641_v48  ;;  %v2646_v36 = vshrl.u32 %v2641_v48, 16  ;;  %v2667_v47 = vand.u32 65535, %v2637_v26 }
 0x25e   : > { %vm12398_vm2 = vcmp.le.f32.partialorder %v13345_v19, 0.7853982  ;;  %v2414_v45 = vadd.f32 0.041655596, %v2413_v50  ;;  %v2559_v12 = vcvt.s32.f32 %v2552_v49  ;;  %v2631_v51 = vsel %vm2629_vm12, %v2619_v54, 2102212464 }
 0x25f   : > { %v2668_v39 = vshrl.u32 %v2637_v26, 16  ;;  %v2556_v16 = vor.u32 4788187, %v2555_v57  ;;  %v2647_v58 = vmul.u32 %v2645_v0, %v2643_v21  ;;  %v2648_v56 = vmul.u32 %v2646_v36, %v2643_v21 }
 0x260   : > { %v2649_v40 = vmul.u32 %v2645_v0, %v2644_v24  ;;  %v2422_v63 = vmul.f32 %v2421_v2, %v12354_v15  ;;  %v2669_v7 = vmul.u32 %v2667_v47, %v2643_v21  ;;  %v2671_v19 = vmul.u32 %v2667_v47, %v2644_v24 }
 0x261   : > { %v2670_v10 = vmul.u32 %v2668_v39, %v2643_v21  ;;  %v2557_v31 = vand.u32 2147483647, %v2556_v16  ;;  %v2650_v38 = vmul.u32 %v2646_v36, %v2644_v24  ;;  %v2651_v3 = vshll.u32 %v2648_v56, 16 }
 0x262   : > { %v2653_v48 = vshll.u32 %v2649_v40, 16  ;;  %v2630_v50 = vsel %vm2626_vm15, %v2610_v14, %v2613_v22  ;;  %v2632_v54 = vsel %vm2628_vm8, %v2616_v43, %v2631_v51  ;;  %v2672_v26 = vmul.u32 %v2668_v39, %v2644_v24  ;;  %v13348_v24 = vld [vmem:[#allocation24_spill] sm:$0xff] }
 0x263   : > { %v2673_v49 = vshll.u32 %v2670_v10, 16  ;;  %v2560_v57 = vmul.f32 %v2559_v12, %v2557_v31  ;;  %vm2655_vm0 = vc.u32 %v2647_v58, %v2651_v3  ;;  %v2657_v0 = vadd.s32 %v2651_v3, %v2647_v58 }
 0x264   : > { %v2675_v5 = vshll.u32 %v2671_v19, 16  ;;  %v2652_v2 = vshrl.u32 %v2648_v56, 16  ;;  %v2656_v21 = vsel %vm2655_vm0, 1, %v13226_v20  ;;  %v2674_v14 = vshrl.u32 %v2670_v10, 16 }
 0x265   : > { %vm2677_vm12 = vc.u32 %v2669_v7, %v2673_v49  ;;  %v2679_v47 = vadd.s32 %v2673_v49, %v2669_v7  ;;  %v2561_v36 = vxor.u32 2147483648, %v2560_v57  ;;  %v2658_v16 = vadd.s32 %v2656_v21, %v2650_v38 }
 0x266   : > { %vm2659_vm1 = vc.u32 %v2657_v0, %v2653_v48  ;;  %v2678_v34 = vsel %vm2677_vm12, 1, %v13226_v20  ;;  %vm13194_vm8 = vweird.f32 %v13348_v24  ;;  %v2654_v31 = vshrl.u32 %v2649_v40, 16 }
 0x267   : > { %v2660_v22 = vsel %vm2659_vm1, 1, %v13226_v20  ;;  %v2680_v43 = vadd.s32 %v2678_v34, %v2672_v26  ;;  %vm2681_vm15 = vc.u32 %v2679_v47, %v2675_v5  ;;  %v2562_v3 = vsel %vm2441_vm14, %v2561_v36, %v2560_v57  ;;  %v13350_v36 = vld [vmem:[#allocation61_spill] sm:$0xff] }
 0x268   : > { %v2662_v12 = vadd.s32 %v2660_v22, %v2658_v16  ;;  %v2682_v51 = vsel %vm2681_vm15, 1, %v13226_v20  ;;  %v2415_v39 = vmul.f32 %v2414_v45, %v12354_v15  ;;  %v12420_v58 = vsel %vm12398_vm2, %v13328_v44, %v2562_v3 }
 0x269   : > { %v2676_v56 = vshrl.u32 %v2671_v19, 16  ;;  %v2684_v7 = vadd.s32 %v2682_v51, %v2680_v43  ;;  %v13349_v34 = vsub.s32 4, %v12148_v17  ;;  %v2567_v40 = vmul.f32 %v12420_v58, %v12420_v58 }
 0x26a   : > { %v2663_v38 = vadd.s32 %v2662_v12, %v2652_v2  ;;  %v12429_v20 = vadd.s32 %v2679_v47, %v2675_v5  ;;  %v2261_v45 = vadd.f32 -0.4999988, %v12360_v52  ;;  %v2423_v48 = vadd.f32 -0.16666654, %v2422_v63 }
 0x26b   : > { %v2409_v10 = vsel %vm2286_vm7, %v13349_v34, %v12148_v17  ;;  %v2633_v26 = vsel %vm2627_vm3, %v2630_v50, %v2632_v54  ;;  %v2685_v19 = vadd.s32 %v2684_v7, %v2674_v14  ;;  %v2269_v49 = vmul.f32 %v12377_v61, %v12272_v11 }
 0x26c   : > { %v2568_v57 = vmul.f32 -0.001358992, %v2567_v40  ;;  %v2575_v0 = vmul.f32 -0.00019511016, %v2567_v40  ;;  %v12436_v21 = vadd.s32 %v2663_v38, %v2654_v31  ;;  %v12440_v17 = vsel %vm12306_vm13, 0, %v2409_v10 }
 0x26d   : > { %v2416_v5 = vadd.f32 -0.4999988, %v2415_v39  ;;  %v2563_v2 = vsub.s32 4, %v12282_v60  ;;  %v2686_v52 = vadd.s32 %v2685_v19, %v2676_v56  ;;  %v2687_v37 = vmul.u32 %v12372_v59, %v2633_v26 }
 0x26e   : > { %v2569_v63 = vadd.f32 0.041655596, %v2568_v57  ;;  %v2576_v47 = vadd.f32 0.008332121, %v2575_v0  ;;  %vm2689_vm7 = vc.u32 %v12436_v21, %v12429_v20  ;;  %v12447_v61 = vadd.f32 1.0, %v12346_v62 }
 0x26f   : > { %v2119_v50 = vand.u32 3, %v12315_v29  ;;  %v2424_v4 = vmul.f32 %v2423_v48, %v12354_v15  ;;  %v2690_v54 = vadd.s32 1, %v2686_v52  ;;  %v12453_v16 = vmul.f32 %v12357_v23, %v13350_v36 }
 0x270   : > { %v2273_v22 = vadd.s32 3, %v12350_v30  ;;  %v2570_v14 = vmul.f32 %v2569_v63, %v2567_v40  ;;  %v2577_v43 = vmul.f32 %v2576_v47, %v2567_v40  ;;  %v2262_v59 = vmul.f32 %v2261_v45, %v12272_v11 }
 0x271   : > { %v2270_v3 = vadd.f32 1.0, %v2269_v49  ;;  %v2428_v31 = vadd.s32 3, %v12440_v17  ;;  %v2691_v62 = vsel %vm2689_vm7, %v2690_v54, %v2686_v52  ;;  %v2417_v12 = vmul.f32 %v2416_v5, %v12354_v15 }
 0x272   : > { %v2564_v29 = vsel %vm2441_vm14, %v2563_v2, %v12282_v60  ;;  %v2578_v51 = vadd.f32 -0.16666654, %v2577_v43  ;;  %v2692_v39 = vadd.s32 %v2691_v62, %v2687_v37  ;;  %v12465_v23 = vsel %vm13194_vm8, nan, %v12302_v18 }
 0x273   : > { %vm2124_vm13 = vcmp.eq.s32.totalorder %v2119_v50, 2  ;;  %v2425_v56 = vadd.f32 1.0, %v2424_v4  ;;  %v2571_v11 = vadd.f32 -0.4999988, %v2570_v14  ;;  %v2122_v7 = vxor.u32 2147483648, %v12453_v16 }
 0x274   : > { %v2125_v34 = vxor.u32 2147483648, %v12447_v61  ;;  %v2579_v10 = vmul.f32 %v2578_v51, %v2567_v40  ;;  %v2693_v15 = vadd.s32 536870912, %v2692_v39  ;;  %v12469_v38 = vadd.f32 1.0, %v2262_v59 }
 0x275   : > { %v12472_v60 = vmul.f32 %v2270_v3, %v12255_v28  ;;  %v2274_v45 = vand.u32 3, %v2273_v22  ;;  %v12476_v48 = vsel %vm12398_vm2, 0, %v2564_v29  ;;  %vm2121_vm3 = vcmp.eq.s32.totalorder %v2119_v50, 0 }
 0x276   : > { %v12478_v18 = vadd.f32 1.0, %v2417_v12  ;;  %v2429_v26 = vand.u32 3, %v2428_v31  ;;  %v2694_v19 = vshrl.u32 %v2693_v15, 30  ;;  %vm13196_vm14 = vweird.f32 %v13303_v32 }
 0x277   : > { %v12482_v49 = vmul.f32 %v2425_v56, %v12326_v33  ;;  %v2572_v57 = vmul.f32 %v2571_v11, %v2567_v40  ;;  %v2580_v0 = vadd.f32 1.0, %v2579_v10  ;;  %vm2120_vm0 = vcmp.lt.s32.totalorder %v2119_v50, 2 }
 0x278   : > { %v2126_v28 = vsel %vm2124_vm13, %v2125_v34, %v12453_v16  ;;  %v2583_v13 = vadd.s32 3, %v12476_v48  ;;  %v2695_v5 = vshll.u32 %v2694_v19, 30  ;;  %v2123_v2 = vsel %vm2121_vm3, %v12447_v61, %v2122_v7 }
 0x279   : > { %vm2276_vm2 = vcmp.eq.s32.totalorder %v2274_v45, 0  ;;  %v2277_v52 = vxor.u32 2147483648, %v12472_v60  ;;  %v2280_v33 = vxor.u32 2147483648, %v12469_v38  ;;  %vm2279_vm12 = vcmp.eq.s32.totalorder %v2274_v45, 2 }
 0x27a   : > { %vm2431_vm1 = vcmp.eq.s32.totalorder %v2429_v26, 0  ;;  %v2435_v40 = vxor.u32 2147483648, %v12478_v18  ;;  %v2696_v63 = vsub.s32 %v2692_v39, %v2695_v5  ;;  %v2432_v47 = vxor.u32 2147483648, %v12482_v49 }
 0x27b   : > { %vm2434_vm15 = vcmp.eq.s32.totalorder %v2429_v26, 2  ;;  %v12496_v37 = vadd.f32 1.0, %v2572_v57  ;;  %v12499_v4 = vmul.f32 %v2580_v0, %v12420_v58  ;;  %v2584_v54 = vand.u32 3, %v2583_v13  ;;  %v13354_v13 = vld [vmem:[#allocation29_spill] sm:$0xff] }
 0x27c   : > { %vm2697_vm7 = vcmp.lt.s32.totalorder %v2696_v63, 0  ;;  %v2698_v36 = vsub.s32 0, %v2696_v63  ;;  %v2718_v22 = vsub.s32 4, %v2694_v19  ;;  %v2127_v14 = vsel %vm2120_vm0, %v2123_v2, %v2126_v28 }
 0x27d   : > { %vm2275_vm13 = vcmp.lt.s32.totalorder %v2274_v45, 2  ;;  %v2278_v43 = vsel %vm2276_vm2, %v12469_v38, %v2277_v52  ;;  %v2281_v59 = vsel %vm2279_vm12, %v2280_v33, %v12472_v60  ;;  %vm2430_vm3 = vcmp.lt.s32.totalorder %v2429_v26, 2 }
 0x27e   : > { %v2436_v58 = vsel %vm2434_vm15, %v2435_v40, %v12482_v49  ;;  %vm2596_vm8 = vcmp.lt.s32.totalorder %v13338_v42, 0  ;;  %v2699_v3 = vsel %vm2697_vm7, %v2698_v36, %v2696_v63  ;;  %v2433_v50 = vsel %vm2431_vm1, %v12478_v18, %v2432_v47 }
 0x27f   : > { %v13198_v31 = vxor.u32 2147483648, %v12499_v4  ;;  %v13197_v62 = vxor.u32 2147483648, %v12496_v37  ;;  %v2700_v12 = vclz %v2699_v3  ;;  %vm13195_vm0 = vweird.f32 %v13311_v53 }
 0x280   : > { %vm2586_vm2 = vcmp.eq.s32.totalorder %v2584_v54, 0  ;;  %vm2589_vm12 = vcmp.eq.s32.totalorder %v2584_v54, 2  ;;  %v2719_v29 = vsel %vm2596_vm8, %v2718_v22, %v2694_v19  ;;  %v12524_v51 = vsel %vm13196_vm14, nan, %v2127_v14 }
 0x281   : > { %v2282_v39 = vsel %vm2275_vm13, %v2278_v43, %v2281_v59  ;;  %vm2427_vm1 = vweird.f32 %v13322_v9  ;;  %v8002_v56 = vadd.s32 4294967294, %v2700_v12  ;;  %v2437_v11 = vsel %vm2430_vm3, %v2433_v50, %v2436_v58  ;;  %v13356_v50 = vld [vmem:[#allocation36_spill] sm:$0xff] }
 0x282   : > { %vm2585_vm15 = vcmp.lt.s32.totalorder %v2584_v54, 2  ;;  %v13351_v10 = vand.u32 2147483647, %v13338_v42  ;;  %v2688_v19 = vadd.s32 %v12429_v20, %v12436_v21  ;;  %v2588_v45 = vsel %vm2586_vm2, %v12496_v37, %v13198_v31  ;;  %v13355_v20 = vld [vmem:[#allocation30_spill] sm:$0xff] }
 0x283   : > { %v2591_v57 = vsel %vm2589_vm12, %v13197_v62, %v12499_v4  ;;  %vm8003_vm13 = vcmp.lt.s32.totalorder %v8002_v56, 0  ;;  %v2283_v0 = vsel %vm13195_vm0, nan, %v2282_v39  ;;  %v2909_v5 = vand.u32 3, %v13354_v13  ;;  %v13361_v54 = vld [vmem:[#allocation42_spill] sm:$0xff]  ;;  %v13363_v13 = vld [vmem:[#allocation48_spill] sm:$0xff] }
 0x284   : > { %vm12531_vm7 = vcmp.le.f32.partialorder %v13351_v10, 0.7853982  ;;  %v2703_v28 = vsel %vm8003_vm13, 0, %v8002_v56  ;;  %v3063_v21 = vand.u32 3, %v13355_v20  ;;  %vm13199_vm3 = vweird.f32 %v13328_v44  ;;  %v13359_v56 = vld [vmem:[#allocation32_spill] sm:$0xff]  ;;  %v13366_v62 = vld [vmem:[#allocation26_spill] sm:$0xff] }
 0x285   : > { %v12545_v26 = vsel %vm12531_vm7, 0, %v2719_v29  ;;  %v2704_v2 = vsub.s32 32, %v2703_v28  ;;  %v2705_v36 = vshll.u32 %v2696_v63, %v2703_v28  ;;  %v2708_v22 = vsub.s32 4294967266, %v2703_v28  ;;  %v13357_v29 = vld [vmem:[#allocation33_spill] sm:$0xff] }
 0x286   : > { %v2438_v14 = vsel %vm2427_vm1, nan, %v2437_v11  ;;  %v2592_v43 = vsel %vm2585_vm15, %v2588_v45, %v2591_v57  ;;  %v2738_v59 = vadd.s32 3, %v12545_v26  ;;  %vm2911_vm2 = vcmp.eq.s32.totalorder %v2909_v5, 0  ;;  %v13360_v11 = vld [vmem:[#allocation41_spill] sm:$0xff]  ;;  %v13362_v57 = vld [vmem:[#allocation43_spill] sm:$0xff] }
 0x287   : > { %v2706_v58 = vshrl.u32 %v2688_v19, %v2704_v2  ;;  %v2709_v3 = vadd.s32 127, %v2708_v22  ;;  %vm2910_vm12 = vcmp.lt.s32.totalorder %v2909_v5, 2  ;;  %v3217_v12 = vand.u32 3, %v13356_v50  ;;  %v13364_v2 = vld [vmem:[#allocation49_spill] sm:$0xff]  ;;  %v13365_v22 = vld [vmem:[#allocation22_spill] sm:$0xff] }
 0x288   : > { %v13358_v39 = vxor.u32 2147483648, %v13357_v29  ;;  %vm2914_vm13 = vcmp.eq.s32.totalorder %v2909_v5, 2  ;;  %vm3065_vm0 = vcmp.eq.s32.totalorder %v3063_v21, 0  ;;  %vm3068_vm14 = vcmp.eq.s32.totalorder %v3063_v21, 2  ;;  %v13373_v5 = vld [vmem:[#allocation40_spill] sm:$0xff] }
 0x289   : > { %v2707_v63 = vor.u32 %v2706_v58, %v2705_v36  ;;  %v2710_v28 = vshll.u32 %v2709_v3, 23  ;;  %v2749_v45 = vpack.c.bf16 %v13361_v54, %v13360_v11  ;;  %v2750_v20 = vpack.c.bf16 %v13363_v13, %v13362_v57  ;;  %v13368_v57 = vld [vmem:[#allocation35_spill] sm:$0xff] }
 0x28a   : > { %v2913_v10 = vsel %vm2911_vm2, %v13359_v56, %v13358_v39  ;;  %v12566_v19 = vsel %vm13199_vm3, nan, %v2592_v43  ;;  %v2751_v50 = vpack.c.bf16 %v13365_v22, %v13364_v2  ;;  %v2752_v39 = vpack.c.bf16 %v12288_v41, %v13366_v62  ;;  %v13370_v41 = vld [vmem:[#allocation34_spill] sm:$0xff] }
 0x28b   : > { %vm3064_vm15 = vcmp.lt.s32.totalorder %v3063_v21, 2  ;;  %v2711_v31 = vor.u32 4788187, %v2710_v28  ;;  %v2714_v36 = vcvt.s32.f32 %v2707_v63  ;;  %v2753_v58 = vpack.c.bf16 %v12297_v25, %v12293_v8  ;;  %2757 = vst [vmem:[#allocation2 + $0x30] sm:$0xff] %v2749_v45  ;;  %v13380_v21 = vld [vmem:[#allocation45_spill] sm:$0xff] }
 0x28c   : > { %v13367_v3 = vxor.u32 2147483648, %v13359_v56  ;;  %v2754_v43 = vpack.c.bf16 %v12524_v51, %v12465_v23  ;;  %2758 = vst [vmem:[#allocation2] sm:$0xff] %v2750_v20  ;;  %v13369_v13 = vxor.u32 2147483648, %v13368_v57  ;;  %v13371_v63 = vxor.u32 2147483648, %v13370_v41  ;;  %v13374_v20 = vld [vmem:[#allocation39_spill] sm:$0xff] }
 0x28d   : > { %v2712_v25 = vand.u32 2147483647, %v2711_v31  ;;  %v12588_v28 = vand.u32 3, %v2738_v59  ;;  %2759 = vst [vmem:[#allocation2 + $0x58] sm:$0xff] %v2751_v50  ;;  %vm3219_vm2 = vcmp.eq.s32.totalorder %v3217_v12, 0  ;;  %v3371_v56 = vand.u32 3, %v13373_v5 }
 0x28e   : > { %v2916_v11 = vsel %vm2914_vm13, %v13367_v3, %v13357_v29  ;;  %v3067_v62 = vsel %vm3065_vm0, %v13370_v41, %v13369_v13  ;;  %v3070_v8 = vsel %vm3068_vm14, %v13371_v63, %v13368_v57  ;;  %v2755_v29 = vpack.c.bf16 %v2438_v14, %v2283_v0  ;;  %2760 = vst [vmem:[#allocation2 + $0x18] sm:$0xff] %v2752_v39  ;;  %v13376_v59 = vld [vmem:[#allocation38_spill] sm:$0xff]  ;;  %v13379_v39 = vld [vmem:[#allocation47_spill] sm:$0xff] }
 0x28f   : > { %v2917_v54 = vsel %vm2910_vm12, %v2913_v10, %v2916_v11  ;;  %vm3218_vm12 = vcmp.lt.s32.totalorder %v3217_v12, 2  ;;  %vm3222_vm13 = vcmp.eq.s32.totalorder %v3217_v12, 2  ;;  %v2715_v10 = vmul.f32 %v2714_v36, %v2712_v25  ;;  %2761 = vst [vmem:[#allocation2 + $0x50] sm:$0xff] %v2753_v58  ;;  %v13377_v0 = vld [vmem:[#allocation46_spill] sm:$0xff]  ;;  %v13382_v58 = vld [vmem:[#allocation44_spill] sm:$0xff] }
 0x290   : > { %v12592_v51 = vsel %vm412_vm10, nan, %v2917_v54  ;;  %v3071_v45 = vsel %vm3064_vm15, %v3067_v62, %v3070_v8  ;;  %v13375_v31 = vxor.u32 2147483648, %v13374_v20  ;;  %v3525_v14 = vand.u32 3, %v13377_v0  ;;  %2762 = vst [vmem:[#allocation2 + $0x68] sm:$0xff] %v2754_v43  ;;  %v13385_v8 = vld [vmem:[#allocation37_spill] sm:$0xff]  ;;  %v13398_v43 = vld [vmem:[#allocation18_spill] sm:$0xff] }
 0x291   : > { %v13378_v22 = vxor.u32 2147483648, %v13376_v59  ;;  %vm3373_vm10 = vcmp.eq.s32.totalorder %v3371_v56, 0  ;;  %vm3376_vm14 = vcmp.eq.s32.totalorder %v3371_v56, 2  ;;  %v3679_v3 = vand.u32 3, %v13379_v39  ;;  %2763 = vst [vmem:[#allocation2 + $0x8] sm:$0xff] %v2755_v29  ;;  %v13387_v29 = vld [vmem:[#allocation23_spill] sm:$0xff] }
 0x292   : > { %v3221_v2 = vsel %vm3219_vm2, %v13376_v59, %v13375_v31  ;;  %v2716_v11 = vxor.u32 2147483648, %v2715_v10  ;;  %vm3372_vm0 = vcmp.lt.s32.totalorder %v3371_v56, 2  ;;  %v13381_v36 = vxor.u32 2147483648, %v13380_v21  ;;  %v13394_v39 = vld [vmem:[#allocation52_spill] sm:$0xff] }
 0x293   : > { %v3224_v50 = vsel %vm3222_vm13, %v13378_v22, %v13374_v20  ;;  %v13383_v57 = vxor.u32 2147483648, %v13382_v58  ;;  %v12612_v41 = vsel %vm567_vm11, nan, %v3071_v45  ;;  %vm3526_vm15 = vcmp.lt.s32.totalorder %v3525_v14, 2 }
 0x294   : > { %v3375_v54 = vsel %vm3373_vm10, %v13382_v58, %v13381_v36  ;;  %vm3527_vm2 = vcmp.eq.s32.totalorder %v3525_v14, 0  ;;  %vm3530_vm13 = vcmp.eq.s32.totalorder %v3525_v14, 2  ;;  %v2717_v62 = vsel %vm2596_vm8, %v2716_v11, %v2715_v10  ;;  %v13389_v10 = vld [vmem:[#allocation51_spill] sm:$0xff] }
 0x295   : > { %v3378_v13 = vsel %vm3376_vm14, %v13383_v57, %v13380_v21  ;;  %v3225_v63 = vsel %vm3218_vm12, %v3221_v2, %v3224_v50  ;;  %v13386_v25 = vxor.u32 2147483648, %v13385_v8  ;;  %v13388_v5 = vxor.u32 2147483648, %v13387_v29  ;;  %v13391_v2 = vld [vmem:[#allocation50_spill] sm:$0xff]  ;;  %v13395_v21 = vld [vmem:[#allocation53_spill] sm:$0xff] }
 0x296   : > { %v12626_v45 = vsel %vm12531_vm7, %v13338_v42, %v2717_v62  ;;  %v3379_v20 = vsel %vm3372_vm0, %v3375_v54, %v3378_v13  ;;  %vm3681_vm11 = vcmp.eq.s32.totalorder %v3679_v3, 0  ;;  %vm3680_vm8 = vcmp.lt.s32.totalorder %v3679_v3, 2  ;;  %v13396_v57 = vld [vmem:[#allocation17_spill] sm:$0xff] }
 0x297   : > { %v3529_v23 = vsel %vm3527_vm2, %v13387_v29, %v13386_v25  ;;  %v3532_v56 = vsel %vm3530_vm13, %v13388_v5, %v13385_v8  ;;  %v2722_v12 = vmul.f32 %v12626_v45, %v12626_v45  ;;  %v13390_v59 = vxor.u32 2147483648, %v13389_v10 }
 0x298   : > { %v3533_v31 = vsel %vm3526_vm15, %v3529_v23, %v3532_v56  ;;  %vm3684_vm12 = vcmp.eq.s32.totalorder %v3679_v3, 2  ;;  %v12635_v22 = vsel %vm722_vm5, nan, %v3225_v63  ;;  %v13393_v15 = vxor.u32 2147483648, %v13391_v2  ;;  %v13400_v63 = vld [vmem:[#allocation56_spill] sm:$0xff]  ;;  %v13401_v23 = vld [vmem:[#allocation27_spill] sm:$0xff]  ;;  %v13402_v56 = vld [vmem:[#allocation25_spill] sm:$0xff] }
 0x299   : > { %v3683_v0 = vsel %vm3681_vm11, %v13391_v2, %v13390_v59  ;;  %v3833_v11 = vand.u32 3, %v13394_v39  ;;  %v3987_v36 = vand.u32 3, %v13395_v21  ;;  %v2723_v58 = vmul.f32 -0.001358992, %v2722_v12  ;;  %v13408_v39 = vld [vmem:[#allocation54_spill] sm:$0xff] }
 0x29a   : > { %v3686_v50 = vsel %vm3684_vm12, %v13393_v15, %v13389_v10  ;;  %v2730_v54 = vmul.f32 -0.00019511016, %v2722_v12  ;;  %vm13397_vm7 = vweird.f32 %v13396_v57  ;;  %vm13399_vm10 = vweird.f32 %v13398_v43  ;;  %v13406_v15 = vld [vmem:[#allocation55_spill] sm:$0xff] }
 0x29b   : > { %v12644_v13 = vsel %vm13397_vm7, nan, %v3379_v20  ;;  %v12648_v3 = vsel %vm13399_vm10, nan, %v3533_v31  ;;  %v3687_v62 = vsel %vm3680_vm8, %v3683_v0, %v3686_v50  ;;  %vm3835_vm5 = vcmp.eq.s32.totalorder %v3833_v11, 0  ;;  %v13404_v20 = vld [vmem:[#allocation21_spill] sm:$0xff] }
 0x29c   : > { %vm3838_vm14 = vcmp.eq.s32.totalorder %v3833_v11, 2  ;;  %v4141_v8 = vand.u32 3, %v13400_v63  ;;  %v2724_v25 = vadd.f32 0.041655596, %v2723_v58  ;;  %v2731_v29 = vadd.f32 0.008332121, %v2730_v54 }
 0x29d   : > { %vm3834_vm0 = vcmp.lt.s32.totalorder %v3833_v11, 2  ;;  %v4295_v5 = vand.u32 3, %v13401_v23  ;;  %vm2744_vm15 = vcmp.eq.s32.totalorder %v12588_v28, 2  ;;  %v13403_v10 = vxor.u32 2147483648, %v13402_v56  ;;  %v13409_v58 = vld [vmem:[#allocation19_spill] sm:$0xff]  ;;  %v13414_v23 = vld [vmem:[#allocation57_spill] sm:$0xff] }
 0x29e   : > { %v13405_v31 = vxor.u32 2147483648, %v13404_v20  ;;  %vm3989_vm2 = vcmp.eq.s32.totalorder %v3987_v36, 0  ;;  %vm3992_vm13 = vcmp.eq.s32.totalorder %v3987_v36, 2  ;;  %v2725_v0 = vmul.f32 %v2724_v25, %v2722_v12 }
 0x29f   : > { %v3837_v59 = vsel %vm3835_vm5, %v13404_v20, %v13403_v10  ;;  %v2732_v14 = vmul.f32 %v2731_v29, %v2722_v12  ;;  %vm3988_vm11 = vcmp.lt.s32.totalorder %v3987_v36, 2  ;;  %v13407_v50 = vxor.u32 2147483648, %v13406_v15  ;;  %v13412_v36 = vld [vmem:[#allocation58_spill] sm:$0xff] }
 0x2a0   : > { %v3840_v2 = vsel %vm3838_vm14, %v13405_v31, %v13402_v56  ;;  %vm2741_vm8 = vcmp.eq.s32.totalorder %v12588_v28, 0  ;;  %vm13410_vm12 = vweird.f32 %v13409_v58  ;;  %v13411_v57 = vxor.u32 2147483648, %v13408_v39 }
 0x2a1   : > { %v3991_v21 = vsel %vm3989_vm2, %v13408_v39, %v13407_v50  ;;  %v12665_v54 = vsel %vm13410_vm12, nan, %v3687_v62  ;;  %vm4143_vm7 = vcmp.eq.s32.totalorder %v4141_v8, 0  ;;  %vm4146_vm10 = vcmp.eq.s32.totalorder %v4141_v8, 2 }
 0x2a2   : > { %v3994_v43 = vsel %vm3992_vm13, %v13411_v57, %v13406_v15  ;;  %v2726_v63 = vadd.f32 -0.4999988, %v2725_v0  ;;  %v2733_v25 = vadd.f32 -0.16666654, %v2732_v14  ;;  %vm2740_vm5 = vcmp.lt.s32.totalorder %v12588_v28, 2  ;;  %v13416_v14 = vld [vmem:[#allocation59_spill] sm:$0xff] }
 0x2a3   : > { %vm4142_vm14 = vcmp.lt.s32.totalorder %v4141_v8, 2  ;;  %v13413_v29 = vxor.u32 2147483648, %v13412_v36  ;;  %vm2737_vm2 = vweird.f32 %v13338_v42  ;;  %v3841_v62 = vsel %vm3834_vm0, %v3837_v59, %v3840_v2  ;;  %v13418_v8 = vld [vmem:[#allocation28_spill] sm:$0xff] }
 0x2a4   : > { %v3995_v10 = vsel %vm3988_vm11, %v3991_v21, %v3994_v43  ;;  %v13415_v20 = vxor.u32 2147483648, %v13414_v23  ;;  %vm4297_vm13 = vcmp.eq.s32.totalorder %v4295_v5, 0  ;;  %v2727_v15 = vmul.f32 %v2726_v63, %v2722_v12  ;;  %v13419_v57 = vld [vmem:[#allocation60_spill] sm:$0xff] }
 0x2a5   : > { %v4145_v56 = vsel %vm4143_vm7, %v13414_v23, %v13413_v29  ;;  %v2734_v0 = vmul.f32 %v2733_v25, %v2722_v12  ;;  %vm4296_vm12 = vcmp.lt.s32.totalorder %v4295_v5, 2  ;;  %v13417_v50 = vxor.u32 2147483648, %v13416_v14  ;;  %v13420_v21 = vld [vmem:[#allocation20_spill] sm:$0xff] }
 0x2a6   : > { %v4148_v31 = vsel %vm4146_vm10, %v13415_v20, %v13412_v36  ;;  %vm4300_vm3 = vcmp.eq.s32.totalorder %v4295_v5, 2  ;;  %v4449_v29 = vand.u32 3, %v13419_v57  ;;  %v4603_v11 = vand.u32 3, %v12279_v35 }
 0x2a7   : > { %v4299_v39 = vsel %vm4297_vm13, %v13418_v8, %v13417_v50  ;;  %v4149_v58 = vsel %vm4142_vm14, %v4145_v56, %v4148_v31  ;;  %v2728_v59 = vadd.f32 1.0, %v2727_v15  ;;  %v2735_v2 = vadd.f32 1.0, %v2734_v0 }
 0x2a8   : > { %vm13421_vm0 = vweird.f32 %v13420_v21  ;;  %v13422_v12 = vxor.u32 2147483648, %v13418_v8  ;;  %vm4451_vm11 = vcmp.eq.s32.totalorder %v4449_v29, 0  ;;  %vm4454_vm7 = vcmp.eq.s32.totalorder %v4449_v29, 2 }
 0x2a9   : > { %v12686_v43 = vsel %vm13421_vm0, nan, %v3841_v62  ;;  %v4757_v36 = vand.u32 3, %v12350_v30  ;;  %v2736_v5 = vmul.f32 %v2735_v2, %v12626_v45  ;;  %v2745_v23 = vxor.u32 2147483648, %v2728_v59 }
 0x2aa   : > { %v4302_v63 = vsel %vm4300_vm3, %v13422_v12, %v13416_v14  ;;  %v12695_v35 = vsel %vm1497_vm6, nan, %v3995_v10  ;;  %v12699_v56 = vsel %vm1652_vm9, nan, %v4149_v58  ;;  %vm4450_vm3 = vcmp.lt.s32.totalorder %v4449_v29, 2 }
 0x2ab   : > { %v4303_v25 = vsel %vm4296_vm12, %v4299_v39, %v4302_v63  ;;  %vm4605_vm10 = vcmp.eq.s32.totalorder %v4603_v11, 0  ;;  %vm4608_vm14 = vcmp.eq.s32.totalorder %v4603_v11, 2  ;;  %v2742_v20 = vxor.u32 2147483648, %v2736_v5 }
 0x2ac   : > { %v12703_v62 = vsel %vm1807_vm4, nan, %v4303_v25  ;;  %v2746_v30 = vsel %vm2744_vm15, %v2745_v23, %v2736_v5  ;;  %v13423_v45 = vxor.u32 2147483648, %v12228_v46  ;;  %v13424_v55 = vxor.u32 2147483648, %v12190_v1 }
 0x2ad   : > { %vm4604_vm6 = vcmp.lt.s32.totalorder %v4603_v11, 2  ;;  %v4607_v27 = vsel %vm4605_vm10, %v12447_v61, %v2122_v7  ;;  %v4610_v31 = vsel %vm4608_vm14, %v2125_v34, %v12453_v16  ;;  %vm4759_vm9 = vcmp.eq.s32.totalorder %v4757_v36, 0 }
 0x2ae   : > { %v4453_v6 = vsel %vm4451_vm11, %v12190_v1, %v13423_v45  ;;  %v4456_v10 = vsel %vm4454_vm7, %v13424_v55, %v12228_v46  ;;  %v2743_v15 = vsel %vm2741_vm8, %v2728_v59, %v2742_v20  ;;  %vm4758_vm4 = vcmp.lt.s32.totalorder %v4757_v36, 2 }
 0x2af   : > { %v4761_v0 = vsel %vm4759_vm9, %v12469_v38, %v2277_v52  ;;  %vm4762_vm15 = vcmp.eq.s32.totalorder %v4757_v36, 2  ;;  %v2747_v1 = vsel %vm2740_vm5, %v2743_v15, %v2746_v30  ;;  %v4457_v46 = vsel %vm4450_vm3, %v4453_v6, %v4456_v10 }
 0x2b0   : > { %v4764_v61 = vsel %vm4762_vm15, %v2280_v33, %v12472_v60  ;;  %v4911_v16 = vand.u32 3, %v12440_v17  ;;  %v2748_v7 = vsel %vm2737_vm2, nan, %v2747_v1  ;;  %v4611_v34 = vsel %vm4604_vm6, %v4607_v27, %v4610_v31 }
 0x2b1   : > { %v5065_v14 = vand.u32 3, %v12476_v48  ;;  %v5219_v52 = vand.u32 3, %v12545_v26  ;;  %v2756_v50 = vpack.c.bf16 %v2748_v7, %v12566_v19  ;;  %v4765_v28 = vsel %vm4758_vm4, %v4761_v0, %v4764_v61 }
 0x2b2   : > { %vm4912_vm8 = vcmp.lt.s32.totalorder %v4911_v16, 2  ;;  %vm4913_vm5 = vcmp.eq.s32.totalorder %v4911_v16, 0  ;;  %vm4916_vm13 = vcmp.eq.s32.totalorder %v4911_v16, 2  ;;  %v13425_v60 = vxor.u32 2147483648, %v12499_v4 }
 0x2b3   : > { %v4915_v38 = vsel %vm4913_vm5, %v12478_v18, %v2432_v47  ;;  %vm5066_vm12 = vcmp.lt.s32.totalorder %v5065_v14, 2  ;;  %vm5067_vm0 = vcmp.eq.s32.totalorder %v5065_v14, 0  ;;  %2764 = vst [vmem:[#allocation2 + $0x48] sm:$0xff] %v2756_v50  ;;  %v4918_v17 = vsel %vm4916_vm13, %v2435_v40, %v12482_v49 }
 0x2b4   : > { %v5069_v48 = vsel %vm5067_vm0, %v12496_v37, %v13425_v60  ;;  %vm5070_vm11 = vcmp.eq.s32.totalorder %v5065_v14, 2  ;;  %vm5220_vm7 = vcmp.lt.s32.totalorder %v5219_v52, 2  ;;  %v4919_v33 = vsel %vm4912_vm8, %v4915_v38, %v4918_v17 }
 0x2b5   : > { %v13426_v26 = vxor.u32 2147483648, %v12496_v37  ;;  %vm5221_vm3 = vcmp.eq.s32.totalorder %v5219_v52, 0  ;;  %vm5224_vm10 = vcmp.eq.s32.totalorder %v5219_v52, 2  ;;  %vm13427_vm14 = vweird.f32 %v13348_v24 }
 0x2b6   : > { %v4458_v47 = vsel %vm13427_vm14, nan, %v4457_v46  ;;  %v5223_v39 = vsel %vm5221_vm3, %v2728_v59, %v2742_v20  ;;  %v5226_v18 = vsel %vm5224_vm10, %v2745_v23, %v2736_v5  ;;  %vm13428_vm6 = vweird.f32 %v13303_v32 }
 0x2b7   : > { %v5072_v19 = vsel %vm5070_vm11, %v13426_v26, %v12499_v4  ;;  %v4612_v49 = vsel %vm13428_vm6, nan, %v4611_v34  ;;  %v5227_v40 = vsel %vm5220_vm7, %v5223_v39, %v5226_v18  ;;  %v5229_v58 = vpack.c.bf16 %v12612_v41, %v12592_v51 }
 0x2b8   : > { %v5073_v8 = vsel %vm5066_vm12, %v5069_v48, %v5072_v19  ;;  %v5230_v57 = vpack.c.bf16 %v12644_v13, %v12635_v22  ;;  %vm13429_vm9 = vweird.f32 %v13311_v53  ;;  %v4920_v24 = vsel %vm2427_vm1, nan, %v4919_v33 }
 0x2b9   : > { %v4766_v37 = vsel %vm13429_vm9, nan, %v4765_v28  ;;  %v5231_v4 = vpack.c.bf16 %v12665_v54, %v12648_v3  ;;  %v5232_v32 = vpack.c.bf16 %v12695_v35, %v12686_v43  ;;  %vm13430_vm4 = vweird.f32 %v13328_v44  ;;  %5237 = vst [vmem:[#allocation2 + $0x40] sm:$0xff] %v5229_v58 }
 0x2ba   : > { %v5074_v29 = vsel %vm13430_vm4, nan, %v5073_v8  ;;  %v5228_v51 = vsel %vm2737_vm2, nan, %v5227_v40  ;;  %v5233_v41 = vpack.c.bf16 %v12703_v62, %v12699_v56  ;;  %v5234_v53 = vpack.c.bf16 %v4612_v49, %v4458_v47  ;;  %5238 = vst [vmem:[#allocation2 + $0x20] sm:$0xff] %v5230_v57 }
 0x2bb   : > { %v5235_v9 = vpack.c.bf16 %v4920_v24, %v4766_v37  ;;  %5239 = vst [vmem:[#allocation2 + $0x10] sm:$0xff] %v5231_v4  ;;  %v5236_v22 = vpack.c.bf16 %v5228_v51, %v5074_v29 }
 0x2bc   : > { %5240 = vst [vmem:[#allocation2 + $0x38] sm:$0xff] %v5232_v32  ;;  %5248 = sbr.rel (%p8052_p1) target bundleno = 707 (0x2c3), region = 48 }
 0x2bd   : > { %5241 = vst [vmem:[#allocation2 + $0x60] sm:$0xff] %v5233_v41 }
 0x2be   : > { %5242 = vst [vmem:[#allocation2 + $0x70] sm:$0xff] %v5234_v53 }
 0x2bf   : > { %5243 = vst [vmem:[#allocation2 + $0x78] sm:$0xff] %v5235_v9 }
 0x2c0   : > { %5244 = vst [vmem:[#allocation2 + $0x28] sm:$0xff] %v5236_v22 }
 0x2c1   : > { %v9431_v44 = vld [vmem:[#allocation8] ss:$0 sm:$0xff] }
 0x2c2   : > { %5253 = vst [vmem:[#allocation9] sm:$0xff] %v9431_v44 }
 0x2c3 PF: > { %v9089_v42 = vld [vmem:[%s9743_s10 + $0x38] sm:$0xff]  ;;  %v9088_v11 = vld [vmem:[%s9743_s10 + $0x30] sm:$0xff]  ;;  %v9087_v43 = vld [vmem:[%s9743_s10 + $0x28] sm:$0xff]  ;;  %s9626_s15 = smov [#allocation9]   ;;  %s7859_s22 = sshll.u32 %s13058_s3, 4  ;;  %s7860_s22 = int_to_ptr.hbm [resolvable:$true] %s7859_s22 }
 0x2c4   : > { %v9097_v13 = vld [vmem:[%s9743_s10 + $0x78] sm:$0xff]  ;;  %7431 = vmatpush.bf16.msra.mxu0 %v9089_v42  ;;  %v9096_v59 = vld [vmem:[%s9743_s10 + $0x70] sm:$0xff]  ;;  %v9095_v12 = vld [vmem:[%s9743_s10 + $0x68] sm:$0xff]  ;;  %s7857_s21 = sshll.u32 %s9626_s15, 4  ;;  %p9368_p2 = scmp.eq.s32.totalorder %s9676_s18, 2  ;;  %s7858_s21 = int_to_ptr.vmem [resolvable:$true] %s7857_s21 }
 0x2c5   : > { %v9105_v3 = vld [vmem:[%s9743_s10 + $0xb8] sm:$0xff]  ;;  %7444 = vmatpush.bf16.msra.mxu1 %v9097_v13  ;;  %v9104_v2 = vld [vmem:[%s9743_s10 + $0xb0] sm:$0xff]  ;;  %v9103_v63 = vld [vmem:[%s9743_s10 + $0xa8] sm:$0xff] }
 0x2c6   : > { %v9113_v54 = vld [vmem:[%s9743_s10 + $0xf8] sm:$0xff]  ;;  %7457 = vmatpush.bf16.msra.mxu2 %v9105_v3  ;;  %v9112_v21 = vld [vmem:[%s9743_s10 + $0xf0] sm:$0xff]  ;;  %v9111_v25 = vld [vmem:[%s9743_s10 + $0xe8] sm:$0xff] }
 0x2c7   : > { %7470 = vmatpush.bf16.msra.mxu3 %v9113_v54  ;;  %v9086_v36 = vld [vmem:[%s9743_s10 + $0x20] sm:$0xff]  ;;  %v9085_v56 = vld [vmem:[%s9743_s10 + $0x18] sm:$0xff]  ;;  %v9084_v45 = vld [vmem:[%s9743_s10 + $0x10] sm:$0xff] }
 0x2c8   : > { %7432 = vmatpush.bf16.msra.mxu0 %v9088_v11  ;;  %v9094_v5 = vld [vmem:[%s9743_s10 + $0x60] sm:$0xff]  ;;  %v9093_v62 = vld [vmem:[%s9743_s10 + $0x58] sm:$0xff]  ;;  %v9092_v6 = vld [vmem:[%s9743_s10 + $0x50] sm:$0xff] }
 0x2c9   : > { %7445 = vmatpush.bf16.msra.mxu1 %v9096_v59  ;;  %v9102_v23 = vld [vmem:[%s9743_s10 + $0xa0] sm:$0xff]  ;;  %v9101_v20 = vld [vmem:[%s9743_s10 + $0x98] sm:$0xff]  ;;  %v9100_v55 = vld [vmem:[%s9743_s10 + $0x90] sm:$0xff] }
 0x2ca   : > { %7458 = vmatpush.bf16.msra.mxu2 %v9104_v2  ;;  %v9110_v35 = vld [vmem:[%s9743_s10 + $0xe0] sm:$0xff]  ;;  %v9109_v30 = vld [vmem:[%s9743_s10 + $0xd8] sm:$0xff]  ;;  %v9108_v10 = vld [vmem:[%s9743_s10 + $0xd0] sm:$0xff] }
 0x2cb   : > { %7471 = vmatpush.bf16.msra.mxu3 %v9112_v21  ;;  %v9083_v27 = vld [vmem:[%s9743_s10 + $0x8] sm:$0xff]  ;;  %v5256_v1 = vld [vmem:[#allocation2] sm:$0xff]  ;;  %v5255_v46 = vld [vmem:[#allocation2 + $0x30] sm:$0xff] }
 0x2cc   : > { %7433 = vmatpush.bf16.msra.mxu0 %v9087_v43  ;;  %v9091_v31 = vld [vmem:[%s9743_s10 + $0x48] sm:$0xff]  ;;  %v9082_v61 = vld [vmem:[%s9743_s10] sm:$0xff]  ;;  %v5801_v7 = vunpack.c.l.b16 %v5256_v1  ;;  %v5799_v34 = vunpack.c.l.b16 %v5255_v46  ;;  %v5802_v50 = vunpack.c.h.b16 %v5256_v1  ;;  %v5800_v28 = vunpack.c.h.b16 %v5255_v46  ;;  %v9121_v38 = vld [vmem:[%s9743_s10 + $0x138] sm:$0xff] }
 0x2cd   : > { %7446 = vmatpush.bf16.msra.mxu1 %v9095_v12  ;;  %v9099_v15 = vld [vmem:[%s9743_s10 + $0x88] sm:$0xff]  ;;  %v9090_v16 = vld [vmem:[%s9743_s10 + $0x40] sm:$0xff]  ;;  %v9129_v17 = vld [vmem:[%s9743_s10 + $0x178] sm:$0xff] }
 0x2ce   : > { %7459 = vmatpush.bf16.msra.mxu2 %v9103_v63  ;;  %v9107_v0 = vld [vmem:[%s9743_s10 + $0xc8] sm:$0xff]  ;;  %v9098_v14 = vld [vmem:[%s9743_s10 + $0x80] sm:$0xff]  ;;  %v9137_v60 = vld [vmem:[%s9743_s10 + $0x1b8] sm:$0xff]  ;;  %v5833_v33 = vpack.c.b16 %v5801_v7, %v5801_v7  ;;  %v5831_v26 = vpack.c.b16 %v5799_v34, %v5799_v34  ;;  %v5834_v19 = vpack.c.b16 %v5802_v50, %v5802_v50  ;;  %v5832_v47 = vpack.c.b16 %v5800_v28, %v5800_v28 }
 0x2cf   : > { %7472 = vmatpush.bf16.msra.mxu3 %v9111_v25  ;;  %v9106_v52 = vld [vmem:[%s9743_s10 + $0xc0] sm:$0xff]  ;;  %v9145_v48 = vld [vmem:[%s9743_s10 + $0x1f8] sm:$0xff]  ;;  %v9120_v8 = vld [vmem:[%s9743_s10 + $0x130] sm:$0xff] }
 0x2d0   : > { %7434 = vmatpush.bf16.msra.mxu0 %v9086_v36  ;;  %v9128_v39 = vld [vmem:[%s9743_s10 + $0x170] sm:$0xff]  ;;  %v9119_v40 = vld [vmem:[%s9743_s10 + $0x128] sm:$0xff]  ;;  %v9118_v24 = vld [vmem:[%s9743_s10 + $0x120] sm:$0xff] }
 0x2d1   : > { %7447 = vmatpush.bf16.msra.mxu1 %v9094_v5  ;;  %v9136_v18 = vld [vmem:[%s9743_s10 + $0x1b0] sm:$0xff]  ;;  %v9127_v58 = vld [vmem:[%s9743_s10 + $0x168] sm:$0xff]  ;;  %v9126_v4 = vld [vmem:[%s9743_s10 + $0x160] sm:$0xff] }
 0x2d2   : > { %7460 = vmatpush.bf16.msra.mxu2 %v9102_v23  ;;  %v9144_v49 = vld [vmem:[%s9743_s10 + $0x1f0] sm:$0xff]  ;;  %v9135_v57 = vld [vmem:[%s9743_s10 + $0x1a8] sm:$0xff]  ;;  %v9134_v32 = vld [vmem:[%s9743_s10 + $0x1a0] sm:$0xff] }
 0x2d3   : > { %7473 = vmatpush.bf16.msra.mxu3 %v9110_v35  ;;  %v9143_v37 = vld [vmem:[%s9743_s10 + $0x1e8] sm:$0xff]  ;;  %v9142_v29 = vld [vmem:[%s9743_s10 + $0x1e0] sm:$0xff]  ;;  %v9117_v51 = vld [vmem:[%s9743_s10 + $0x118] sm:$0xff] }
 0x2d4   : > { %7435 = vmatpush.bf16.msra.mxu0 %v9085_v56  ;;  %v9125_v41 = vld [vmem:[%s9743_s10 + $0x158] sm:$0xff]  ;;  %v9116_v22 = vld [vmem:[%s9743_s10 + $0x110] sm:$0xff]  ;;  %v9115_v3 = vld [vmem:[%s9743_s10 + $0x108] sm:$0xff] }
 0x2d5   : > { %7448 = vmatpush.bf16.msra.mxu1 %v9093_v62  ;;  %v9133_v53 = vld [vmem:[%s9743_s10 + $0x198] sm:$0xff]  ;;  %v9124_v44 = vld [vmem:[%s9743_s10 + $0x150] sm:$0xff]  ;;  %v9123_v54 = vld [vmem:[%s9743_s10 + $0x148] sm:$0xff] }
 0x2d6   : > { %7461 = vmatpush.bf16.msra.mxu2 %v9101_v20  ;;  %v9141_v9 = vld [vmem:[%s9743_s10 + $0x1d8] sm:$0xff]  ;;  %v9132_v42 = vld [vmem:[%s9743_s10 + $0x190] sm:$0xff]  ;;  %v9131_v11 = vld [vmem:[%s9743_s10 + $0x188] sm:$0xff] }
 0x2d7   : > { %7474 = vmatpush.bf16.msra.mxu3 %v9109_v30  ;;  %v9140_v13 = vld [vmem:[%s9743_s10 + $0x1d0] sm:$0xff]  ;;  %v9139_v59 = vld [vmem:[%s9743_s10 + $0x1c8] sm:$0xff]  ;;  %v5258_v2 = vld [vmem:[#allocation2 + $0x18] sm:$0xff] }
 0x2d8   : > { %7436 = vmatpush.bf16.msra.mxu0 %v9084_v45  ;;  %v5257_v21 = vld [vmem:[#allocation2 + $0x58] sm:$0xff]  ;;  %v9114_v43 = vld [vmem:[%s9743_s10 + $0x100] sm:$0xff]  ;;  %v5805_v63 = vunpack.c.l.b16 %v5258_v2  ;;  %v5806_v23 = vunpack.c.h.b16 %v5258_v2  ;;  %v9151_v1 = vld [vmem:[%s9743_s10 + $0x228] sm:$0xff] }
 0x2d9   : > { %7449 = vmatpush.bf16.msra.mxu1 %v9092_v6  ;;  %v9122_v12 = vld [vmem:[%s9743_s10 + $0x140] sm:$0xff]  ;;  %v5803_v25 = vunpack.c.l.b16 %v5257_v21  ;;  %v5804_v35 = vunpack.c.h.b16 %v5257_v21  ;;  %v9153_v56 = vld [vmem:[%s9743_s10 + $0x238] sm:$0xff]  ;;  %v9159_v46 = vld [vmem:[%s9743_s10 + $0x268] sm:$0xff] }
 0x2da   : > { %7462 = vmatpush.bf16.msra.mxu2 %v9100_v55  ;;  %v9130_v36 = vld [vmem:[%s9743_s10 + $0x180] sm:$0xff]  ;;  %v9161_v62 = vld [vmem:[%s9743_s10 + $0x278] sm:$0xff]  ;;  %v5837_v45 = vpack.c.b16 %v5805_v63, %v5805_v63  ;;  %v5838_v55 = vpack.c.b16 %v5806_v23, %v5806_v23  ;;  %v9183_v2 = vld [vmem:[%s9743_s10 + $0x328] sm:$0xff] }
 0x2db   : > { %7475 = vmatpush.bf16.msra.mxu3 %v9108_v10  ;;  %v9138_v5 = vld [vmem:[%s9743_s10 + $0x1c0] sm:$0xff]  ;;  %v9169_v20 = vld [vmem:[%s9743_s10 + $0x2b8] sm:$0xff]  ;;  %v5835_v6 = vpack.c.b16 %v5803_v25, %v5803_v25  ;;  %v5836_v10 = vpack.c.b16 %v5804_v35, %v5804_v35  ;;  %v9191_v21 = vld [vmem:[%s9743_s10 + $0x368] sm:$0xff] }
 0x2dc   : > { %7437 = vmatpush.bf16.msra.mxu0 %v9083_v27  ;;  %v9177_v30 = vld [vmem:[%s9743_s10 + $0x2f8] sm:$0xff]  ;;  %v9152_v27 = vld [vmem:[%s9743_s10 + $0x230] sm:$0xff]  ;;  %v9150_v7 = vld [vmem:[%s9743_s10 + $0x220] sm:$0xff] }
 0x2dd   : > { %7450 = vmatpush.bf16.msra.mxu1 %v9091_v31  ;;  %v9160_v31 = vld [vmem:[%s9743_s10 + $0x270] sm:$0xff]  ;;  %v9158_v34 = vld [vmem:[%s9743_s10 + $0x260] sm:$0xff]  ;;  %v9149_v50 = vld [vmem:[%s9743_s10 + $0x218] sm:$0xff] }
 0x2de   : > { %7463 = vmatpush.bf16.msra.mxu2 %v9099_v15  ;;  %v9168_v15 = vld [vmem:[%s9743_s10 + $0x2b0] sm:$0xff]  ;;  %v9157_v28 = vld [vmem:[%s9743_s10 + $0x258] sm:$0xff]  ;;  %v9182_v63 = vld [vmem:[%s9743_s10 + $0x320] sm:$0xff] }
 0x2df   : > { %7476 = vmatpush.bf16.msra.mxu3 %v9107_v0  ;;  %v9176_v0 = vld [vmem:[%s9743_s10 + $0x2f0] sm:$0xff]  ;;  %v9190_v25 = vld [vmem:[%s9743_s10 + $0x360] sm:$0xff]  ;;  %v9181_v23 = vld [vmem:[%s9743_s10 + $0x318] sm:$0xff] }
 0x2e0   : > { %7438 = vmatpush.bf16.msra.mxu0 %v9082_v61  ;;  %v9167_v61 = vld [vmem:[%s9743_s10 + $0x2a8] sm:$0xff]  ;;  %v9189_v35 = vld [vmem:[%s9743_s10 + $0x358] sm:$0xff] }
 0x2e1   : > { %7451 = vmatpush.bf16.msra.mxu1 %v9090_v16  ;;  %v9175_v16 = vld [vmem:[%s9743_s10 + $0x2e8] sm:$0xff] }
 0x2e2   : > { %7464 = vmatpush.bf16.msra.mxu2 %v9098_v14  ;;  %v9166_v14 = vld [vmem:[%s9743_s10 + $0x2a0] sm:$0xff] }
 0x2e3   : > { %7477 = vmatpush.bf16.msra.mxu3 %v9106_v52  ;;  %7439 = vmatmul.bf16.vlgmr.msra.gmra.mxu0 %v5831_v26  ;;  %v9174_v52 = vld [vmem:[%s9743_s10 + $0x2e0] sm:$0xff]  ;;  %v9172_v26 = vld [vmem:[%s9743_s10 + $0x2d0] sm:$0xff] }
 0x2e4   : > { %7483 = vmatpush.bf16.msrb.mxu0 %v9121_v38  ;;  %7452 = vmatmul.bf16.vlgmr.msra.gmra.mxu1 %v5832_v47  ;;  %v9165_v38 = vld [vmem:[%s9743_s10 + $0x298] sm:$0xff]  ;;  %v9155_v47 = vld [vmem:[%s9743_s10 + $0x248] sm:$0xff] }
 0x2e5   : > { %7496 = vmatpush.bf16.msrb.mxu1 %v9129_v17  ;;  %7465 = vmatmul.bf16.vlgmr.msra.gmra.mxu2 %v5833_v33  ;;  %v9173_v17 = vld [vmem:[%s9743_s10 + $0x2d8] sm:$0xff]  ;;  %v9164_v33 = vld [vmem:[%s9743_s10 + $0x290] sm:$0xff] }
 0x2e6   : > { %7509 = vmatpush.bf16.msrb.mxu2 %v9137_v60  ;;  %7478 = vmatmul.bf16.vlgmr.msra.gmra.mxu3 %v5834_v19  ;;  %v9148_v60 = vld [vmem:[%s9743_s10 + $0x210] sm:$0xff]  ;;  %v9147_v19 = vld [vmem:[%s9743_s10 + $0x208] sm:$0xff] }
 0x2e7   : > { %7522 = vmatpush.bf16.msrb.mxu3 %v9145_v48  ;;  %v9156_v48 = vld [vmem:[%s9743_s10 + $0x250] sm:$0xff] }
 0x2e8   : > { %7484 = vmatpush.bf16.msrb.mxu0 %v9120_v8  ;;  %v9163_v8 = vld [vmem:[%s9743_s10 + $0x288] sm:$0xff] }
 0x2e9   : > { %7497 = vmatpush.bf16.msrb.mxu1 %v9128_v39  ;;  %v9171_v39 = vld [vmem:[%s9743_s10 + $0x2c8] sm:$0xff] }
 0x2ea   : > { %7510 = vmatpush.bf16.msrb.mxu2 %v9136_v18  ;;  %v5259_v18 = vld [vmem:[#allocation2 + $0x50] sm:$0xff] }
 0x2eb   : > { %7523 = vmatpush.bf16.msrb.mxu3 %v9144_v49  ;;  %v5260_v49 = vld [vmem:[#allocation2 + $0x68] sm:$0xff] }
 0x2ec   : > { %7485 = vmatpush.bf16.msrb.mxu0 %v9119_v40  ;;  %v9146_v40 = vld [vmem:[%s9743_s10 + $0x200] sm:$0xff] }
 0x2ed   : > { %7498 = vmatpush.bf16.msrb.mxu1 %v9127_v58  ;;  %v9154_v58 = vld [vmem:[%s9743_s10 + $0x240] sm:$0xff] }
 0x2ee   : > { %7511 = vmatpush.bf16.msrb.mxu2 %v9135_v57  ;;  %v5807_v57 = vunpack.c.l.b16 %v5259_v18 }
 0x2ef   : > { %7524 = vmatpush.bf16.msrb.mxu3 %v9143_v37  ;;  %v5809_v37 = vunpack.c.l.b16 %v5260_v49 }
 0x2f0   : > { %7486 = vmatpush.bf16.msrb.mxu0 %v9118_v24  ;;  %v9162_v24 = vld [vmem:[%s9743_s10 + $0x280] sm:$0xff] }
 0x2f1   : > { %7499 = vmatpush.bf16.msrb.mxu1 %v9126_v4  ;;  %v9170_v4 = vld [vmem:[%s9743_s10 + $0x2c0] sm:$0xff] }
 0x2f2   : > { %7512 = vmatpush.bf16.msrb.mxu2 %v9134_v32  ;;  %v5808_v32 = vunpack.c.h.b16 %v5259_v18  ;;  %v9215_v18 = vld [vmem:[%s9743_s10 + $0x428] sm:$0xff] }
 0x2f3   : > { %7525 = vmatpush.bf16.msrb.mxu3 %v9142_v29  ;;  %v5810_v29 = vunpack.c.h.b16 %v5260_v49  ;;  %v9223_v49 = vld [vmem:[%s9743_s10 + $0x468] sm:$0xff] }
 0x2f4   : > { %7487 = vmatpush.bf16.msrb.mxu0 %v9117_v51  ;;  %v9185_v51 = vld [vmem:[%s9743_s10 + $0x338] sm:$0xff] }
 0x2f5   : > { %7500 = vmatpush.bf16.msrb.mxu1 %v9125_v41  ;;  %v9193_v41 = vld [vmem:[%s9743_s10 + $0x378] sm:$0xff] }
 0x2f6   : > { %7513 = vmatpush.bf16.msrb.mxu2 %v9133_v53  ;;  %v9201_v53 = vld [vmem:[%s9743_s10 + $0x3b8] sm:$0xff] }
 0x2f7   : > { %7526 = vmatpush.bf16.msrb.mxu3 %v9141_v9  ;;  %v9209_v9 = vld [vmem:[%s9743_s10 + $0x3f8] sm:$0xff] }
 0x2f8   : > { %7488 = vmatpush.bf16.msrb.mxu0 %v9116_v22  ;;  %v5839_v22 = vpack.c.b16 %v5807_v57, %v5807_v57  ;;  %v9214_v57 = vld [vmem:[%s9743_s10 + $0x420] sm:$0xff] }
 0x2f9   : > { %7501 = vmatpush.bf16.msrb.mxu1 %v9124_v44  ;;  %v5841_v44 = vpack.c.b16 %v5809_v37, %v5809_v37  ;;  %v9222_v37 = vld [vmem:[%s9743_s10 + $0x460] sm:$0xff] }
 0x2fa   : > { %7514 = vmatpush.bf16.msrb.mxu2 %v9132_v42  ;;  %v5840_v42 = vpack.c.b16 %v5808_v32, %v5808_v32  ;;  %v9213_v32 = vld [vmem:[%s9743_s10 + $0x418] sm:$0xff] }
 0x2fb   : > { %7527 = vmatpush.bf16.msrb.mxu3 %v9140_v13  ;;  %v5842_v13 = vpack.c.b16 %v5810_v29, %v5810_v29  ;;  %v9221_v29 = vld [vmem:[%s9743_s10 + $0x458] sm:$0xff] }
 0x2fc   : > { %7489 = vmatpush.bf16.msrb.mxu0 %v9115_v3  ;;  %v9184_v3 = vld [vmem:[%s9743_s10 + $0x330] sm:$0xff] }
 0x2fd   : > { %7502 = vmatpush.bf16.msrb.mxu1 %v9123_v54  ;;  %v9192_v54 = vld [vmem:[%s9743_s10 + $0x370] sm:$0xff] }
 0x2fe   : > { %7515 = vmatpush.bf16.msrb.mxu2 %v9131_v11  ;;  %v9200_v11 = vld [vmem:[%s9743_s10 + $0x3b0] sm:$0xff] }
 0x2ff   : > { %7528 = vmatpush.bf16.msrb.mxu3 %v9139_v59  ;;  %v9208_v59 = vld [vmem:[%s9743_s10 + $0x3f0] sm:$0xff] }
 0x300   : > { %7490 = vmatpush.bf16.msrb.mxu0 %v9114_v43  ;;  %v9199_v43 = vld [vmem:[%s9743_s10 + $0x3a8] sm:$0xff] }
 0x301   : > { %7503 = vmatpush.bf16.msrb.mxu1 %v9122_v12  ;;  %v9207_v12 = vld [vmem:[%s9743_s10 + $0x3e8] sm:$0xff] }
 0x302   : > { %7516 = vmatpush.bf16.msrb.mxu2 %v9130_v36  ;;  %v9198_v36 = vld [vmem:[%s9743_s10 + $0x3a0] sm:$0xff] }
 0x303   : > { %7529 = vmatpush.bf16.msrb.mxu3 %v9138_v5  ;;  %7491 = vmatmul.bf16.vlgmr.msrb.gmra.mxu0 %v5835_v6  ;;  %v9206_v5 = vld [vmem:[%s9743_s10 + $0x3e0] sm:$0xff]  ;;  %v9204_v6 = vld [vmem:[%s9743_s10 + $0x3d0] sm:$0xff] }
 0x304   : > { %7535 = vmatpush.bf16.msra.mxu0 %v9153_v56  ;;  %7504 = vmatmul.bf16.vlgmr.msrb.gmra.mxu1 %v5836_v10  ;;  %v9197_v56 = vld [vmem:[%s9743_s10 + $0x398] sm:$0xff]  ;;  %v9187_v10 = vld [vmem:[%s9743_s10 + $0x348] sm:$0xff] }
 0x305   : > { %7548 = vmatpush.bf16.msra.mxu1 %v9161_v62  ;;  %7517 = vmatmul.bf16.vlgmr.msrb.gmra.mxu2 %v5837_v45  ;;  %v9205_v62 = vld [vmem:[%s9743_s10 + $0x3d8] sm:$0xff]  ;;  %v9196_v45 = vld [vmem:[%s9743_s10 + $0x390] sm:$0xff] }
 0x306   : > { %7561 = vmatpush.bf16.msra.mxu2 %v9169_v20  ;;  %7530 = vmatmul.bf16.vlgmr.msrb.gmra.mxu3 %v5838_v55  ;;  %v9180_v20 = vld [vmem:[%s9743_s10 + $0x310] sm:$0xff]  ;;  %v9179_v55 = vld [vmem:[%s9743_s10 + $0x308] sm:$0xff] }
 0x307   : > { %7574 = vmatpush.bf16.msra.mxu3 %v9177_v30  ;;  %v9188_v30 = vld [vmem:[%s9743_s10 + $0x350] sm:$0xff] }
 0x308   : > { %7536 = vmatpush.bf16.msra.mxu0 %v9152_v27  ;;  %v9195_v27 = vld [vmem:[%s9743_s10 + $0x388] sm:$0xff] }
 0x309   : > { %7549 = vmatpush.bf16.msra.mxu1 %v9160_v31  ;;  %v9203_v31 = vld [vmem:[%s9743_s10 + $0x3c8] sm:$0xff] }
 0x30a   : > { %7562 = vmatpush.bf16.msra.mxu2 %v9168_v15  ;;  %v5261_v15 = vld [vmem:[#allocation2 + $0x8] sm:$0xff] }
 0x30b   : > { %7575 = vmatpush.bf16.msra.mxu3 %v9176_v0  ;;  %v5262_v0 = vld [vmem:[#allocation2 + $0x48] sm:$0xff] }
 0x30c   : > { %7537 = vmatpush.bf16.msra.mxu0 %v9151_v1  ;;  %v9178_v1 = vld [vmem:[%s9743_s10 + $0x300] sm:$0xff] }
 0x30d   : > { %7550 = vmatpush.bf16.msra.mxu1 %v9159_v46  ;;  %v9186_v46 = vld [vmem:[%s9743_s10 + $0x340] sm:$0xff] }
 0x30e   : > { %7563 = vmatpush.bf16.msra.mxu2 %v9167_v61  ;;  %v5811_v61 = vunpack.c.l.b16 %v5261_v15 }
 0x30f   : > { %7576 = vmatpush.bf16.msra.mxu3 %v9175_v16  ;;  %v5813_v16 = vunpack.c.l.b16 %v5262_v0 }
 0x310   : > { %7538 = vmatpush.bf16.msra.mxu0 %v9150_v7  ;;  %v9194_v7 = vld [vmem:[%s9743_s10 + $0x380] sm:$0xff] }
 0x311   : > { %7551 = vmatpush.bf16.msra.mxu1 %v9158_v34  ;;  %v9202_v34 = vld [vmem:[%s9743_s10 + $0x3c0] sm:$0xff] }
 0x312   : > { %7564 = vmatpush.bf16.msra.mxu2 %v9166_v14  ;;  %v5812_v14 = vunpack.c.h.b16 %v5261_v15  ;;  %v9247_v15 = vld [vmem:[%s9743_s10 + $0x528] sm:$0xff] }
 0x313   : > { %7577 = vmatpush.bf16.msra.mxu3 %v9174_v52  ;;  %v5814_v52 = vunpack.c.h.b16 %v5262_v0  ;;  %v9255_v0 = vld [vmem:[%s9743_s10 + $0x568] sm:$0xff] }
 0x314   : > { %7539 = vmatpush.bf16.msra.mxu0 %v9149_v50  ;;  %v9217_v50 = vld [vmem:[%s9743_s10 + $0x438] sm:$0xff] }
 0x315   : > { %7552 = vmatpush.bf16.msra.mxu1 %v9157_v28  ;;  %v9225_v28 = vld [vmem:[%s9743_s10 + $0x478] sm:$0xff] }
 0x316   : > { %7565 = vmatpush.bf16.msra.mxu2 %v9165_v38  ;;  %v9233_v38 = vld [vmem:[%s9743_s10 + $0x4b8] sm:$0xff] }
 0x317   : > { %7578 = vmatpush.bf16.msra.mxu3 %v9173_v17  ;;  %v9241_v17 = vld [vmem:[%s9743_s10 + $0x4f8] sm:$0xff] }
 0x318   : > { %7540 = vmatpush.bf16.msra.mxu0 %v9148_v60  ;;  %v5843_v60 = vpack.c.b16 %v5811_v61, %v5811_v61 }
 0x319   : > { %7553 = vmatpush.bf16.msra.mxu1 %v9156_v48  ;;  %v5845_v48 = vpack.c.b16 %v5813_v16, %v5813_v16  ;;  %v9246_v16 = vld [vmem:[%s9743_s10 + $0x520] sm:$0xff] }
 0x31a   : > { %7566 = vmatpush.bf16.msra.mxu2 %v9164_v33  ;;  %v5844_v33 = vpack.c.b16 %v5812_v14, %v5812_v14  ;;  %v9262_v14 = vld [vmem:[%s9743_s10 + $0x5a0] sm:$0xff] }
 0x31b   : > { %7579 = vmatpush.bf16.msra.mxu3 %v9172_v26  ;;  %v5846_v26 = vpack.c.b16 %v5814_v52, %v5814_v52  ;;  %v9270_v52 = vld [vmem:[%s9743_s10 + $0x5e0] sm:$0xff] }
 0x31c   : > { %7541 = vmatpush.bf16.msra.mxu0 %v9147_v19  ;;  %v9216_v19 = vld [vmem:[%s9743_s10 + $0x430] sm:$0xff] }
 0x31d   : > { %7554 = vmatpush.bf16.msra.mxu1 %v9155_v47  ;;  %v9224_v47 = vld [vmem:[%s9743_s10 + $0x470] sm:$0xff] }
 0x31e   : > { %7567 = vmatpush.bf16.msra.mxu2 %v9163_v8  ;;  %v9232_v8 = vld [vmem:[%s9743_s10 + $0x4b0] sm:$0xff] }
 0x31f   : > { %7580 = vmatpush.bf16.msra.mxu3 %v9171_v39  ;;  %v9240_v39 = vld [vmem:[%s9743_s10 + $0x4f0] sm:$0xff] }
 0x320   : > { %7542 = vmatpush.bf16.msra.mxu0 %v9146_v40  ;;  %v9231_v40 = vld [vmem:[%s9743_s10 + $0x4a8] sm:$0xff] }
 0x321   : > { %7555 = vmatpush.bf16.msra.mxu1 %v9154_v58  ;;  %v9239_v58 = vld [vmem:[%s9743_s10 + $0x4e8] sm:$0xff] }
 0x322   : > { %7568 = vmatpush.bf16.msra.mxu2 %v9162_v24  ;;  %v9230_v24 = vld [vmem:[%s9743_s10 + $0x4a0] sm:$0xff] }
 0x323   : > { %7581 = vmatpush.bf16.msra.mxu3 %v9170_v4  ;;  %7543 = vmatmul.bf16.vlgmr.msra.gmra.mxu0 %v5839_v22  ;;  %v9238_v4 = vld [vmem:[%s9743_s10 + $0x4e0] sm:$0xff]  ;;  %v9228_v22 = vld [vmem:[%s9743_s10 + $0x490] sm:$0xff] }
 0x324   : > { %7587 = vmatpush.bf16.msrb.mxu0 %v9185_v51  ;;  %7556 = vmatmul.bf16.vlgmr.msra.gmra.mxu1 %v5840_v42  ;;  %v9229_v51 = vld [vmem:[%s9743_s10 + $0x498] sm:$0xff]  ;;  %v9211_v42 = vld [vmem:[%s9743_s10 + $0x408] sm:$0xff] }
 0x325   : > { %7600 = vmatpush.bf16.msrb.mxu1 %v9193_v41  ;;  %7569 = vmatmul.bf16.vlgmr.msra.gmra.mxu2 %v5841_v44  ;;  %v9237_v41 = vld [vmem:[%s9743_s10 + $0x4d8] sm:$0xff]  ;;  %v9236_v44 = vld [vmem:[%s9743_s10 + $0x4d0] sm:$0xff] }
 0x326   : > { %7613 = vmatpush.bf16.msrb.mxu2 %v9201_v53  ;;  %7582 = vmatmul.bf16.vlgmr.msra.gmra.mxu3 %v5842_v13  ;;  %v9212_v53 = vld [vmem:[%s9743_s10 + $0x410] sm:$0xff]  ;;  %v9219_v13 = vld [vmem:[%s9743_s10 + $0x448] sm:$0xff] }
 0x327   : > { %7626 = vmatpush.bf16.msrb.mxu3 %v9209_v9  ;;  %v9220_v9 = vld [vmem:[%s9743_s10 + $0x450] sm:$0xff] }
 0x328   : > { %7588 = vmatpush.bf16.msrb.mxu0 %v9184_v3  ;;  %v9227_v3 = vld [vmem:[%s9743_s10 + $0x488] sm:$0xff] }
 0x329   : > { %7601 = vmatpush.bf16.msrb.mxu1 %v9192_v54  ;;  %v9235_v54 = vld [vmem:[%s9743_s10 + $0x4c8] sm:$0xff] }
 0x32a   : > { %7614 = vmatpush.bf16.msrb.mxu2 %v9200_v11  ;;  %v5263_v11 = vld [vmem:[#allocation2 + $0x40] sm:$0xff] }
 0x32b   : > { %7627 = vmatpush.bf16.msrb.mxu3 %v9208_v59  ;;  %v5264_v59 = vld [vmem:[#allocation2 + $0x20] sm:$0xff] }
 0x32c   : > { %7589 = vmatpush.bf16.msrb.mxu0 %v9183_v2  ;;  %v9210_v2 = vld [vmem:[%s9743_s10 + $0x400] sm:$0xff] }
 0x32d   : > { %7602 = vmatpush.bf16.msrb.mxu1 %v9191_v21  ;;  %v9218_v21 = vld [vmem:[%s9743_s10 + $0x440] sm:$0xff] }
 0x32e   : > { %7615 = vmatpush.bf16.msrb.mxu2 %v9199_v43  ;;  %v5815_v43 = vunpack.c.l.b16 %v5263_v11 }
 0x32f   : > { %7628 = vmatpush.bf16.msrb.mxu3 %v9207_v12  ;;  %v5817_v12 = vunpack.c.l.b16 %v5264_v59 }
 0x330   : > { %7590 = vmatpush.bf16.msrb.mxu0 %v9182_v63  ;;  %v9226_v63 = vld [vmem:[%s9743_s10 + $0x480] sm:$0xff] }
 0x331   : > { %7603 = vmatpush.bf16.msrb.mxu1 %v9190_v25  ;;  %v9234_v25 = vld [vmem:[%s9743_s10 + $0x4c0] sm:$0xff] }
 0x332   : > { %7616 = vmatpush.bf16.msrb.mxu2 %v9198_v36  ;;  %v5816_v36 = vunpack.c.h.b16 %v5263_v11  ;;  %v9289_v11 = vld [vmem:[%s9743_s10 + $0x678] sm:$0xff] }
 0x333   : > { %7629 = vmatpush.bf16.msrb.mxu3 %v9206_v5  ;;  %v5818_v5 = vunpack.c.h.b16 %v5264_v59  ;;  %v9297_v59 = vld [vmem:[%s9743_s10 + $0x6b8] sm:$0xff] }
 0x334   : > { %7591 = vmatpush.bf16.msrb.mxu0 %v9181_v23  ;;  %v9249_v23 = vld [vmem:[%s9743_s10 + $0x538] sm:$0xff] }
 0x335   : > { %7604 = vmatpush.bf16.msrb.mxu1 %v9189_v35  ;;  %v9257_v35 = vld [vmem:[%s9743_s10 + $0x578] sm:$0xff] }
 0x336   : > { %7617 = vmatpush.bf16.msrb.mxu2 %v9197_v56  ;;  %v9265_v56 = vld [vmem:[%s9743_s10 + $0x5b8] sm:$0xff] }
 0x337   : > { %7630 = vmatpush.bf16.msrb.mxu3 %v9205_v62  ;;  %v9273_v62 = vld [vmem:[%s9743_s10 + $0x5f8] sm:$0xff] }
 0x338   : > { %7592 = vmatpush.bf16.msrb.mxu0 %v9180_v20  ;;  %v5847_v20 = vpack.c.b16 %v5815_v43, %v5815_v43 }
 0x339   : > { %7605 = vmatpush.bf16.msrb.mxu1 %v9188_v30  ;;  %v5849_v30 = vpack.c.b16 %v5817_v12, %v5817_v12 }
 0x33a   : > { %7618 = vmatpush.bf16.msrb.mxu2 %v9196_v45  ;;  %v5848_v45 = vpack.c.b16 %v5816_v36, %v5816_v36  ;;  %v9288_v36 = vld [vmem:[%s9743_s10 + $0x670] sm:$0xff] }
 0x33b   : > { %7631 = vmatpush.bf16.msrb.mxu3 %v9204_v6  ;;  %v5850_v6 = vpack.c.b16 %v5818_v5, %v5818_v5  ;;  %v9296_v5 = vld [vmem:[%s9743_s10 + $0x6b0] sm:$0xff] }
 0x33c   : > { %7593 = vmatpush.bf16.msrb.mxu0 %v9179_v55  ;;  %v9248_v55 = vld [vmem:[%s9743_s10 + $0x530] sm:$0xff] }
 0x33d   : > { %7606 = vmatpush.bf16.msrb.mxu1 %v9187_v10  ;;  %v9256_v10 = vld [vmem:[%s9743_s10 + $0x570] sm:$0xff] }
 0x33e   : > { %7619 = vmatpush.bf16.msrb.mxu2 %v9195_v27  ;;  %v9264_v27 = vld [vmem:[%s9743_s10 + $0x5b0] sm:$0xff] }
 0x33f   : > { %7632 = vmatpush.bf16.msrb.mxu3 %v9203_v31  ;;  %v9272_v31 = vld [vmem:[%s9743_s10 + $0x5f0] sm:$0xff] }
 0x340   : > { %7594 = vmatpush.bf16.msrb.mxu0 %v9178_v1  ;;  %v9263_v1 = vld [vmem:[%s9743_s10 + $0x5a8] sm:$0xff] }
 0x341   : > { %7607 = vmatpush.bf16.msrb.mxu1 %v9186_v46  ;;  %v9271_v46 = vld [vmem:[%s9743_s10 + $0x5e8] sm:$0xff] }
 0x342   : > { %7620 = vmatpush.bf16.msrb.mxu2 %v9194_v7  ;;  %v9254_v7 = vld [vmem:[%s9743_s10 + $0x560] sm:$0xff] }
 0x343   : > { %7633 = vmatpush.bf16.msrb.mxu3 %v9202_v34  ;;  %7595 = vmatmul.bf16.vlgmr.msrb.gmra.mxu0 %v5843_v60  ;;  %v9269_v60 = vld [vmem:[%s9743_s10 + $0x5d8] sm:$0xff] }
 0x344   : > { %7639 = vmatpush.bf16.msra.mxu0 %v9217_v50  ;;  %7608 = vmatmul.bf16.vlgmr.msrb.gmra.mxu1 %v5844_v33 }
 0x345   : > { %7652 = vmatpush.bf16.msra.mxu1 %v9225_v28  ;;  %7621 = vmatmul.bf16.vlgmr.msrb.gmra.mxu2 %v5845_v48  ;;  %v9245_v28 = vld [vmem:[%s9743_s10 + $0x518] sm:$0xff] }
 0x346   : > { %7665 = vmatpush.bf16.msra.mxu2 %v9233_v38  ;;  %7634 = vmatmul.bf16.vlgmr.msrb.gmra.mxu3 %v5846_v26  ;;  %v9253_v38 = vld [vmem:[%s9743_s10 + $0x558] sm:$0xff] }
 0x347   : > { %7678 = vmatpush.bf16.msra.mxu3 %v9241_v17  ;;  %v9261_v17 = vld [vmem:[%s9743_s10 + $0x598] sm:$0xff] }
 0x348   : > { %7640 = vmatpush.bf16.msra.mxu0 %v9216_v19 }
 0x349   : > { %7653 = vmatpush.bf16.msra.mxu1 %v9224_v47  ;;  %v9244_v47 = vld [vmem:[%s9743_s10 + $0x510] sm:$0xff] }
 0x34a   : > { %7666 = vmatpush.bf16.msra.mxu2 %v9232_v8  ;;  %v9252_v8 = vld [vmem:[%s9743_s10 + $0x550] sm:$0xff] }
 0x34b   : > { %7679 = vmatpush.bf16.msra.mxu3 %v9240_v39 }
 0x34c   : > { %7641 = vmatpush.bf16.msra.mxu0 %v9215_v18 }
 0x34d   : > { %7654 = vmatpush.bf16.msra.mxu1 %v9223_v49  ;;  %v9260_v49 = vld [vmem:[%s9743_s10 + $0x590] sm:$0xff] }
 0x34e   : > { %7667 = vmatpush.bf16.msra.mxu2 %v9231_v40  ;;  %v9268_v40 = vld [vmem:[%s9743_s10 + $0x5d0] sm:$0xff] }
 0x34f   : > { %7680 = vmatpush.bf16.msra.mxu3 %v9239_v58  ;;  %v9243_v58 = vld [vmem:[%s9743_s10 + $0x508] sm:$0xff] }
 0x350   : > { %7642 = vmatpush.bf16.msra.mxu0 %v9214_v57  ;;  %v9251_v57 = vld [vmem:[%s9743_s10 + $0x548] sm:$0xff] }
 0x351   : > { %7655 = vmatpush.bf16.msra.mxu1 %v9222_v37  ;;  %v9259_v37 = vld [vmem:[%s9743_s10 + $0x588] sm:$0xff] }
 0x352   : > { %7668 = vmatpush.bf16.msra.mxu2 %v9230_v24  ;;  %v9267_v24 = vld [vmem:[%s9743_s10 + $0x5c8] sm:$0xff] }
 0x353   : > { %7681 = vmatpush.bf16.msra.mxu3 %v9238_v4  ;;  %v5265_v4 = vld [vmem:[#allocation2 + $0x10] sm:$0xff] }
 0x354   : > { %7643 = vmatpush.bf16.msra.mxu0 %v9213_v32  ;;  %v5266_v32 = vld [vmem:[#allocation2 + $0x38] sm:$0xff] }
 0x355   : > { %7656 = vmatpush.bf16.msra.mxu1 %v9221_v29 }
 0x356   : > { %7669 = vmatpush.bf16.msra.mxu2 %v9229_v51 }
 0x357   : > { %7682 = vmatpush.bf16.msra.mxu3 %v9237_v41  ;;  %v9242_v41 = vld [vmem:[%s9743_s10 + $0x500] sm:$0xff] }
 0x358   : > { %7644 = vmatpush.bf16.msra.mxu0 %v9212_v53  ;;  %v9250_v53 = vld [vmem:[%s9743_s10 + $0x540] sm:$0xff] }
 0x359   : > { %7657 = vmatpush.bf16.msra.mxu1 %v9220_v9  ;;  %v5819_v9 = vunpack.c.l.b16 %v5265_v4 }
 0x35a   : > { %7670 = vmatpush.bf16.msra.mxu2 %v9228_v22  ;;  %v5821_v22 = vunpack.c.l.b16 %v5266_v32 }
 0x35b   : > { %7683 = vmatpush.bf16.msra.mxu3 %v9236_v44  ;;  %v9258_v44 = vld [vmem:[%s9743_s10 + $0x580] sm:$0xff] }
 0x35c   : > { %7645 = vmatpush.bf16.msra.mxu0 %v9211_v42  ;;  %v9266_v42 = vld [vmem:[%s9743_s10 + $0x5c0] sm:$0xff]  ;;  %v5853_v43 = vpack.c.b16 %v5821_v22, %v5821_v22 }
 0x35d   : > { %7658 = vmatpush.bf16.msra.mxu1 %v9219_v13  ;;  %v5820_v13 = vunpack.c.h.b16 %v5265_v4 }
 0x35e   : > { %7671 = vmatpush.bf16.msra.mxu2 %v9227_v3  ;;  %v5822_v3 = vunpack.c.h.b16 %v5266_v32 }
 0x35f   : > { %7684 = vmatpush.bf16.msra.mxu3 %v9235_v54  ;;  %v9281_v54 = vld [vmem:[%s9743_s10 + $0x638] sm:$0xff]  ;;  %v5852_v12 = vpack.c.b16 %v5820_v13, %v5820_v13  ;;  %v9312_v13 = vld [vmem:[%s9743_s10 + $0x730] sm:$0xff] }
 0x360   : > { %7646 = vmatpush.bf16.msra.mxu0 %v9210_v2  ;;  %v7440_v61 = vpop.f32.mrf.mxu0  ;;  %v9305_v2 = vld [vmem:[%s9743_s10 + $0x6f8] sm:$0xff] }
 0x361   : > { %7659 = vmatpush.bf16.msra.mxu1 %v9218_v21  ;;  %v7453_v34 = vpop.f32.mrf.mxu1  ;;  %v5851_v21 = vpack.c.b16 %v5819_v9, %v5819_v9 }
 0x362   : > { %7672 = vmatpush.bf16.msra.mxu2 %v9226_v63  ;;  %v7454_v50 = vadd.f32 %v7453_v34, %v7440_v61  ;;  %v5854_v63 = vpack.c.b16 %v5822_v3, %v5822_v3  ;;  %v9301_v61 = vld [vmem:[%s9743_s10 + $0x6d8] sm:$0xff]  ;;  %v9320_v3 = vld [vmem:[%s9743_s10 + $0x770] sm:$0xff] }
 0x363   : > { %7685 = vmatpush.bf16.msra.mxu3 %v9234_v25  ;;  %7647 = vmatmul.bf16.vlgmr.msra.gmra.mxu0 %v5847_v20  ;;  %v9280_v25 = vld [vmem:[%s9743_s10 + $0x630] sm:$0xff]  ;;  %v9303_v20 = vld [vmem:[%s9743_s10 + $0x6e8] sm:$0xff] }
 0x364   : > { %7691 = vmatpush.bf16.msrb.mxu0 %v9249_v23  ;;  %7660 = vmatmul.bf16.vlgmr.msra.gmra.mxu1 %v5848_v45  ;;  %v9304_v23 = vld [vmem:[%s9743_s10 + $0x6f0] sm:$0xff]  ;;  %v9278_v45 = vld [vmem:[%s9743_s10 + $0x620] sm:$0xff] }
 0x365   : > { %7704 = vmatpush.bf16.msrb.mxu1 %v9257_v35  ;;  %7673 = vmatmul.bf16.vlgmr.msra.gmra.mxu2 %v5849_v30  ;;  %v9279_v35 = vld [vmem:[%s9743_s10 + $0x628] sm:$0xff] }
 0x366   : > { %7717 = vmatpush.bf16.msrb.mxu2 %v9265_v56  ;;  %7686 = vmatmul.bf16.vlgmr.msra.gmra.mxu3 %v5850_v6  ;;  %v9287_v56 = vld [vmem:[%s9743_s10 + $0x668] sm:$0xff]  ;;  %v9286_v6 = vld [vmem:[%s9743_s10 + $0x660] sm:$0xff] }
 0x367   : > { %7730 = vmatpush.bf16.msrb.mxu3 %v9273_v62  ;;  %v9295_v62 = vld [vmem:[%s9743_s10 + $0x6a8] sm:$0xff] }
 0x368   : > { %7692 = vmatpush.bf16.msrb.mxu0 %v9248_v55  ;;  %v7466_v48 = vpop.f32.mrf.mxu2  ;;  %v7442_v19 = vpop.f32.mrf.mxu0 }
 0x369   : > { %7705 = vmatpush.bf16.msrb.mxu1 %v9256_v10  ;;  %v7467_v33 = vadd.f32 %v7466_v48, %v7454_v50  ;;  %v7479_v26 = vpop.f32.mrf.mxu3  ;;  %v7455_v18 = vpop.f32.mrf.mxu1  ;;  %v9284_v50 = vld [vmem:[%s9743_s10 + $0x650] sm:$0xff]  ;;  %v9275_v48 = vld [vmem:[%s9743_s10 + $0x608] sm:$0xff] }
 0x36a   : > { %7718 = vmatpush.bf16.msrb.mxu2 %v9264_v27  ;;  %v9294_v27 = vld [vmem:[%s9743_s10 + $0x6a0] sm:$0xff]  ;;  %v9299_v19 = vld [vmem:[%s9743_s10 + $0x6c8] sm:$0xff] }
 0x36b   : > { %7731 = vmatpush.bf16.msrb.mxu3 %v9272_v31  ;;  %v12953_v39 = vadd.f32 %v7479_v26, %v7467_v33  ;;  %v9302_v31 = vld [vmem:[%s9743_s10 + $0x6e0] sm:$0xff]  ;;  %v9283_v33 = vld [vmem:[%s9743_s10 + $0x648] sm:$0xff] }
 0x36c   : > { %7693 = vmatpush.bf16.msrb.mxu0 %v9247_v15  ;;  %v9291_v26 = vld [vmem:[%s9743_s10 + $0x688] sm:$0xff] }
 0x36d   : > { %7706 = vmatpush.bf16.msrb.mxu1 %v9255_v0  ;;  %v9277_v0 = vld [vmem:[%s9743_s10 + $0x618] sm:$0xff] }
 0x36e   : > { %7719 = vmatpush.bf16.msrb.mxu2 %v9263_v1  ;;  %v9285_v1 = vld [vmem:[%s9743_s10 + $0x658] sm:$0xff] }
 0x36f   : > { %7732 = vmatpush.bf16.msrb.mxu3 %v9271_v46  ;;  %v9293_v46 = vld [vmem:[%s9743_s10 + $0x698] sm:$0xff] }
 0x370   : > { %7694 = vmatpush.bf16.msrb.mxu0 %v9246_v16  ;;  %v7468_v29 = vpop.f32.mrf.mxu2 }
 0x371   : > { %7707 = vmatpush.bf16.msrb.mxu1 %v9254_v7  ;;  %v7481_v51 = vpop.f32.mrf.mxu3  ;;  %v9313_v29 = vld [vmem:[%s9743_s10 + $0x738] sm:$0xff] }
 0x372   : > { %7720 = vmatpush.bf16.msrb.mxu2 %v9262_v14  ;;  %v9321_v51 = vld [vmem:[%s9743_s10 + $0x778] sm:$0xff] }
 0x373   : > { %7733 = vmatpush.bf16.msrb.mxu3 %v9270_v52  ;;  %v9276_v52 = vld [vmem:[%s9743_s10 + $0x610] sm:$0xff] }
 0x374   : > { %7695 = vmatpush.bf16.msrb.mxu0 %v9245_v28 }
 0x375   : > { %7708 = vmatpush.bf16.msrb.mxu1 %v9253_v38 }
 0x376   : > { %7721 = vmatpush.bf16.msrb.mxu2 %v9261_v17  ;;  %v9292_v17 = vld [vmem:[%s9743_s10 + $0x690] sm:$0xff] }
 0x377   : > { %7734 = vmatpush.bf16.msrb.mxu3 %v9269_v60  ;;  %v9300_v60 = vld [vmem:[%s9743_s10 + $0x6d0] sm:$0xff] }
 0x378   : > { %7696 = vmatpush.bf16.msrb.mxu0 %v9244_v47  ;;  %v5267_v47 = vld [vmem:[#allocation2 + $0x60] sm:$0xff] }
 0x379   : > { %7709 = vmatpush.bf16.msrb.mxu1 %v9252_v8  ;;  %v5268_v8 = vld [vmem:[#allocation2 + $0x70] sm:$0xff]  ;;  %v5824_v4 = vunpack.c.h.b16 %v5267_v47 }
 0x37a   : > { %7722 = vmatpush.bf16.msrb.mxu2 %v9260_v49  ;;  %v9274_v49 = vld [vmem:[%s9743_s10 + $0x600] sm:$0xff]  ;;  %v5826_v32 = vunpack.c.h.b16 %v5268_v8 }
 0x37b   : > { %7735 = vmatpush.bf16.msrb.mxu3 %v9268_v40  ;;  %v9282_v40 = vld [vmem:[%s9743_s10 + $0x640] sm:$0xff] }
 0x37c   : > { %7697 = vmatpush.bf16.msrb.mxu0 %v9243_v58  ;;  %v5823_v58 = vunpack.c.l.b16 %v5267_v47  ;;  %v9322_v47 = vld [vmem:[%s9743_s10 + $0x780] sm:$0xff] }
 0x37d   : > { %7710 = vmatpush.bf16.msrb.mxu1 %v9251_v57  ;;  %v5825_v57 = vunpack.c.l.b16 %v5268_v8  ;;  %v9330_v8 = vld [vmem:[%s9743_s10 + $0x7c0] sm:$0xff] }
 0x37e   : > { %7723 = vmatpush.bf16.msrb.mxu2 %v9259_v37  ;;  %v9290_v37 = vld [vmem:[%s9743_s10 + $0x680] sm:$0xff]  ;;  %v5855_v9 = vpack.c.b16 %v5823_v58, %v5823_v58 }
 0x37f   : > { %7736 = vmatpush.bf16.msrb.mxu3 %v9267_v24  ;;  %v9298_v24 = vld [vmem:[%s9743_s10 + $0x6c0] sm:$0xff]  ;;  %v5857_v22 = vpack.c.b16 %v5825_v57, %v5825_v57 }
 0x380   : > { %7698 = vmatpush.bf16.msrb.mxu0 %v9242_v41  ;;  %v7492_v30 = vpop.f32.mrf.mxu0  ;;  %v9329_v41 = vld [vmem:[%s9743_s10 + $0x7b8] sm:$0xff] }
 0x381   : > { %7711 = vmatpush.bf16.msrb.mxu1 %v9250_v53  ;;  %v7493_v55 = vadd.f32 %v7492_v30, %v12953_v39  ;;  %v7505_v10 = vpop.f32.mrf.mxu1  ;;  %v9337_v53 = vld [vmem:[%s9743_s10 + $0x7f8] sm:$0xff] }
 0x382   : > { %7724 = vmatpush.bf16.msrb.mxu2 %v9258_v44  ;;  %v5856_v44 = vpack.c.b16 %v5824_v4, %v5824_v4  ;;  %v9325_v30 = vld [vmem:[%s9743_s10 + $0x798] sm:$0xff] }
 0x383   : > { %7737 = vmatpush.bf16.msrb.mxu3 %v9266_v42  ;;  %7699 = vmatmul.bf16.vlgmr.msrb.gmra.mxu0 %v5851_v21  ;;  %v7506_v15 = vadd.f32 %v7505_v10, %v7493_v55  ;;  %v5858_v42 = vpack.c.b16 %v5826_v32, %v5826_v32  ;;  %v9327_v21 = vld [vmem:[%s9743_s10 + $0x7a8] sm:$0xff] }
 0x384   : > { %7743 = vmatpush.bf16.msra.mxu0 %v9281_v54  ;;  %7712 = vmatmul.bf16.vlgmr.msrb.gmra.mxu1 %v5852_v12  ;;  %v9328_v54 = vld [vmem:[%s9743_s10 + $0x7b0] sm:$0xff] }
 0x385   : > { %7756 = vmatpush.bf16.msra.mxu1 %v9289_v11  ;;  %7725 = vmatmul.bf16.vlgmr.msrb.gmra.mxu2 %v5853_v43  ;;  %v9336_v11 = vld [vmem:[%s9743_s10 + $0x7f0] sm:$0xff]  ;;  %v9335_v43 = vld [vmem:[%s9743_s10 + $0x7e8] sm:$0xff] }
 0x386   : > { %7769 = vmatpush.bf16.msra.mxu2 %v9297_v59  ;;  %7738 = vmatmul.bf16.vlgmr.msrb.gmra.mxu3 %v5854_v63  ;;  %v9311_v59 = vld [vmem:[%s9743_s10 + $0x728] sm:$0xff] }
 0x387   : > { %7782 = vmatpush.bf16.msra.mxu3 %v9305_v2  ;;  %v9319_v2 = vld [vmem:[%s9743_s10 + $0x768] sm:$0xff] }
 0x388   : > { %7744 = vmatpush.bf16.msra.mxu0 %v9280_v25  ;;  %v7518_v16 = vpop.f32.mrf.mxu2  ;;  %v7494_v14 = vpop.f32.mrf.mxu0  ;;  %v9310_v25 = vld [vmem:[%s9743_s10 + $0x720] sm:$0xff] }
 0x389   : > { %7757 = vmatpush.bf16.msra.mxu1 %v9288_v36  ;;  %v7519_v7 = vadd.f32 %v7518_v16, %v7506_v15  ;;  %v7531_v34 = vpop.f32.mrf.mxu3  ;;  %v7507_v38 = vpop.f32.mrf.mxu1  ;;  %v9318_v36 = vld [vmem:[%s9743_s10 + $0x760] sm:$0xff]  ;;  %v9308_v15 = vld [vmem:[%s9743_s10 + $0x710] sm:$0xff]  ;;  %v9307_v16 = vld [vmem:[%s9743_s10 + $0x708] sm:$0xff] }
 0x38a   : > { %7770 = vmatpush.bf16.msra.mxu2 %v9296_v5  ;;  %v9323_v14 = vld [vmem:[%s9743_s10 + $0x788] sm:$0xff] }
 0x38b   : > { %7783 = vmatpush.bf16.msra.mxu3 %v9304_v23  ;;  %v12988_v28 = vadd.f32 %v7531_v34, %v7519_v7  ;;  %v9326_v23 = vld [vmem:[%s9743_s10 + $0x7a0] sm:$0xff]  ;;  %v9315_v7 = vld [vmem:[%s9743_s10 + $0x748] sm:$0xff]  ;;  %v5269_v34 = vld [vmem:[#allocation2 + $0x78] sm:$0xff] }
 0x38c   : > { %7745 = vmatpush.bf16.msra.mxu0 %v9279_v35  ;;  %v9334_v35 = vld [vmem:[%s9743_s10 + $0x7e0] sm:$0xff] }
 0x38d   : > { %7758 = vmatpush.bf16.msra.mxu1 %v9287_v56 }
 0x38e   : > { %7771 = vmatpush.bf16.msra.mxu2 %v9295_v62  ;;  %v9309_v62 = vld [vmem:[%s9743_s10 + $0x718] sm:$0xff] }
 0x38f   : > { %7784 = vmatpush.bf16.msra.mxu3 %v9303_v20  ;;  %v9317_v20 = vld [vmem:[%s9743_s10 + $0x758] sm:$0xff] }
 0x390   : > { %7746 = vmatpush.bf16.msra.mxu0 %v9278_v45  ;;  %v7520_v39 = vpop.f32.mrf.mxu2  ;;  %v9333_v45 = vld [vmem:[%s9743_s10 + $0x7d8] sm:$0xff] }
 0x391   : > { %7759 = vmatpush.bf16.msra.mxu1 %v9286_v6  ;;  %v7533_v18 = vpop.f32.mrf.mxu3 }
 0x392   : > { %7772 = vmatpush.bf16.msra.mxu2 %v9294_v27 }
 0x393   : > { %7785 = vmatpush.bf16.msra.mxu3 %v9302_v31 }
 0x394   : > { %7747 = vmatpush.bf16.msra.mxu0 %v9277_v0  ;;  %v9316_v0 = vld [vmem:[%s9743_s10 + $0x750] sm:$0xff] }
 0x395   : > { %7760 = vmatpush.bf16.msra.mxu1 %v9285_v1 }
 0x396   : > { %7773 = vmatpush.bf16.msra.mxu2 %v9293_v46  ;;  %v9324_v46 = vld [vmem:[%s9743_s10 + $0x790] sm:$0xff] }
 0x397   : > { %7786 = vmatpush.bf16.msra.mxu3 %v9301_v61  ;;  %v9332_v61 = vld [vmem:[%s9743_s10 + $0x7d0] sm:$0xff] }
 0x398   : > { %7748 = vmatpush.bf16.msra.mxu0 %v9276_v52  ;;  %v9331_v52 = vld [vmem:[%s9743_s10 + $0x7c8] sm:$0xff] }
 0x399   : > { %7761 = vmatpush.bf16.msra.mxu1 %v9284_v50  ;;  %v5270_v50 = vld [vmem:[#allocation2 + $0x28] sm:$0xff] }
 0x39a   : > { %7774 = vmatpush.bf16.msra.mxu2 %v9292_v17  ;;  %v5827_v17 = vunpack.c.l.b16 %v5269_v34 }
 0x39b   : > { %7787 = vmatpush.bf16.msra.mxu3 %v9300_v60  ;;  %v5828_v60 = vunpack.c.h.b16 %v5269_v34 }
 0x39c   : > { %7749 = vmatpush.bf16.msra.mxu0 %v9275_v48  ;;  %v9306_v48 = vld [vmem:[%s9743_s10 + $0x700] sm:$0xff]  ;;  %v5859_v39 = vpack.c.b16 %v5827_v17, %v5827_v17 }
 0x39d   : > { %7762 = vmatpush.bf16.msra.mxu1 %v9283_v33  ;;  %v9314_v33 = vld [vmem:[%s9743_s10 + $0x740] sm:$0xff]  ;;  %v5860_v18 = vpack.c.b16 %v5828_v60, %v5828_v60 }
 0x39e   : > { %7775 = vmatpush.bf16.msra.mxu2 %v9291_v26  ;;  %v5829_v26 = vunpack.c.l.b16 %v5270_v50 }
 0x39f   : > { %7788 = vmatpush.bf16.msra.mxu3 %v9299_v19  ;;  %v5830_v19 = vunpack.c.h.b16 %v5270_v50 }
 0x3a0   : > { %7750 = vmatpush.bf16.msra.mxu0 %v9274_v49  ;;  %v7544_v12 = vpop.f32.mrf.mxu0  ;;  %v5861_v49 = vpack.c.b16 %v5829_v26, %v5829_v26 }
 0x3a1   : > { %7763 = vmatpush.bf16.msra.mxu1 %v9282_v40  ;;  %v7545_v63 = vadd.f32 %v7544_v12, %v12988_v28  ;;  %v7557_v5 = vpop.f32.mrf.mxu1  ;;  %v5862_v40 = vpack.c.b16 %v5830_v19, %v5830_v19  ;;  %v5254_v19 = vld [vmem:[#allocation9] sm:$0xff] }
 0x3a2   : > { %7776 = vmatpush.bf16.msra.mxu2 %v9290_v37 }
 0x3a3   : > { %7789 = vmatpush.bf16.msra.mxu3 %v9298_v24  ;;  %7751 = vmatmul.bf16.vlgmr.msra.gmra.mxu0 %v5855_v9  ;;  %v7558_v56 = vadd.f32 %v7557_v5, %v7545_v63 }
 0x3a4   : > { %7795 = vmatpush.bf16.msrb.mxu0 %v9313_v29  ;;  %7764 = vmatmul.bf16.vlgmr.msra.gmra.mxu1 %v5856_v44 }
 0x3a5   : > { %7808 = vmatpush.bf16.msrb.mxu1 %v9321_v51  ;;  %7777 = vmatmul.bf16.vlgmr.msra.gmra.mxu2 %v5857_v22 }
 0x3a6   : > { %7821 = vmatpush.bf16.msrb.mxu2 %v9329_v41  ;;  %7790 = vmatmul.bf16.vlgmr.msra.gmra.mxu3 %v5858_v42 }
 0x3a7   : > { %7834 = vmatpush.bf16.msrb.mxu3 %v9337_v53 }
 0x3a8   : > { %7796 = vmatpush.bf16.msrb.mxu0 %v9312_v13  ;;  %v7570_v6 = vpop.f32.mrf.mxu2  ;;  %v7546_v27 = vpop.f32.mrf.mxu0 }
 0x3a9   : > { %7809 = vmatpush.bf16.msrb.mxu1 %v9320_v3  ;;  %v7571_v55 = vadd.f32 %v7570_v6, %v7558_v56  ;;  %v7583_v10 = vpop.f32.mrf.mxu3  ;;  %v7559_v1 = vpop.f32.mrf.mxu1 }
 0x3aa   : > { %7822 = vmatpush.bf16.msrb.mxu2 %v9328_v54 }
 0x3ab   : > { %7835 = vmatpush.bf16.msrb.mxu3 %v9336_v11  ;;  %v7584_v31 = vadd.f32 %v7583_v10, %v7571_v55 }
 0x3ac   : > { %7797 = vmatpush.bf16.msrb.mxu0 %v9311_v59 }
 0x3ad   : > { %7810 = vmatpush.bf16.msrb.mxu1 %v9319_v2 }
 0x3ae   : > { %7823 = vmatpush.bf16.msrb.mxu2 %v9327_v21 }
 0x3af   : > { %7836 = vmatpush.bf16.msrb.mxu3 %v9335_v43 }
 0x3b0   : > { %7798 = vmatpush.bf16.msrb.mxu0 %v9310_v25  ;;  %v7572_v28 = vpop.f32.mrf.mxu2 }
 0x3b1   : > { %7811 = vmatpush.bf16.msrb.mxu1 %v9318_v36  ;;  %v7585_v38 = vpop.f32.mrf.mxu3 }
 0x3b2   : > { %7824 = vmatpush.bf16.msrb.mxu2 %v9326_v23 }
 0x3b3   : > { %7837 = vmatpush.bf16.msrb.mxu3 %v9334_v35 }
 0x3b4   : > { %7799 = vmatpush.bf16.msrb.mxu0 %v9309_v62 }
 0x3b5   : > { %7812 = vmatpush.bf16.msrb.mxu1 %v9317_v20 }
 0x3b6   : > { %7825 = vmatpush.bf16.msrb.mxu2 %v9325_v30 }
 0x3b7   : > { %7838 = vmatpush.bf16.msrb.mxu3 %v9333_v45 }
 0x3b8   : > { %7800 = vmatpush.bf16.msrb.mxu0 %v9308_v15 }
 0x3b9   : > { %7813 = vmatpush.bf16.msrb.mxu1 %v9316_v0 }
 0x3ba   : > { %7826 = vmatpush.bf16.msrb.mxu2 %v9324_v46 }
 0x3bb   : > { %7839 = vmatpush.bf16.msrb.mxu3 %v9332_v61 }
 0x3bc   : > { %7801 = vmatpush.bf16.msrb.mxu0 %v9307_v16 }
 0x3bd   : > { %7814 = vmatpush.bf16.msrb.mxu1 %v9315_v7 }
 0x3be   : > { %7827 = vmatpush.bf16.msrb.mxu2 %v9323_v14 }
 0x3bf   : > { %7840 = vmatpush.bf16.msrb.mxu3 %v9331_v52 }
 0x3c0   : > { %7802 = vmatpush.bf16.msrb.mxu0 %v9306_v48  ;;  %v7596_v58 = vpop.f32.mrf.mxu0 }
 0x3c1   : > { %7815 = vmatpush.bf16.msrb.mxu1 %v9314_v33  ;;  %v7597_v57 = vadd.f32 %v7596_v58, %v7584_v31  ;;  %v7609_v37 = vpop.f32.mrf.mxu1 }
 0x3c2   : > { %7828 = vmatpush.bf16.msrb.mxu2 %v9322_v47 }
 0x3c3   : > { %7841 = vmatpush.bf16.msrb.mxu3 %v9330_v8  ;;  %7803 = vmatmul.bf16.vlgmr.msrb.gmra.mxu0 %v5859_v39  ;;  %v7610_v24 = vadd.f32 %v7609_v37, %v7597_v57 }
 0x3c4   : > { %7816 = vmatmul.bf16.vlgmr.msrb.gmra.mxu1 %v5860_v18 }
 0x3c5   : > { %7829 = vmatmul.bf16.vlgmr.msrb.gmra.mxu2 %v5861_v49 }
 0x3c6   : > { %7842 = vmatmul.bf16.vlgmr.msrb.gmra.mxu3 %v5862_v40 }
 0x3c8   : > { %v7622_v4 = vpop.f32.mrf.mxu2  ;;  %v7598_v51 = vpop.f32.mrf.mxu0 }
 0x3c9   : > { %v7623_v32 = vadd.f32 %v7622_v4, %v7610_v24  ;;  %v7635_v29 = vpop.f32.mrf.mxu3  ;;  %v7611_v53 = vpop.f32.mrf.mxu1 }
 0x3cb   : > { %v7636_v41 = vadd.f32 %v7635_v29, %v7623_v32 }
 0x3d0   : > { %v7624_v9 = vpop.f32.mrf.mxu2 }
 0x3d1   : > { %v7637_v22 = vpop.f32.mrf.mxu3 }
 0x3e0   : > { %v7648_v44 = vpop.f32.mrf.mxu0 }
 0x3e1   : > { %v7649_v42 = vadd.f32 %v7648_v44, %v7636_v41  ;;  %v7661_v13 = vpop.f32.mrf.mxu1 }
 0x3e3   : > { %v7662_v3 = vadd.f32 %v7661_v13, %v7649_v42 }
 0x3e8   : > { %v7674_v54 = vpop.f32.mrf.mxu2  ;;  %v7650_v2 = vpop.f32.mrf.mxu0 }
 0x3e9   : > { %v7675_v11 = vadd.f32 %v7674_v54, %v7662_v3  ;;  %v7687_v59 = vpop.f32.mrf.mxu3  ;;  %v7663_v43 = vpop.f32.mrf.mxu1 }
 0x3eb   : > { %v7688_v21 = vadd.f32 %v7687_v59, %v7675_v11 }
 0x3f0   : > { %v7676_v12 = vpop.f32.mrf.mxu2 }
 0x3f1   : > { %v7689_v63 = vpop.f32.mrf.mxu3 }
 0x400   : > { %v7700_v25 = vpop.f32.mrf.mxu0 }
 0x401   : > { %v7713_v36 = vpop.f32.mrf.mxu1  ;;  %v7701_v55 = vadd.f32 %v7700_v25, %v7688_v21 }
 0x403   : > { %v7714_v15 = vadd.f32 %v7713_v36, %v7701_v55 }
 0x408   : > { %v7726_v5 = vpop.f32.mrf.mxu2  ;;  %v7702_v35 = vpop.f32.mrf.mxu0 }
 0x409   : > { %v7739_v23 = vpop.f32.mrf.mxu3  ;;  %v7715_v56 = vpop.f32.mrf.mxu1  ;;  %v7727_v0 = vadd.f32 %v7726_v5, %v7714_v15 }
 0x40b   : > { %v7740_v61 = vadd.f32 %v7739_v23, %v7727_v0 }
 0x410   : > { %v7728_v62 = vpop.f32.mrf.mxu2 }
 0x411   : > { %v7741_v20 = vpop.f32.mrf.mxu3 }
 0x420   : > { %v7752_v30 = vpop.f32.mrf.mxu0 }
 0x421   : > { %v7765_v45 = vpop.f32.mrf.mxu1  ;;  %v7753_v16 = vadd.f32 %v7752_v30, %v7740_v61 }
 0x423   : > { %v7766_v7 = vadd.f32 %v7765_v45, %v7753_v16 }
 0x428   : > { %v7778_v6 = vpop.f32.mrf.mxu2  ;;  %v7754_v27 = vpop.f32.mrf.mxu0 }
 0x429   : > { %v7791_v10 = vpop.f32.mrf.mxu3  ;;  %v7767_v31 = vpop.f32.mrf.mxu1  ;;  %v7779_v34 = vadd.f32 %v7778_v6, %v7766_v7 }
 0x42b   : > { %v7792_v14 = vadd.f32 %v7791_v10, %v7779_v34 }
 0x430   : > { %v7780_v1 = vpop.f32.mrf.mxu2 }
 0x431   : > { %v7793_v46 = vpop.f32.mrf.mxu3 }
 0x440   : > { %v7804_v52 = vpop.f32.mrf.mxu0 }
 0x441   : > { %v7817_v50 = vpop.f32.mrf.mxu1  ;;  %v7805_v28 = vadd.f32 %v7804_v52, %v7792_v14 }
 0x443   : > { %v7818_v38 = vadd.f32 %v7817_v50, %v7805_v28 }
 0x448   : > { %v7830_v17 = vpop.f32.mrf.mxu2  ;;  %v7806_v33 = vpop.f32.mrf.mxu0 }
 0x449   : > { %v7843_v60 = vpop.f32.mrf.mxu3  ;;  %v7831_v48 = vadd.f32 %v7830_v17, %v7818_v38  ;;  %v7819_v26 = vpop.f32.mrf.mxu1 }
 0x44b   : > { %v7844_v47 = vadd.f32 %v7843_v60, %v7831_v48 }
 0x44d   : > { %v7847_v8 = vadd.f32 %v7844_v47, %v5254_v19 }
 0x44f   : > { %7848 = vst [vmem:[#allocation9] sm:$0xff] %v7847_v8 }
 0x450   : > { %v7832_v39 = vpop.f32.mrf.mxu2  ;;  %9349 = dma.vmem_to_hbm [thread:$0]  (%p9368_p2), %s7858_s21, 128, %s7860_s22, [#allocation5]  }
 0x451   : > { %v7845_v18 = vpop.f32.mrf.mxu3 }
 0x452   : > { %9587 = dma.done.wait (%p9368_p2), [#allocation5], 128  }
 0x453   : > { %9589 = vsyncadd (%p9368_p2), [#allocation5], 4294967168 }
 0x454 PF: > { %s18_s17 = sadd.s32 1, %s9612_s17   ;;  %s13431_s12 = smov %s9596_s13 }
 0x455   : > { %p15_p3 = scmp.ge.s32.totalorder %s18_s17, 5   ;;  %s13432_s13 = smov %s9600_s14 }
 0x456   : > { %s13433_s14 = smov %s9731_s29  ;;  %s13434_s15 = smov %s9608_s16 }
 0x457   : > { %s13435_s16 = smov %s13437_s7  ;;  %17 = sbr.rel (!%p15_p3) target bundleno = 6 (0x6), region = 84 }
 0x45c   :  { %7873 = vsyncpa [#allocation4], 1 }
 0x45d   :  { %7875 = vsyncpa [#allocation4 + $0x1], 1 }
 0x45e   :  { %7876 = vsyncpa [#allocation7], 1 }
 0x45f   :  { %7878 = vsyncpa [#allocation7 + $0x1], 1 }
 0x460   :  { %7879 = vsyncpa [#allocation5], 1 }
 0x461   :  { %7881 = vsyncpa [#allocation5 + $0x1], 1 }

</bundles_post_ra>
